<compile_context>
chip_gen: v7x
topology: tpu7x:2x2x1
jax: 0.10.0
libtpu: 0.0.40
codegen_flags: <defaults>
</compile_context>

<pallas_src>
import jax
import jax.numpy as jnp
import numpy as np
from jax.experimental import pallas as pl
from jax.experimental.pallas import tpu as pltpu

NUM_HEAD = 2
NUM_CLASS = 8
_VMEM_LIMIT = 32 * 1024 * 1024


def _hswish(x):
    # h_swish: x * relu6(x + 3) / 6
    return x * (jnp.clip(x + 3.0, 0.0, 6.0) * (1.0 / 6.0))


def _dot_bf16(a, b):
    # bf16 operands, f32 accumulation: single MXU pass on v5e/v6e/v7x.
    return jnp.dot(a.astype(jnp.bfloat16), b.astype(jnp.bfloat16),
                   preferred_element_type=jnp.float32)


# ----------------------------------------------------------------------------
# Kernel 1: CoordAtt heads (batched over Bt samples, shared conv1 weight push)
#           + max-fuse + (x * att) + depthwise 7x7 Linear_block + BN
#           ->  attention maps (sublane-dense) + pooled (C,)
# ----------------------------------------------------------------------------
def _coordatt_pool_kernel(x_ref,
                          wh_ref, bnh_s_ref, bnh_b_ref,
                          ww_ref, bnw_s_ref, bnw_b_ref,
                          w1cat_ref, b1_ref, bn1_s_ref, bn1_b_ref,
                          w2_ref, b2_ref, w3_ref, b3_ref,
                          wlin_ref, bnlin_s_ref, bnlin_b_ref,
                          att_ref, pooled_ref):
    x = x_ref[...]                                              # (Bt, H, W, C) f32
    Bt, H, W, C = x.shape                                       # H == W (7x7 maps)
    mip = w1cat_ref.shape[1] // NUM_HEAD

    # --- depthwise Linear_h / Linear_w + folded BN for both heads ----------
    rows = []
    for i in range(NUM_HEAD):                                   # unrolled, NUM_HEAD=2
        # Linear_h: depthwise (1,7) conv + BN -> per-channel weighted sum over W
        x_h = jnp.sum(x * wh_ref[i][None, None, :, :], axis=2)  # (Bt, H, C)
        x_h = x_h * bnh_s_ref[i] + bnh_b_ref[i]
        # Linear_w: depthwise (7,1) conv + BN -> per-channel weighted sum over H
        x_w = jnp.sum(x * ww_ref[i][None, :, None, :], axis=1)  # (Bt, W, C)
        x_w = x_w * bnw_s_ref[i] + bnw_b_ref[i]
        rows.append(x_h)
        rows.append(x_w)
    # stack both branches of both heads -> ONE conv1 matmul (single MXU
    # weight push of the concatenated (C, NH*mip) weight)
    rows = jnp.concatenate(rows, axis=0)                        # (2*NH*Bt, H, C)
    rows2d = rows.reshape(2 * NUM_HEAD * Bt * H, C)
    y_all = _dot_bf16(rows2d, w1cat_ref[...])                   # (2*NH*Bt*H, NH*mip)

    att_flat = []
    y_max = None
    for i in range(NUM_HEAD):
        blk = y_all[2 * i * Bt * H:(2 * i + 2) * Bt * H,
                    i * mip:(i + 1) * mip]                      # (2*Bt*H, mip)
        blk = blk + b1_ref[i]
        blk = _hswish(blk * bn1_s_ref[i] + bn1_b_ref[i])        # bn1 + h_swish
        y_h = blk[:Bt * H]                                      # (Bt*H, mip)
        y_w = blk[Bt * H:]                                      # (Bt*W, mip)
        # conv2 / conv3 (1x1, mip -> C) + sigmoid
        s_h = jax.nn.sigmoid(_dot_bf16(y_h, w2_ref[i]) + b2_ref[i]).reshape(Bt, H, C)
        s_w = jax.nn.sigmoid(_dot_bf16(y_w, w3_ref[i]) + b3_ref[i]).reshape(Bt, W, C)
        # attention map: expand(h, w) product
        att = s_h[:, :, None, :] * s_w[:, None, :, :]           # (Bt, H, W, C)
        y_max = att if y_max is None else jnp.maximum(y_max, att)
        att_flat.append(att.reshape(Bt, H * W, C))
    # single fused sublane/lane-dense store of all heads: (Bt, NH*H*W, C)
    att_ref[...] = jnp.concatenate(att_flat, axis=1)

    # y = x * max_i(att_i); self.Linear: depthwise (7,7) conv + BN -> (Bt, C)
    # (4-D contraction, no retiling reshape of x / wlin)
    pooled = jnp.sum((x * y_max) * wlin_ref[...][None], axis=(1, 2))
    pooled_ref[...] = pooled * bnlin_s_ref[...] + bnlin_b_ref[...]


def _full_spec(arr):
    nd = arr.ndim
    return pl.BlockSpec(arr.shape, lambda *_, _nd=nd: (0,) * _nd)


def _pick_bt(n):
    """Samples per grid step.

    Large enough to amortize the ~0.35us/step overhead and fill the MXU,
    small enough for VMEM; keep >=2 grid steps for N >= 16 (v7x megacore)
    while keeping the pooled-output sublane dim a multiple of 8.
    """
    if n < 16:
        return max(n, 1)
    bt = 16
    if -(-n // bt) < 2:
        bt = 8
    return bt


def coordatt_pool(x, head_p, lin_p):
    """x: (N, H, W, C) features -> (att (N, NH, H, W, C), pooled (N, C))."""
    N, H, W, C = x.shape
    Bt = _pick_bt(N)
    NB = -(-N // Bt)
    Np = NB * Bt
    if Np != N:                               # pad batch to a multiple of Bt
        x = jnp.pad(x, ((0, Np - N), (0, 0), (0, 0), (0, 0)))
    # one shared conv1 weight push for both heads: concat along output columns
    w1cat = jnp.concatenate([head_p['w1'][i] for i in range(NUM_HEAD)], axis=1)
    params = [head_p['wh'], head_p['bnh_s'], head_p['bnh_b'],
              head_p['ww'], head_p['bnw_s'], head_p['bnw_b'],
              w1cat, head_p['b1'], head_p['bn1_s'], head_p['bn1_b'],
              head_p['w2'], head_p['b2'], head_p['w3'], head_p['b3'],
              lin_p['wlin'], lin_p['bnlin_s'], lin_p['bnlin_b']]
    att, pooled = pl.pallas_call(
        _coordatt_pool_kernel,
        grid=(NB,),
        in_specs=[pl.BlockSpec((Bt, H, W, C), lambda n: (n, 0, 0, 0))]
                 + [_full_spec(p) for p in params],
        out_specs=[pl.BlockSpec((Bt, NUM_HEAD * H * W, C), lambda n: (n, 0, 0)),
                   pl.BlockSpec((Bt, C), lambda n: (n, 0))],
        out_shape=(jax.ShapeDtypeStruct((Np, NUM_HEAD * H * W, C), jnp.float32),
                   jax.ShapeDtypeStruct((Np, C), jnp.float32)),
        compiler_params=pltpu.CompilerParams(
            dimension_semantics=("parallel",),
            vmem_limit_bytes=_VMEM_LIMIT),
    )(x, *params)
    # (Np, NH*H*W, C) is contiguous -> free reshape back to per-head maps
    att = att[:N].reshape(N, NUM_HEAD, H, W, C)
    return att, pooled[:N]


# ----------------------------------------------------------------------------
# Kernel 2: fully-connected layer, full-K weight tile, lane-dense column
#           blocks (+ optional folded BatchNorm1d + LeakyReLU(0.2)); bf16
#           weights streamed block-by-block.
# ----------------------------------------------------------------------------
def _fc_bn_act_kernel(y_ref, w_ref, b_ref, s_ref, t_ref, out_ref):
    r = jnp.dot(y_ref[...].astype(jnp.bfloat16), w_ref[...],
                preferred_element_type=jnp.float32) + b_ref[...]
    r = r * s_ref[...] + t_ref[...]                              # folded BatchNorm1d
    out_ref[...] = jnp.where(r >= 0.0, r, 0.2 * r)               # LeakyReLU(0.2)


def _fc_plain_kernel(y_ref, w_ref, b_ref, out_ref):
    out_ref[...] = jnp.dot(y_ref[...].astype(jnp.bfloat16), w_ref[...],
                           preferred_element_type=jnp.float32) + b_ref[...]


def _pick_tn(K, nout, max_bytes=4 * 1024 * 1024):
    """Lane-dense output column tile.

    Prefer >=2 blocks on the parallel axis (v7x megacore) and cap the bf16
    weight block (K x tn) at ~4 MiB so double-buffering stays well inside
    scoped VMEM on every chip.
    """
    if nout <= 128 or nout % 128 != 0:
        return nout
    tn = nout
    while tn % 2 == 0 and (tn // 2) % 128 == 0 and (
            nout // tn < 2 or K * tn * 2 > max_bytes):
        tn //= 2
    return tn


def _fc_layer(y, w, b, s, t, *, bn_act):
    M, K = y.shape
    Kw, nout = w.shape
    assert Kw == K
    tn = _pick_tn(K, nout)
    grid = (nout // tn,)
    col = lambda j: (0, j)
    row = lambda j: (0, 0)
    if bn_act:
        kernel = _fc_bn_act_kernel
        operands = (y, w, b, s, t)
        in_specs = [pl.BlockSpec((M, K), row),
                    pl.BlockSpec((K, tn), col),
                    pl.BlockSpec((1, tn), col),
                    pl.BlockSpec((1, tn), col),
                    pl.BlockSpec((1, tn), col)]
    else:                                      # plain linear output head
        kernel = _fc_plain_kernel
        operands = (y, w, b)
        in_specs = [pl.BlockSpec((M, K), row),
                    pl.BlockSpec((K, tn), col),
                    pl.BlockSpec((1, tn), col)]
    return pl.pallas_call(
        kernel,
        grid=grid,
        in_specs=in_specs,
        out_specs=pl.BlockSpec((M, tn), col),
        out_shape=jax.ShapeDtypeStruct((M, nout), jnp.float32),
        compiler_params=pltpu.CompilerParams(
            dimension_semantics=("parallel",),
            vmem_limit_bytes=_VMEM_LIMIT),
    )(*operands)


def mlp_head(feat, mp):
    """fc1..fc4 (+BN1d+LeakyReLU, dropout=id) then the padded output layer."""
    y = feat
    for j in range(1, 5):
        y = _fc_layer(y, mp[f'w{j}'], mp[f'b{j}'], mp[f's{j}'], mp[f't{j}'],
                      bn_act=True)
    return _fc_layer(y, mp['wo'], mp['bo'], None, None, bn_act=False)


def ddamnet_smirk_forward(orig_feat, smirk_feat, params):
    """orig_feat / smirk_feat: backbone feature maps (N, H, W, C)."""
    head_p, lin_p, mlp_p = params['heads'], params['linear'], params['mlp']
    orig_att, orig_pool = coordatt_pool(orig_feat, head_p, lin_p)
    smirk_att, smirk_pool = coordatt_pool(smirk_feat, head_p, lin_p)
    feat = jnp.concatenate([orig_pool, smirk_pool], axis=1)      # flatten(cat)
    out = mlp_head(feat, mlp_p)[:, :NUM_CLASS + 2]               # drop lane padding
    expression = out[:, :NUM_CLASS]
    arousal = out[:, NUM_CLASS]
    valence = out[:, NUM_CLASS + 1]
    orig_heads = [orig_att[:, i] for i in range(NUM_HEAD)]
    smirk_heads = [smirk_att[:, i] for i in range(NUM_HEAD)]
    return expression, orig_heads, smirk_heads, arousal, valence


# ----------------------------------------------------------------------------
# Deterministic parameter construction (folded BN, bf16 matmul weights)
# ----------------------------------------------------------------------------
def _bn_fold(key, n, eps=1e-5):
    k1, k2, k3, k4 = jax.random.split(key, 4)
    gamma = 1.0 + 0.1 * jax.random.normal(k1, (n,), jnp.float32)
    beta = 0.1 * jax.random.normal(k2, (n,), jnp.float32)
    mean = 0.1 * jax.random.normal(k3, (n,), jnp.float32)
    var = 0.5 + jax.random.uniform(k4, (n,), jnp.float32)
    scale = gamma / jnp.sqrt(var + eps)
    shift = beta - mean * scale
    return scale[None, :], shift[None, :]


def init_params(key, C, H, W, hid, num_class):
    mip = max(8, C // 32)           # CoordAtt(inp, oup, groups=32)
    keys = list(jax.random.split(key, 64))
    ki = iter(keys)

    def nrm(shape, scale=0.05):
        return scale * jax.random.normal(next(ki), shape, jnp.float32)

    wh, bnh_s, bnh_b = [], [], []
    ww_, bnw_s, bnw_b = [], [], []
    w1, b1, bn1_s, bn1_b = [], [], [], []
    w2, b2, w3, b3 = [], [], [], []
    for _ in range(NUM_HEAD):
        wh.append(nrm((W, C)))                      # Linear_h depthwise (1,7), no bias
        s, t = _bn_fold(next(ki), C); bnh_s.append(s); bnh_b.append(t)
        ww_.append(nrm((H, C)))                     # Linear_w depthwise (7,1), no bias
        s, t = _bn_fold(next(ki), C); bnw_s.append(s); bnw_b.append(t)
        w1.append(nrm((C, mip)).astype(jnp.bfloat16)); b1.append(nrm((1, mip)))
        s, t = _bn_fold(next(ki), mip); bn1_s.append(s); bn1_b.append(t)
        w2.append(nrm((mip, C)).astype(jnp.bfloat16)); b2.append(nrm((1, C)))
        w3.append(nrm((mip, C)).astype(jnp.bfloat16)); b3.append(nrm((1, C)))
    heads = dict(
        wh=jnp.stack(wh), bnh_s=jnp.stack(bnh_s), bnh_b=jnp.stack(bnh_b),
        ww=jnp.stack(ww_), bnw_s=jnp.stack(bnw_s), bnw_b=jnp.stack(bnw_b),
        w1=jnp.stack(w1), b1=jnp.stack(b1),
        bn1_s=jnp.stack(bn1_s), bn1_b=jnp.stack(bn1_b),
        w2=jnp.stack(w2), b2=jnp.stack(b2),
        w3=jnp.stack(w3), b3=jnp.stack(b3))

    # shared Linear_block(C, C, groups=C, kernel=(7,7)) + BN (no conv bias)
    s, t = _bn_fold(next(ki), C)
    linear = dict(wlin=nrm((H, W, C)), bnlin_s=s, bnlin_b=t)

    # MLP head (bf16 weights; output layer padded to a lane-dense width)
    mlp = {}
    dims = [(2 * C, hid), (hid, hid), (hid, hid), (hid, hid)]
    for j, (din, dout) in enumerate(dims, start=1):
        mlp[f'w{j}'] = nrm((din, dout)).astype(jnp.bfloat16)
        mlp[f'b{j}'] = nrm((1, dout))
        s, t = _bn_fold(next(ki), dout)
        mlp[f's{j}'] = s
        mlp[f't{j}'] = t
    out_dim = num_class + 2
    out_pad = ((out_dim + 127) // 128) * 128
    wo = jnp.zeros((hid, out_pad), jnp.float32).at[:, :out_dim].set(nrm((hid, out_dim)))
    bo = jnp.zeros((1, out_pad), jnp.float32).at[:, :out_dim].set(nrm((1, out_dim)))
    mlp['wo'] = wo.astype(jnp.bfloat16)
    mlp['bo'] = bo
    return dict(heads=heads, linear=linear, mlp=mlp)


# ----------------------------------------------------------------------------
# Pure-JAX reference (same math, incl. bf16 matmul operands) for correctness
# ----------------------------------------------------------------------------
def _reference_forward(orig_feat, smirk_feat, params):
    hp, lp, mp = params['heads'], params['linear'], params['mlp']

    def coordatt_ref(x):
        N, H, W, C = x.shape
        atts = []
        for i in range(NUM_HEAD):
            x_h = jnp.sum(x * hp['wh'][i][None, None, :, :], axis=2)
            x_h = x_h * hp['bnh_s'][i] + hp['bnh_b'][i]          # (N, H, C)
            x_w = jnp.sum(x * hp['ww'][i][None, :, None, :], axis=1)
            x_w = x_w * hp['bnw_s'][i] + hp['bnw_b'][i]          # (N, W, C)
            cat = jnp.concatenate([x_h, x_w], axis=1)            # (N, H+W, C)
            y = _dot_bf16(cat.reshape(N * (H + W), C), hp['w1'][i]) + hp['b1'][i]
            y = _hswish(y * hp['bn1_s'][i] + hp['bn1_b'][i])
            y = y.reshape(N, H + W, -1)
            y_h = y[:, :H].reshape(N * H, -1)
            y_w = y[:, H:].reshape(N * W, -1)
            s_h = jax.nn.sigmoid(_dot_bf16(y_h, hp['w2'][i]) + hp['b2'][i]).reshape(N, H, C)
            s_w = jax.nn.sigmoid(_dot_bf16(y_w, hp['w3'][i]) + hp['b3'][i]).reshape(N, W, C)
            atts.append(s_h[:, :, None, :] * s_w[:, None, :, :])
        y = atts[0]
        for i in range(1, NUM_HEAD):
            y = jnp.maximum(y, atts[i])
        z = (x * y).reshape(N, H * W, C)
        pooled = jnp.sum(z * lp['wlin'].reshape(1, H * W, C), axis=1)
        pooled = pooled * lp['bnlin_s'] + lp['bnlin_b']
        return atts, pooled

    o_atts, o_pool = coordatt_ref(orig_feat)
    s_atts, s_pool = coordatt_ref(smirk_feat)
    y = jnp.concatenate([o_pool, s_pool], axis=1)
    for j in range(1, 5):
        y = _dot_bf16(y, mp[f'w{j}']) + mp[f'b{j}']
        y = y * mp[f's{j}'] + mp[f't{j}']
        y = jnp.where(y >= 0.0, y, 0.2 * y)
    out = _dot_bf16(y, mp['wo']) + mp['bo']
    return out[:, :NUM_CLASS + 2], o_atts, s_atts


if __name__ == "__main__":
    key = jax.random.PRNGKey(0)
    k_in1, k_in2, k_p = jax.random.split(key, 3)

    # Small stand-in for the real (N, 7, 7, 512) backbone features:
    N, H, W, C = 2, 7, 7, 64
    HID = 256                       # small stand-in for the 2048 hidden width

    orig_feat = jax.random.normal(k_in1, (N, H, W, C), jnp.float32)
    smirk_feat = jax.random.normal(k_in2, (N, H, W, C), jnp.float32)
    params = init_params(k_p, C, H, W, HID, NUM_CLASS)

    expr, orig_heads, smirk_heads, arousal, valence = ddamnet_smirk_forward(
        orig_feat, smirk_feat, params)
    jax.block_until_ready((expr, orig_heads, smirk_heads, arousal, valence))

    # correctness check vs pure-JAX reference (same bf16-matmul math)
    ref_out, ref_o_atts, ref_s_atts = _reference_forward(orig_feat, smirk_feat, params)
    np.testing.assert_allclose(np.asarray(expr), np.asarray(ref_out[:, :NUM_CLASS]),
                               rtol=5e-3, atol=5e-3)
    np.testing.assert_allclose(np.asarray(arousal), np.asarray(ref_out[:, NUM_CLASS]),
                               rtol=5e-3, atol=5e-3)
    np.testing.assert_allclose(np.asarray(valence), np.asarray(ref_out[:, NUM_CLASS + 1]),
                               rtol=5e-3, atol=5e-3)
    for i in range(NUM_HEAD):
        np.testing.assert_allclose(np.asarray(orig_heads[i]), np.asarray(ref_o_atts[i]),
                                   rtol=5e-3, atol=5e-3)
        np.testing.assert_allclose(np.asarray(smirk_heads[i]), np.asarray(ref_s_atts[i]),
                                   rtol=5e-3, atol=5e-3)

    print("KERNEL_OK")
</pallas_src>

<mosaic_0001>
module attributes {stable_mosaic.version = 11 : i64} {
  func.func @_coordatt_pool_kernel(%arg0: i32, %arg1: memref<2x7x7x64xf32, #tpu.memory_space<vmem>>, %arg2: memref<2x7x64xf32, #tpu.memory_space<vmem>>, %arg3: memref<2x1x64xf32, #tpu.memory_space<vmem>>, %arg4: memref<2x1x64xf32, #tpu.memory_space<vmem>>, %arg5: memref<2x7x64xf32, #tpu.memory_space<vmem>>, %arg6: memref<2x1x64xf32, #tpu.memory_space<vmem>>, %arg7: memref<2x1x64xf32, #tpu.memory_space<vmem>>, %arg8: memref<64x16xbf16, #tpu.memory_space<vmem>>, %arg9: memref<2x1x8xf32, #tpu.memory_space<vmem>>, %arg10: memref<2x1x8xf32, #tpu.memory_space<vmem>>, %arg11: memref<2x1x8xf32, #tpu.memory_space<vmem>>, %arg12: memref<2x8x64xbf16, #tpu.memory_space<vmem>>, %arg13: memref<2x1x64xf32, #tpu.memory_space<vmem>>, %arg14: memref<2x8x64xbf16, #tpu.memory_space<vmem>>, %arg15: memref<2x1x64xf32, #tpu.memory_space<vmem>>, %arg16: memref<7x7x64xf32, #tpu.memory_space<vmem>>, %arg17: memref<1x64xf32, #tpu.memory_space<vmem>>, %arg18: memref<1x64xf32, #tpu.memory_space<vmem>>, %arg19: memref<2x98x64xf32, #tpu.memory_space<vmem>>, %arg20: memref<2x64xf32, #tpu.memory_space<vmem>>) attributes {dimension_semantics = [#tpu.dimension_semantics<parallel>], iteration_bounds = array<i64: 1>, scalar_prefetch = 0 : i64, scratch_operands = 0 : i64, tpu.core_type = #tpu.core_type<tc>, window_params = [{transform_indices = @transform_0, window_bounds = array<i64: 2, 7, 7, 64>}, {pipeline_mode = #tpu.pipeline_mode<synchronous>, transform_indices = @transform_1, window_bounds = array<i64: 2, 7, 64>}, {pipeline_mode = #tpu.pipeline_mode<synchronous>, transform_indices = @transform_2, window_bounds = array<i64: 2, 1, 64>}, {pipeline_mode = #tpu.pipeline_mode<synchronous>, transform_indices = @transform_3, window_bounds = array<i64: 2, 1, 64>}, {pipeline_mode = #tpu.pipeline_mode<synchronous>, transform_indices = @transform_4, window_bounds = array<i64: 2, 7, 64>}, {pipeline_mode = #tpu.pipeline_mode<synchronous>, transform_indices = @transform_5, window_bounds = array<i64: 2, 1, 64>}, {pipeline_mode = #tpu.pipeline_mode<synchronous>, transform_indices = @transform_6, window_bounds = array<i64: 2, 1, 64>}, {pipeline_mode = #tpu.pipeline_mode<synchronous>, transform_indices = @transform_7, window_bounds = array<i64: 64, 16>}, {pipeline_mode = #tpu.pipeline_mode<synchronous>, transform_indices = @transform_8, window_bounds = array<i64: 2, 1, 8>}, {pipeline_mode = #tpu.pipeline_mode<synchronous>, transform_indices = @transform_9, window_bounds = array<i64: 2, 1, 8>}, {pipeline_mode = #tpu.pipeline_mode<synchronous>, transform_indices = @transform_10, window_bounds = array<i64: 2, 1, 8>}, {pipeline_mode = #tpu.pipeline_mode<synchronous>, transform_indices = @transform_11, window_bounds = array<i64: 2, 8, 64>}, {pipeline_mode = #tpu.pipeline_mode<synchronous>, transform_indices = @transform_12, window_bounds = array<i64: 2, 1, 64>}, {pipeline_mode = #tpu.pipeline_mode<synchronous>, transform_indices = @transform_13, window_bounds = array<i64: 2, 8, 64>}, {pipeline_mode = #tpu.pipeline_mode<synchronous>, transform_indices = @transform_14, window_bounds = array<i64: 2, 1, 64>}, {pipeline_mode = #tpu.pipeline_mode<synchronous>, transform_indices = @transform_15, window_bounds = array<i64: 7, 7, 64>}, {pipeline_mode = #tpu.pipeline_mode<synchronous>, transform_indices = @transform_16, window_bounds = array<i64: 1, 64>}, {pipeline_mode = #tpu.pipeline_mode<synchronous>, transform_indices = @transform_17, window_bounds = array<i64: 1, 64>}, {transform_indices = @transform_18, window_bounds = array<i64: 2, 98, 64>}, {transform_indices = @transform_19, window_bounds = array<i64: 2, 64>}]} {
    %c0 = arith.constant 0 : index
    %c0_0 = arith.constant 0 : index
    %c0_1 = arith.constant 0 : index
    %c0_2 = arith.constant 0 : index
    %0 = vector.load %arg1[%c0, %c0_0, %c0_1, %c0_2] : memref<2x7x7x64xf32, #tpu.memory_space<vmem>>, vector<2x7x7x64xf32>
    %c0_3 = arith.constant 0 : index
    %c0_4 = arith.constant 0 : index
    %c0_5 = arith.constant 0 : index
    %1 = vector.load %arg2[%c0_3, %c0_4, %c0_5] : memref<2x7x64xf32, #tpu.memory_space<vmem>>, vector<1x7x64xf32>
    %2 = vector.shape_cast %1 : vector<1x7x64xf32> to vector<7x64xf32>
    %3 = vector.shape_cast %2 : vector<7x64xf32> to vector<1x1x7x64xf32>
    %4 = vector.broadcast %3 : vector<1x1x7x64xf32> to vector<2x7x7x64xf32>
    %5 = arith.mulf %0, %4 : vector<2x7x7x64xf32>
    %cst = arith.constant dense<0.000000e+00> : vector<2x7x64xf32>
    %6 = vector.multi_reduction <add>, %5, %cst [2] : vector<2x7x7x64xf32> to vector<2x7x64xf32>
    %c0_6 = arith.constant 0 : index
    %c0_7 = arith.constant 0 : index
    %c0_8 = arith.constant 0 : index
    %7 = vector.load %arg3[%c0_6, %c0_7, %c0_8] : memref<2x1x64xf32, #tpu.memory_space<vmem>>, vector<1x1x64xf32>
    %8 = vector.shape_cast %7 : vector<1x1x64xf32> to vector<1x64xf32>
    %9 = vector.shape_cast %8 : vector<1x64xf32> to vector<1x1x64xf32>
    %10 = vector.broadcast %9 : vector<1x1x64xf32> to vector<2x7x64xf32>
    %11 = arith.mulf %6, %10 : vector<2x7x64xf32>
    %c0_9 = arith.constant 0 : index
    %c0_10 = arith.constant 0 : index
    %c0_11 = arith.constant 0 : index
    %12 = vector.load %arg4[%c0_9, %c0_10, %c0_11] : memref<2x1x64xf32, #tpu.memory_space<vmem>>, vector<1x1x64xf32>
    %13 = vector.shape_cast %12 : vector<1x1x64xf32> to vector<1x64xf32>
    %14 = vector.shape_cast %13 : vector<1x64xf32> to vector<1x1x64xf32>
    %15 = vector.broadcast %14 : vector<1x1x64xf32> to vector<2x7x64xf32>
    %16 = arith.addf %11, %15 : vector<2x7x64xf32>
    %c0_12 = arith.constant 0 : index
    %c0_13 = arith.constant 0 : index
    %c0_14 = arith.constant 0 : index
    %17 = vector.load %arg5[%c0_12, %c0_13, %c0_14] : memref<2x7x64xf32, #tpu.memory_space<vmem>>, vector<1x7x64xf32>
    %18 = vector.shape_cast %17 : vector<1x7x64xf32> to vector<7x64xf32>
    %19 = vector.shape_cast %18 : vector<7x64xf32> to vector<1x7x1x64xf32>
    %20 = vector.broadcast %19 : vector<1x7x1x64xf32> to vector<2x7x7x64xf32>
    %21 = arith.mulf %0, %20 : vector<2x7x7x64xf32>
    %cst_15 = arith.constant dense<0.000000e+00> : vector<2x7x64xf32>
    %22 = vector.multi_reduction <add>, %21, %cst_15 [1] : vector<2x7x7x64xf32> to vector<2x7x64xf32>
    %c0_16 = arith.constant 0 : index
    %c0_17 = arith.constant 0 : index
    %c0_18 = arith.constant 0 : index
    %23 = vector.load %arg6[%c0_16, %c0_17, %c0_18] : memref<2x1x64xf32, #tpu.memory_space<vmem>>, vector<1x1x64xf32>
    %24 = vector.shape_cast %23 : vector<1x1x64xf32> to vector<1x64xf32>
    %25 = vector.shape_cast %24 : vector<1x64xf32> to vector<1x1x64xf32>
    %26 = vector.broadcast %25 : vector<1x1x64xf32> to vector<2x7x64xf32>
    %27 = arith.mulf %22, %26 : vector<2x7x64xf32>
    %c0_19 = arith.constant 0 : index
    %c0_20 = arith.constant 0 : index
    %c0_21 = arith.constant 0 : index
    %28 = vector.load %arg7[%c0_19, %c0_20, %c0_21] : memref<2x1x64xf32, #tpu.memory_space<vmem>>, vector<1x1x64xf32>
    %29 = vector.shape_cast %28 : vector<1x1x64xf32> to vector<1x64xf32>
    %30 = vector.shape_cast %29 : vector<1x64xf32> to vector<1x1x64xf32>
    %31 = vector.broadcast %30 : vector<1x1x64xf32> to vector<2x7x64xf32>
    %32 = arith.addf %27, %31 : vector<2x7x64xf32>
    %c1 = arith.constant 1 : index
    %c0_22 = arith.constant 0 : index
    %c0_23 = arith.constant 0 : index
    %33 = vector.load %arg2[%c1, %c0_22, %c0_23] : memref<2x7x64xf32, #tpu.memory_space<vmem>>, vector<1x7x64xf32>
    %34 = vector.shape_cast %33 : vector<1x7x64xf32> to vector<7x64xf32>
    %35 = vector.shape_cast %34 : vector<7x64xf32> to vector<1x1x7x64xf32>
    %36 = vector.broadcast %35 : vector<1x1x7x64xf32> to vector<2x7x7x64xf32>
    %37 = arith.mulf %0, %36 : vector<2x7x7x64xf32>
    %cst_24 = arith.constant dense<0.000000e+00> : vector<2x7x64xf32>
    %38 = vector.multi_reduction <add>, %37, %cst_24 [2] : vector<2x7x7x64xf32> to vector<2x7x64xf32>
    %c1_25 = arith.constant 1 : index
    %c0_26 = arith.constant 0 : index
    %c0_27 = arith.constant 0 : index
    %39 = vector.load %arg3[%c1_25, %c0_26, %c0_27] : memref<2x1x64xf32, #tpu.memory_space<vmem>>, vector<1x1x64xf32>
    %40 = vector.shape_cast %39 : vector<1x1x64xf32> to vector<1x64xf32>
    %41 = vector.shape_cast %40 : vector<1x64xf32> to vector<1x1x64xf32>
    %42 = vector.broadcast %41 : vector<1x1x64xf32> to vector<2x7x64xf32>
    %43 = arith.mulf %38, %42 : vector<2x7x64xf32>
    %c1_28 = arith.constant 1 : index
    %c0_29 = arith.constant 0 : index
    %c0_30 = arith.constant 0 : index
    %44 = vector.load %arg4[%c1_28, %c0_29, %c0_30] : memref<2x1x64xf32, #tpu.memory_space<vmem>>, vector<1x1x64xf32>
    %45 = vector.shape_cast %44 : vector<1x1x64xf32> to vector<1x64xf32>
    %46 = vector.shape_cast %45 : vector<1x64xf32> to vector<1x1x64xf32>
    %47 = vector.broadcast %46 : vector<1x1x64xf32> to vector<2x7x64xf32>
    %48 = arith.addf %43, %47 : vector<2x7x64xf32>
    %c1_31 = arith.constant 1 : index
    %c0_32 = arith.constant 0 : index
    %c0_33 = arith.constant 0 : index
    %49 = vector.load %arg5[%c1_31, %c0_32, %c0_33] : memref<2x7x64xf32, #tpu.memory_space<vmem>>, vector<1x7x64xf32>
    %50 = vector.shape_cast %49 : vector<1x7x64xf32> to vector<7x64xf32>
    %51 = vector.shape_cast %50 : vector<7x64xf32> to vector<1x7x1x64xf32>
    %52 = vector.broadcast %51 : vector<1x7x1x64xf32> to vector<2x7x7x64xf32>
    %53 = arith.mulf %0, %52 : vector<2x7x7x64xf32>
    %cst_34 = arith.constant dense<0.000000e+00> : vector<2x7x64xf32>
    %54 = vector.multi_reduction <add>, %53, %cst_34 [1] : vector<2x7x7x64xf32> to vector<2x7x64xf32>
    %c1_35 = arith.constant 1 : index
    %c0_36 = arith.constant 0 : index
    %c0_37 = arith.constant 0 : index
    %55 = vector.load %arg6[%c1_35, %c0_36, %c0_37] : memref<2x1x64xf32, #tpu.memory_space<vmem>>, vector<1x1x64xf32>
    %56 = vector.shape_cast %55 : vector<1x1x64xf32> to vector<1x64xf32>
    %57 = vector.shape_cast %56 : vector<1x64xf32> to vector<1x1x64xf32>
    %58 = vector.broadcast %57 : vector<1x1x64xf32> to vector<2x7x64xf32>
    %59 = arith.mulf %54, %58 : vector<2x7x64xf32>
    %c1_38 = arith.constant 1 : index
    %c0_39 = arith.constant 0 : index
    %c0_40 = arith.constant 0 : index
    %60 = vector.load %arg7[%c1_38, %c0_39, %c0_40] : memref<2x1x64xf32, #tpu.memory_space<vmem>>, vector<1x1x64xf32>
    %61 = vector.shape_cast %60 : vector<1x1x64xf32> to vector<1x64xf32>
    %62 = vector.shape_cast %61 : vector<1x64xf32> to vector<1x1x64xf32>
    %63 = vector.broadcast %62 : vector<1x1x64xf32> to vector<2x7x64xf32>
    %64 = arith.addf %59, %63 : vector<2x7x64xf32>
    %65 = tpu.concatenate %16, %32, %48, %64 in 0 : vector<2x7x64xf32>, vector<2x7x64xf32>, vector<2x7x64xf32>, vector<2x7x64xf32> -> vector<8x7x64xf32>
    %66 = vector.shape_cast %65 : vector<8x7x64xf32> to vector<56x64xf32>
    %c0_41 = arith.constant 0 : index
    %c0_42 = arith.constant 0 : index
    %67 = vector.load %arg8[%c0_41, %c0_42] : memref<64x16xbf16, #tpu.memory_space<vmem>>, vector<64x16xbf16>
    %68 = arith.truncf %66 : vector<56x64xf32> to vector<56x64xbf16>
    %cst_43 = arith.constant dense<0.000000e+00> : vector<56x16xf32>
    %69 = tpu.matmul %68, %67, %cst_43 {dimension_numbers = #tpu.dot_dimension_numbers<[1], [0], [0], [1], [0, 0, 1, 1], [], []>} : vector<56x64xbf16>, vector<64x16xbf16>, vector<56x16xf32> -> vector<56x16xf32>
    %70 = vector.extract_strided_slice %69 {offsets = [0, 0], sizes = [28, 8], strides = [1, 1]} : vector<56x16xf32> to vector<28x8xf32>
    %c0_44 = arith.constant 0 : index
    %c0_45 = arith.constant 0 : index
    %c0_46 = arith.constant 0 : index
    %71 = vector.load %arg9[%c0_44, %c0_45, %c0_46] : memref<2x1x8xf32, #tpu.memory_space<vmem>>, vector<1x1x8xf32>
    %72 = vector.shape_cast %71 : vector<1x1x8xf32> to vector<1x8xf32>
    %73 = vector.broadcast %72 : vector<1x8xf32> to vector<28x8xf32>
    %74 = arith.addf %70, %73 : vector<28x8xf32>
    %c0_47 = arith.constant 0 : index
    %c0_48 = arith.constant 0 : index
    %c0_49 = arith.constant 0 : index
    %75 = vector.load %arg10[%c0_47, %c0_48, %c0_49] : memref<2x1x8xf32, #tpu.memory_space<vmem>>, vector<1x1x8xf32>
    %76 = vector.shape_cast %75 : vector<1x1x8xf32> to vector<1x8xf32>
    %77 = vector.broadcast %76 : vector<1x8xf32> to vector<28x8xf32>
    %78 = arith.mulf %74, %77 : vector<28x8xf32>
    %c0_50 = arith.constant 0 : index
    %c0_51 = arith.constant 0 : index
    %c0_52 = arith.constant 0 : index
    %79 = vector.load %arg11[%c0_50, %c0_51, %c0_52] : memref<2x1x8xf32, #tpu.memory_space<vmem>>, vector<1x1x8xf32>
    %80 = vector.shape_cast %79 : vector<1x1x8xf32> to vector<1x8xf32>
    %81 = vector.broadcast %80 : vector<1x8xf32> to vector<28x8xf32>
    %82 = arith.addf %78, %81 : vector<28x8xf32>
    %cst_53 = arith.constant 3.000000e+00 : f32
    %83 = vector.broadcast %cst_53 : f32 to vector<28x8xf32>
    %84 = arith.addf %82, %83 : vector<28x8xf32>
    %cst_54 = arith.constant 0.000000e+00 : f32
    %cst_55 = arith.constant 6.000000e+00 : f32
    %85 = vector.broadcast %cst_54 : f32 to vector<28x8xf32>
    %86 = arith.maximumf %85, %84 : vector<28x8xf32>
    %87 = vector.broadcast %cst_55 : f32 to vector<28x8xf32>
    %88 = arith.minimumf %87, %86 : vector<28x8xf32>
    %cst_56 = arith.constant 0.166666672 : f32
    %89 = vector.broadcast %cst_56 : f32 to vector<28x8xf32>
    %90 = arith.mulf %88, %89 : vector<28x8xf32>
    %91 = arith.mulf %82, %90 : vector<28x8xf32>
    %92 = vector.extract_strided_slice %91 {offsets = [0, 0], sizes = [14, 8], strides = [1, 1]} : vector<28x8xf32> to vector<14x8xf32>
    %93 = vector.extract_strided_slice %91 {offsets = [14, 0], sizes = [14, 8], strides = [1, 1]} : vector<28x8xf32> to vector<14x8xf32>
    %c0_57 = arith.constant 0 : index
    %c0_58 = arith.constant 0 : index
    %c0_59 = arith.constant 0 : index
    %94 = vector.load %arg12[%c0_57, %c0_58, %c0_59] : memref<2x8x64xbf16, #tpu.memory_space<vmem>>, vector<1x8x64xbf16>
    %95 = vector.shape_cast %94 : vector<1x8x64xbf16> to vector<8x64xbf16>
    %96 = arith.truncf %92 : vector<14x8xf32> to vector<14x8xbf16>
    %cst_60 = arith.constant dense<0.000000e+00> : vector<14x64xf32>
    %97 = tpu.matmul %96, %95, %cst_60 {dimension_numbers = #tpu.dot_dimension_numbers<[1], [0], [0], [1], [0, 0, 1, 1], [], []>} : vector<14x8xbf16>, vector<8x64xbf16>, vector<14x64xf32> -> vector<14x64xf32>
    %c0_61 = arith.constant 0 : index
    %c0_62 = arith.constant 0 : index
    %c0_63 = arith.constant 0 : index
    %98 = vector.load %arg13[%c0_61, %c0_62, %c0_63] : memref<2x1x64xf32, #tpu.memory_space<vmem>>, vector<1x1x64xf32>
    %99 = vector.shape_cast %98 : vector<1x1x64xf32> to vector<1x64xf32>
    %100 = vector.broadcast %99 : vector<1x64xf32> to vector<14x64xf32>
    %101 = arith.addf %97, %100 : vector<14x64xf32>
    %102 = arith.negf %101 : vector<14x64xf32>
    %103 = math.exp %102 : vector<14x64xf32>
    %cst_64 = arith.constant 1.000000e+00 : f32
    %104 = vector.broadcast %cst_64 : f32 to vector<14x64xf32>
    %105 = arith.addf %104, %103 : vector<14x64xf32>
    %106 = arith.divf %104, %105 : vector<14x64xf32>
    %107 = vector.shape_cast %106 : vector<14x64xf32> to vector<2x7x64xf32>
    %c0_65 = arith.constant 0 : index
    %c0_66 = arith.constant 0 : index
    %c0_67 = arith.constant 0 : index
    %108 = vector.load %arg14[%c0_65, %c0_66, %c0_67] : memref<2x8x64xbf16, #tpu.memory_space<vmem>>, vector<1x8x64xbf16>
    %109 = vector.shape_cast %108 : vector<1x8x64xbf16> to vector<8x64xbf16>
    %110 = arith.truncf %93 : vector<14x8xf32> to vector<14x8xbf16>
    %cst_68 = arith.constant dense<0.000000e+00> : vector<14x64xf32>
    %111 = tpu.matmul %110, %109, %cst_68 {dimension_numbers = #tpu.dot_dimension_numbers<[1], [0], [0], [1], [0, 0, 1, 1], [], []>} : vector<14x8xbf16>, vector<8x64xbf16>, vector<14x64xf32> -> vector<14x64xf32>
    %c0_69 = arith.constant 0 : index
    %c0_70 = arith.constant 0 : index
    %c0_71 = arith.constant 0 : index
    %112 = vector.load %arg15[%c0_69, %c0_70, %c0_71] : memref<2x1x64xf32, #tpu.memory_space<vmem>>, vector<1x1x64xf32>
    %113 = vector.shape_cast %112 : vector<1x1x64xf32> to vector<1x64xf32>
    %114 = vector.broadcast %113 : vector<1x64xf32> to vector<14x64xf32>
    %115 = arith.addf %111, %114 : vector<14x64xf32>
    %116 = arith.negf %115 : vector<14x64xf32>
    %117 = math.exp %116 : vector<14x64xf32>
    %cst_72 = arith.constant 1.000000e+00 : f32
    %118 = vector.broadcast %cst_72 : f32 to vector<14x64xf32>
    %119 = arith.addf %118, %117 : vector<14x64xf32>
    %120 = arith.divf %118, %119 : vector<14x64xf32>
    %121 = vector.shape_cast %120 : vector<14x64xf32> to vector<2x7x64xf32>
    %122 = vector.shape_cast %107 : vector<2x7x64xf32> to vector<2x7x1x64xf32>
    %123 = vector.shape_cast %121 : vector<2x7x64xf32> to vector<2x1x7x64xf32>
    %124 = vector.broadcast %122 : vector<2x7x1x64xf32> to vector<2x7x7x64xf32>
    %125 = vector.broadcast %123 : vector<2x1x7x64xf32> to vector<2x7x7x64xf32>
    %126 = arith.mulf %124, %125 : vector<2x7x7x64xf32>
    %127 = vector.shape_cast %126 : vector<2x7x7x64xf32> to vector<2x49x64xf32>
    %128 = vector.extract_strided_slice %69 {offsets = [28, 8], sizes = [28, 8], strides = [1, 1]} : vector<56x16xf32> to vector<28x8xf32>
    %c1_73 = arith.constant 1 : index
    %c0_74 = arith.constant 0 : index
    %c0_75 = arith.constant 0 : index
    %129 = vector.load %arg9[%c1_73, %c0_74, %c0_75] : memref<2x1x8xf32, #tpu.memory_space<vmem>>, vector<1x1x8xf32>
    %130 = vector.shape_cast %129 : vector<1x1x8xf32> to vector<1x8xf32>
    %131 = vector.broadcast %130 : vector<1x8xf32> to vector<28x8xf32>
    %132 = arith.addf %128, %131 : vector<28x8xf32>
    %c1_76 = arith.constant 1 : index
    %c0_77 = arith.constant 0 : index
    %c0_78 = arith.constant 0 : index
    %133 = vector.load %arg10[%c1_76, %c0_77, %c0_78] : memref<2x1x8xf32, #tpu.memory_space<vmem>>, vector<1x1x8xf32>
    %134 = vector.shape_cast %133 : vector<1x1x8xf32> to vector<1x8xf32>
    %135 = vector.broadcast %134 : vector<1x8xf32> to vector<28x8xf32>
    %136 = arith.mulf %132, %135 : vector<28x8xf32>
    %c1_79 = arith.constant 1 : index
    %c0_80 = arith.constant 0 : index
    %c0_81 = arith.constant 0 : index
    %137 = vector.load %arg11[%c1_79, %c0_80, %c0_81] : memref<2x1x8xf32, #tpu.memory_space<vmem>>, vector<1x1x8xf32>
    %138 = vector.shape_cast %137 : vector<1x1x8xf32> to vector<1x8xf32>
    %139 = vector.broadcast %138 : vector<1x8xf32> to vector<28x8xf32>
    %140 = arith.addf %136, %139 : vector<28x8xf32>
    %cst_82 = arith.constant 3.000000e+00 : f32
    %141 = vector.broadcast %cst_82 : f32 to vector<28x8xf32>
    %142 = arith.addf %140, %141 : vector<28x8xf32>
    %cst_83 = arith.constant 0.000000e+00 : f32
    %cst_84 = arith.constant 6.000000e+00 : f32
    %143 = vector.broadcast %cst_83 : f32 to vector<28x8xf32>
    %144 = arith.maximumf %143, %142 : vector<28x8xf32>
    %145 = vector.broadcast %cst_84 : f32 to vector<28x8xf32>
    %146 = arith.minimumf %145, %144 : vector<28x8xf32>
    %cst_85 = arith.constant 0.166666672 : f32
    %147 = vector.broadcast %cst_85 : f32 to vector<28x8xf32>
    %148 = arith.mulf %146, %147 : vector<28x8xf32>
    %149 = arith.mulf %140, %148 : vector<28x8xf32>
    %150 = vector.extract_strided_slice %149 {offsets = [0, 0], sizes = [14, 8], strides = [1, 1]} : vector<28x8xf32> to vector<14x8xf32>
    %151 = vector.extract_strided_slice %149 {offsets = [14, 0], sizes = [14, 8], strides = [1, 1]} : vector<28x8xf32> to vector<14x8xf32>
    %c1_86 = arith.constant 1 : index
    %c0_87 = arith.constant 0 : index
    %c0_88 = arith.constant 0 : index
    %152 = vector.load %arg12[%c1_86, %c0_87, %c0_88] : memref<2x8x64xbf16, #tpu.memory_space<vmem>>, vector<1x8x64xbf16>
    %153 = vector.shape_cast %152 : vector<1x8x64xbf16> to vector<8x64xbf16>
    %154 = arith.truncf %150 : vector<14x8xf32> to vector<14x8xbf16>
    %cst_89 = arith.constant dense<0.000000e+00> : vector<14x64xf32>
    %155 = tpu.matmul %154, %153, %cst_89 {dimension_numbers = #tpu.dot_dimension_numbers<[1], [0], [0], [1], [0, 0, 1, 1], [], []>} : vector<14x8xbf16>, vector<8x64xbf16>, vector<14x64xf32> -> vector<14x64xf32>
    %c1_90 = arith.constant 1 : index
    %c0_91 = arith.constant 0 : index
    %c0_92 = arith.constant 0 : index
    %156 = vector.load %arg13[%c1_90, %c0_91, %c0_92] : memref<2x1x64xf32, #tpu.memory_space<vmem>>, vector<1x1x64xf32>
    %157 = vector.shape_cast %156 : vector<1x1x64xf32> to vector<1x64xf32>
    %158 = vector.broadcast %157 : vector<1x64xf32> to vector<14x64xf32>
    %159 = arith.addf %155, %158 : vector<14x64xf32>
    %160 = arith.negf %159 : vector<14x64xf32>
    %161 = math.exp %160 : vector<14x64xf32>
    %cst_93 = arith.constant 1.000000e+00 : f32
    %162 = vector.broadcast %cst_93 : f32 to vector<14x64xf32>
    %163 = arith.addf %162, %161 : vector<14x64xf32>
    %164 = arith.divf %162, %163 : vector<14x64xf32>
    %165 = vector.shape_cast %164 : vector<14x64xf32> to vector<2x7x64xf32>
    %c1_94 = arith.constant 1 : index
    %c0_95 = arith.constant 0 : index
    %c0_96 = arith.constant 0 : index
    %166 = vector.load %arg14[%c1_94, %c0_95, %c0_96] : memref<2x8x64xbf16, #tpu.memory_space<vmem>>, vector<1x8x64xbf16>
    %167 = vector.shape_cast %166 : vector<1x8x64xbf16> to vector<8x64xbf16>
    %168 = arith.truncf %151 : vector<14x8xf32> to vector<14x8xbf16>
    %cst_97 = arith.constant dense<0.000000e+00> : vector<14x64xf32>
    %169 = tpu.matmul %168, %167, %cst_97 {dimension_numbers = #tpu.dot_dimension_numbers<[1], [0], [0], [1], [0, 0, 1, 1], [], []>} : vector<14x8xbf16>, vector<8x64xbf16>, vector<14x64xf32> -> vector<14x64xf32>
    %c1_98 = arith.constant 1 : index
    %c0_99 = arith.constant 0 : index
    %c0_100 = arith.constant 0 : index
    %170 = vector.load %arg15[%c1_98, %c0_99, %c0_100] : memref<2x1x64xf32, #tpu.memory_space<vmem>>, vector<1x1x64xf32>
    %171 = vector.shape_cast %170 : vector<1x1x64xf32> to vector<1x64xf32>
    %172 = vector.broadcast %171 : vector<1x64xf32> to vector<14x64xf32>
    %173 = arith.addf %169, %172 : vector<14x64xf32>
    %174 = arith.negf %173 : vector<14x64xf32>
    %175 = math.exp %174 : vector<14x64xf32>
    %cst_101 = arith.constant 1.000000e+00 : f32
    %176 = vector.broadcast %cst_101 : f32 to vector<14x64xf32>
    %177 = arith.addf %176, %175 : vector<14x64xf32>
    %178 = arith.divf %176, %177 : vector<14x64xf32>
    %179 = vector.shape_cast %178 : vector<14x64xf32> to vector<2x7x64xf32>
    %180 = vector.shape_cast %165 : vector<2x7x64xf32> to vector<2x7x1x64xf32>
    %181 = vector.shape_cast %179 : vector<2x7x64xf32> to vector<2x1x7x64xf32>
    %182 = vector.broadcast %180 : vector<2x7x1x64xf32> to vector<2x7x7x64xf32>
    %183 = vector.broadcast %181 : vector<2x1x7x64xf32> to vector<2x7x7x64xf32>
    %184 = arith.mulf %182, %183 : vector<2x7x7x64xf32>
    %185 = arith.maximumf %126, %184 : vector<2x7x7x64xf32>
    %186 = vector.shape_cast %184 : vector<2x7x7x64xf32> to vector<2x49x64xf32>
    %187 = tpu.concatenate %127, %186 in 1 : vector<2x49x64xf32>, vector<2x49x64xf32> -> vector<2x98x64xf32>
    %c0_102 = arith.constant 0 : index
    %c0_103 = arith.constant 0 : index
    %c0_104 = arith.constant 0 : index
    %188 = vector.load %arg19[%c0_102, %c0_103, %c0_104] : memref<2x98x64xf32, #tpu.memory_space<vmem>>, vector<2x98x64xf32>
    tpu.vector_store %arg19[%c0_102, %c0_103, %c0_104], %187 {strides = array<i32>} : memref<2x98x64xf32, #tpu.memory_space<vmem>>, vector<2x98x64xf32>,
    %189 = arith.mulf %0, %185 : vector<2x7x7x64xf32>
    %c0_105 = arith.constant 0 : index
    %c0_106 = arith.constant 0 : index
    %c0_107 = arith.constant 0 : index
    %190 = vector.load %arg16[%c0_105, %c0_106, %c0_107] : memref<7x7x64xf32, #tpu.memory_space<vmem>>, vector<7x7x64xf32>
    %191 = vector.shape_cast %190 : vector<7x7x64xf32> to vector<1x7x7x64xf32>
    %192 = vector.broadcast %191 : vector<1x7x7x64xf32> to vector<2x7x7x64xf32>
    %193 = arith.mulf %189, %192 : vector<2x7x7x64xf32>
    %cst_108 = arith.constant dense<0.000000e+00> : vector<2x64xf32>
    %194 = vector.multi_reduction <add>, %193, %cst_108 [1, 2] : vector<2x7x7x64xf32> to vector<2x64xf32>
    %c0_109 = arith.constant 0 : index
    %c0_110 = arith.constant 0 : index
    %195 = vector.load %arg17[%c0_109, %c0_110] : memref<1x64xf32, #tpu.memory_space<vmem>>, vector<1x64xf32>
    %196 = vector.broadcast %195 : vector<1x64xf32> to vector<2x64xf32>
    %197 = arith.mulf %194, %196 : vector<2x64xf32>
    %c0_111 = arith.constant 0 : index
    %c0_112 = arith.constant 0 : index
    %198 = vector.load %arg18[%c0_111, %c0_112] : memref<1x64xf32, #tpu.memory_space<vmem>>, vector<1x64xf32>
    %199 = vector.broadcast %198 : vector<1x64xf32> to vector<2x64xf32>
    %200 = arith.addf %197, %199 : vector<2x64xf32>
    %c0_113 = arith.constant 0 : index
    %c0_114 = arith.constant 0 : index
    %201 = vector.load %arg20[%c0_113, %c0_114] : memref<2x64xf32, #tpu.memory_space<vmem>>, vector<2x64xf32>
    tpu.vector_store %arg20[%c0_113, %c0_114], %200 {strides = array<i32>} : memref<2x64xf32, #tpu.memory_space<vmem>>, vector<2x64xf32>,
    return
  }
  func.func @transform_0(%arg0: i32) -> (i32, i32, i32, i32) {
    %c0_i32 = arith.constant 0 : i32
    %c0_i32_0 = arith.constant 0 : i32
    %c0_i32_1 = arith.constant 0 : i32
    %c0_i32_2 = arith.constant 0 : i32
    return %arg0, %c0_i32, %c0_i32_0, %c0_i32_1 : i32, i32, i32, i32
  }
  func.func @transform_1(%arg0: i32) -> (i32, i32, i32) {
    %c0_i32 = arith.constant 0 : i32
    %c0_i32_0 = arith.constant 0 : i32
    %c0_i32_1 = arith.constant 0 : i32
    %c0_i32_2 = arith.constant 0 : i32
    return %c0_i32, %c0_i32_0, %c0_i32_1 : i32, i32, i32
  }
  func.func @transform_2(%arg0: i32) -> (i32, i32, i32) {
    %c0_i32 = arith.constant 0 : i32
    %c0_i32_0 = arith.constant 0 : i32
    %c0_i32_1 = arith.constant 0 : i32
    %c0_i32_2 = arith.constant 0 : i32
    return %c0_i32, %c0_i32_0, %c0_i32_1 : i32, i32, i32
  }
  func.func @transform_3(%arg0: i32) -> (i32, i32, i32) {
    %c0_i32 = arith.constant 0 : i32
    %c0_i32_0 = arith.constant 0 : i32
    %c0_i32_1 = arith.constant 0 : i32
    %c0_i32_2 = arith.constant 0 : i32
    return %c0_i32, %c0_i32_0, %c0_i32_1 : i32, i32, i32
  }
  func.func @transform_4(%arg0: i32) -> (i32, i32, i32) {
    %c0_i32 = arith.constant 0 : i32
    %c0_i32_0 = arith.constant 0 : i32
    %c0_i32_1 = arith.constant 0 : i32
    %c0_i32_2 = arith.constant 0 : i32
    return %c0_i32, %c0_i32_0, %c0_i32_1 : i32, i32, i32
  }
  func.func @transform_5(%arg0: i32) -> (i32, i32, i32) {
    %c0_i32 = arith.constant 0 : i32
    %c0_i32_0 = arith.constant 0 : i32
    %c0_i32_1 = arith.constant 0 : i32
    %c0_i32_2 = arith.constant 0 : i32
    return %c0_i32, %c0_i32_0, %c0_i32_1 : i32, i32, i32
  }
  func.func @transform_6(%arg0: i32) -> (i32, i32, i32) {
    %c0_i32 = arith.constant 0 : i32
    %c0_i32_0 = arith.constant 0 : i32
    %c0_i32_1 = arith.constant 0 : i32
    %c0_i32_2 = arith.constant 0 : i32
    return %c0_i32, %c0_i32_0, %c0_i32_1 : i32, i32, i32
  }
  func.func @transform_7(%arg0: i32) -> (i32, i32) {
    %c0_i32 = arith.constant 0 : i32
    %c0_i32_0 = arith.constant 0 : i32
    %c0_i32_1 = arith.constant 0 : i32
    return %c0_i32, %c0_i32_0 : i32, i32
  }
  func.func @transform_8(%arg0: i32) -> (i32, i32, i32) {
    %c0_i32 = arith.constant 0 : i32
    %c0_i32_0 = arith.constant 0 : i32
    %c0_i32_1 = arith.constant 0 : i32
    %c0_i32_2 = arith.constant 0 : i32
    return %c0_i32, %c0_i32_0, %c0_i32_1 : i32, i32, i32
  }
  func.func @transform_9(%arg0: i32) -> (i32, i32, i32) {
    %c0_i32 = arith.constant 0 : i32
    %c0_i32_0 = arith.constant 0 : i32
    %c0_i32_1 = arith.constant 0 : i32
    %c0_i32_2 = arith.constant 0 : i32
    return %c0_i32, %c0_i32_0, %c0_i32_1 : i32, i32, i32
  }
  func.func @transform_10(%arg0: i32) -> (i32, i32, i32) {
    %c0_i32 = arith.constant 0 : i32
    %c0_i32_0 = arith.constant 0 : i32
    %c0_i32_1 = arith.constant 0 : i32
    %c0_i32_2 = arith.constant 0 : i32
    return %c0_i32, %c0_i32_0, %c0_i32_1 : i32, i32, i32
  }
  func.func @transform_11(%arg0: i32) -> (i32, i32, i32) {
    %c0_i32 = arith.constant 0 : i32
    %c0_i32_0 = arith.constant 0 : i32
    %c0_i32_1 = arith.constant 0 : i32
    %c0_i32_2 = arith.constant 0 : i32
    return %c0_i32, %c0_i32_0, %c0_i32_1 : i32, i32, i32
  }
  func.func @transform_12(%arg0: i32) -> (i32, i32, i32) {
    %c0_i32 = arith.constant 0 : i32
    %c0_i32_0 = arith.constant 0 : i32
    %c0_i32_1 = arith.constant 0 : i32
    %c0_i32_2 = arith.constant 0 : i32
    return %c0_i32, %c0_i32_0, %c0_i32_1 : i32, i32, i32
  }
  func.func @transform_13(%arg0: i32) -> (i32, i32, i32) {
    %c0_i32 = arith.constant 0 : i32
    %c0_i32_0 = arith.constant 0 : i32
    %c0_i32_1 = arith.constant 0 : i32
    %c0_i32_2 = arith.constant 0 : i32
    return %c0_i32, %c0_i32_0, %c0_i32_1 : i32, i32, i32
  }
  func.func @transform_14(%arg0: i32) -> (i32, i32, i32) {
    %c0_i32 = arith.constant 0 : i32
    %c0_i32_0 = arith.constant 0 : i32
    %c0_i32_1 = arith.constant 0 : i32
    %c0_i32_2 = arith.constant 0 : i32
    return %c0_i32, %c0_i32_0, %c0_i32_1 : i32, i32, i32
  }
  func.func @transform_15(%arg0: i32) -> (i32, i32, i32) {
    %c0_i32 = arith.constant 0 : i32
    %c0_i32_0 = arith.constant 0 : i32
    %c0_i32_1 = arith.constant 0 : i32
    %c0_i32_2 = arith.constant 0 : i32
    return %c0_i32, %c0_i32_0, %c0_i32_1 : i32, i32, i32
  }
  func.func @transform_16(%arg0: i32) -> (i32, i32) {
    %c0_i32 = arith.constant 0 : i32
    %c0_i32_0 = arith.constant 0 : i32
    %c0_i32_1 = arith.constant 0 : i32
    return %c0_i32, %c0_i32_0 : i32, i32
  }
  func.func @transform_17(%arg0: i32) -> (i32, i32) {
    %c0_i32 = arith.constant 0 : i32
    %c0_i32_0 = arith.constant 0 : i32
    %c0_i32_1 = arith.constant 0 : i32
    return %c0_i32, %c0_i32_0 : i32, i32
  }
  func.func @transform_18(%arg0: i32) -> (i32, i32, i32) {
    %c0_i32 = arith.constant 0 : i32
    %c0_i32_0 = arith.constant 0 : i32
    %c0_i32_1 = arith.constant 0 : i32
    return %arg0, %c0_i32, %c0_i32_0 : i32, i32, i32
  }
  func.func @transform_19(%arg0: i32) -> (i32, i32) {
    %c0_i32 = arith.constant 0 : i32
    %c0_i32_0 = arith.constant 0 : i32
    return %arg0, %c0_i32 : i32, i32
  }
}

</mosaic_0001>

<bundles_post_ra>
// kernel: tpu_custom_call.1
= control target key start
LH: loop header
LB: loop body
LE: loop exit
PB: predicated region body
PF: predicated region fallthrough
CT: control target
= control target key end

     0   :  { %s7524_s0 = inlined_call_operand.vmem [shape: f32[2,7,7,64], index: 0, kind: input, shape index: {}]   ;;  %s7525_s1 = inlined_call_operand.vmem [shape: f32[2,7,64], index: 1, kind: input, shape index: {}]   ;;  %s7526_s2 = inlined_call_operand.vmem [shape: f32[2,1,64], index: 2, kind: input, shape index: {}]   ;;  %s7527_s3 = inlined_call_operand.vmem [shape: f32[2,1,64], index: 3, kind: input, shape index: {}]   ;;  %s7528_s4 = inlined_call_operand.vmem [shape: f32[2,7,64], index: 4, kind: input, shape index: {}]   ;;  %s7529_s5 = inlined_call_operand.vmem [shape: f32[2,1,64], index: 5, kind: input, shape index: {}]   ;;  %s7530_s6 = inlined_call_operand.vmem [shape: f32[2,1,64], index: 6, kind: input, shape index: {}]   ;;  %s7531_s7 = inlined_call_operand.vmem [shape: bf16[64,16], index: 7, kind: input, shape index: {}]   ;;  %s7532_s8 = inlined_call_operand.vmem [shape: f32[2,1,8], index: 8, kind: input, shape index: {}]   ;;  %s7533_s9 = inlined_call_operand.vmem [shape: f32[2,1,8], index: 9, kind: input, shape index: {}]   ;;  %s7534_s10 = inlined_call_operand.vmem [shape: f32[2,1,8], index: 10, kind: input, shape index: {}]   ;;  %s7535_s11 = inlined_call_operand.vmem [shape: bf16[2,8,64], index: 11, kind: input, shape index: {}]   ;;  %s7536_s12 = inlined_call_operand.vmem [shape: f32[2,1,64], index: 12, kind: input, shape index: {}]   ;;  %s7537_s13 = inlined_call_operand.vmem [shape: bf16[2,8,64], index: 13, kind: input, shape index: {}]   ;;  %s7538_s14 = inlined_call_operand.vmem [shape: f32[2,1,64], index: 14, kind: input, shape index: {}]   ;;  %s7539_s15 = inlined_call_operand.vmem [shape: f32[7,7,64], index: 15, kind: input, shape index: {}]   ;;  %s7540_s16 = inlined_call_operand.vmem [shape: f32[1,64], index: 16, kind: input, shape index: {}]   ;;  %s7541_s17 = inlined_call_operand.vmem [shape: f32[1,64], index: 17, kind: input, shape index: {}]   ;;  %s7542_s18 = inlined_call_operand.vmem [shape: f32[2,98,64], index: 18, kind: output, shape index: {0}]   ;;  %s7543_s19 = inlined_call_operand.hbm [shape: f32[2,64], index: 19, kind: output, shape index: {1}]  }
   0x1   :  { %7592 = sst [smem:[#allocation37_spill]] %s7524_s0 }
   0x2   :  { %7593 = sst [smem:[#allocation38_spill]] %s7525_s1 }
   0x3   :  { %7594 = sst [smem:[#allocation39_spill]] %s7526_s2 }
   0x4   :  { %7595 = sst [smem:[#allocation40_spill]] %s7527_s3 }
   0x5   :  { %v5215_v0 = vld [vmem:[%s7531_s7] sm:$0xff]   ;;  %v5216_v1 = vld [vmem:[%s7531_s7 + $0x8] sm:$0xff]   ;;  %v5217_v2 = vld [vmem:[%s7531_s7 + $0x10] sm:$0xff]   ;;  %vm92_vm0 = vcmask 522240   ;;  %s7596_s3 = sld [smem:[#allocation37_spill]]  ;;  %v239_v8 = vlaneseq  ;;  %s7597_s29 = sld [smem:[#allocation38_spill]] }
   0x6   :  { %5169 = vmatprep.subr.bf16.mxu0 %v5215_v0  ;;  %v5218_v3 = vld [vmem:[%s7531_s7 + $0x18] sm:$0xff]  }
   0x7   :  { %5170 = vmatpush3.bf16.msra.mxu0 %v5215_v0  ;;  %v5493_v26 = vshrl.u32 %v239_v8, 7 }
   0x8   :  { %5171 = vmatprep.subr.bf16.mxu0 %v5216_v1 }
   0xb   :  { %v5412_v4 = vld [vmem:[%s7596_s3] sm:$0x7f]  ;;  %v5417_v5 = vld [vmem:[%s7596_s3 + $0x8] sm:$0x7f]  ;;  %v5422_v6 = vld [vmem:[%s7596_s3 + $0x10] sm:$0x7f]  ;;  %5172 = vmatpush3.bf16.msra.mxu0 %v5216_v1 }
   0xc   :  { %v5427_v7 = vld [vmem:[%s7596_s3 + $0x18] sm:$0x7f]  ;;  %v5432_v9 = vld [vmem:[%s7596_s3 + $0x20] sm:$0x7f]  ;;  %v5437_v10 = vld [vmem:[%s7596_s3 + $0x28] sm:$0x7f]  ;;  %5173 = vmatprep.subr.bf16.mxu0 %v5217_v2 }
   0xd   :  { %v5442_v11 = vld [vmem:[%s7596_s3 + $0x30] sm:$0x7f]  ;;  %v5447_v12 = vld [vmem:[%s7596_s3 + $0x48] sm:$0x7f]  ;;  %v5457_v14 = vld [vmem:[%s7597_s29] sm:$0x7f] }
   0xe   :  { %v5452_v13 = vld [vmem:[%s7596_s3 + $0x50] sm:$0x7f]  ;;  %v5462_v15 = vld [vmem:[%s7596_s3 + $0x58] sm:$0x7f]  ;;  %v5467_v16 = vld [vmem:[%s7596_s3 + $0x60] sm:$0x7f]  ;;  %v78_v17 = vmul.f32 %v5457_v14, %v5412_v4  ;;  %v79_v18 = vmul.f32 %v5457_v14, %v5417_v5  ;;  %v80_v19 = vmul.f32 %v5457_v14, %v5422_v6  ;;  %v81_v20 = vmul.f32 %v5457_v14, %v5427_v7 }
   0xf   :  { %v5480_v21 = vld [vmem:[%s7596_s3 + $0x38] sm:$0x7f]  ;;  %v5485_v22 = vld [vmem:[%s7596_s3 + $0x40] sm:$0x7f]  ;;  %v82_v23 = vmul.f32 %v5457_v14, %v5432_v9  ;;  %v83_v24 = vmul.f32 %v5457_v14, %v5437_v10  ;;  %v84_v25 = vmul.f32 %v5457_v14, %v5442_v11  ;;  %5174 = vmatpush3.bf16.msra.mxu0 %v5217_v2  ;;  %v87_v29 = vmul.f32 %v5457_v14, %v5447_v12 }
  0x10   :  { %v85_v27 = vmul.f32 %v5457_v14, %v5480_v21  ;;  %v86_v28 = vmul.f32 %v5457_v14, %v5485_v22  ;;  %v5503_v30 = vmul.f32 %v5457_v14, %v5452_v13  ;;  %5175 = vmatprep.subr.bf16.mxu0 %v5218_v3  ;;  %v5507_v31 = vmul.f32 %v5457_v14, %v5462_v15 }
  0x11   :  { %v5511_v32 = vmul.f32 %v5457_v14, %v5467_v16  ;;  %v93_v33 = vsel %vm92_vm0, %v78_v17, 0.0  ;;  %v100_v34 = vsel %vm92_vm0, %v79_v18, 0.0 }
  0x12   :  { %25 = vsyncpa [#allocation3], 0  ;;  %v94_v35 = vrot.slane %v93_v33, 4  ;;  %v101_v36 = vrot.slane %v100_v34, 4  ;;  %v107_v37 = vsel %vm92_vm0, %v80_v19, 0.0  ;;  %v114_v38 = vsel %vm92_vm0, %v81_v20, 0.0 }
  0x13   :  { %v108_v39 = vrot.slane %v107_v37, 4  ;;  %v115_v40 = vrot.slane %v114_v38, 4  ;;  %v121_v41 = vsel %vm92_vm0, %v82_v23, 0.0  ;;  %v128_v42 = vsel %vm92_vm0, %v83_v24, 0.0  ;;  %5176 = vmatpush3.bf16.msra.mxu0 %v5218_v3  ;;  %v5524_v63 = vld [vmem:[%s7596_s3 + $0x68] sm:$0x7f] }
  0x14   :  { %v95_v43 = vadd.f32 %v94_v35, %v93_v33  ;;  %v102_v44 = vadd.f32 %v101_v36, %v100_v34  ;;  %v122_v45 = vrot.slane %v121_v41, 4  ;;  %v129_v46 = vrot.slane %v128_v42, 4  ;;  %s7598_s27 = sld [smem:[#allocation39_spill]]  ;;  %s7599_s30 = sld [smem:[#allocation40_spill]] }
  0x15   :  { %v109_v47 = vadd.f32 %v108_v39, %v107_v37  ;;  %v116_v48 = vadd.f32 %v115_v40, %v114_v38  ;;  %v135_v49 = vsel %vm92_vm0, %v84_v25, 0.0  ;;  %v142_v50 = vsel %vm92_vm0, %v85_v27, 0.0  ;;  %s5292_s23 = smov 8  }
  0x16   :  { %v96_v51 = vrot.slane %v95_v43, 2  ;;  %v103_v52 = vrot.slane %v102_v44, 2  ;;  %v123_v53 = vadd.f32 %v122_v45, %v121_v41  ;;  %v130_v54 = vadd.f32 %v129_v46, %v128_v42 }
  0x17   :  { %v110_v55 = vrot.slane %v109_v47, 2  ;;  %v117_v56 = vrot.slane %v116_v48, 2  ;;  %v136_v57 = vrot.slane %v135_v49, 4  ;;  %v143_v58 = vrot.slane %v142_v50, 4 }
  0x18   :  { %v97_v59 = vadd.f32 %v96_v51, %v95_v43  ;;  %v104_v60 = vadd.f32 %v103_v52, %v102_v44  ;;  %v124_v61 = vrot.slane %v123_v53, 2  ;;  %v131_v62 = vrot.slane %v130_v54, 2 }
  0x19   :  { %v111_v0 = vadd.f32 %v110_v55, %v109_v47  ;;  %v118_v1 = vadd.f32 %v117_v56, %v116_v48  ;;  %v137_v2 = vadd.f32 %v136_v57, %v135_v49  ;;  %v144_v3 = vadd.f32 %v143_v58, %v142_v50 }
  0x1a   :  { %v98_v8 = vrot.slane %v97_v59, 1  ;;  %v105_v17 = vrot.slane %v104_v60, 1  ;;  %v125_v18 = vadd.f32 %v124_v61, %v123_v53  ;;  %v132_v19 = vadd.f32 %v131_v62, %v130_v54 }
  0x1b   :  { %v112_v20 = vrot.slane %v111_v0, 1  ;;  %v119_v23 = vrot.slane %v118_v1, 1  ;;  %v138_v24 = vrot.slane %v137_v2, 2  ;;  %v145_v25 = vrot.slane %v144_v3, 2 }
  0x1c   :  { %v91_v27 = vmul.f32 %v5457_v14, %v5524_v63  ;;  %v99_v33 = vadd.f32 %v98_v8, %v97_v59  ;;  %v106_v34 = vadd.f32 %v105_v17, %v104_v60  ;;  %v126_v35 = vrot.slane %v125_v18, 1 }
  0x1d   :  { %v113_v36 = vadd.f32 %v112_v20, %v111_v0  ;;  %v133_v37 = vrot.slane %v132_v19, 1  ;;  %v139_v38 = vadd.f32 %v138_v24, %v137_v2  ;;  %v146_v39 = vadd.f32 %v145_v25, %v144_v3 }
  0x1e   :  { %v120_v40 = vadd.f32 %v119_v23, %v118_v1  ;;  %v127_v41 = vadd.f32 %v126_v35, %v125_v18  ;;  %v149_v42 = vsel %vm92_vm0, %v86_v28, 0.0  ;;  %v156_v43 = vsel %vm92_vm0, %v87_v29, 0.0 }
  0x1f   :  { %v140_v44 = vrot.slane %v139_v38, 1  ;;  %v147_v45 = vrot.slane %v146_v39, 1  ;;  %v150_v46 = vrot.slane %v149_v42, 4  ;;  %v157_v47 = vrot.slane %v156_v43, 4 }
  0x20   :  { %v163_v14 = vsel %vm92_vm0, %v5503_v30, 0.0  ;;  %v170_v48 = vsel %vm92_vm0, %v5507_v31, 0.0  ;;  %v177_v49 = vsel %vm92_vm0, %v5511_v32, 0.0  ;;  %v184_v50 = vsel %vm92_vm0, %v91_v27, 0.0  ;;  %v5084_v30 = vld [vmem:[%s7598_s27] ss:$0 sm:$0xff] }
  0x21   :  { %v134_v51 = vadd.f32 %v133_v37, %v132_v19  ;;  %v141_v52 = vadd.f32 %v140_v44, %v139_v38  ;;  %v151_v28 = vadd.f32 %v150_v46, %v149_v42  ;;  %v158_v53 = vadd.f32 %v157_v47, %v156_v43  ;;  %v5085_v46 = vld [vmem:[%s7599_s30] ss:$0 sm:$0xff] }
  0x22   :  { %v164_v29 = vrot.slane %v163_v14, 4  ;;  %v171_v54 = vrot.slane %v170_v48, 4  ;;  %v178_v55 = vrot.slane %v177_v49, 4  ;;  %v185_v56 = vrot.slane %v184_v50, 4 }
  0x23   :  { %v148_v57 = vadd.f32 %v147_v45, %v146_v39  ;;  %v152_v58 = vrot.slane %v151_v28, 2  ;;  %v159_v31 = vrot.slane %v158_v53, 2  ;;  %v198_v59 = vmul.f32 %v5084_v30, %v99_v33 }
  0x24   :  { %v165_v60 = vadd.f32 %v164_v29, %v163_v14  ;;  %v172_v32 = vadd.f32 %v171_v54, %v170_v48  ;;  %v179_v61 = vadd.f32 %v178_v55, %v177_v49  ;;  %v186_v62 = vadd.f32 %v185_v56, %v184_v50 }
  0x25   :  { %v153_v0 = vadd.f32 %v152_v58, %v151_v28  ;;  %v160_v1 = vadd.f32 %v159_v31, %v158_v53  ;;  %v199_v2 = vmul.f32 %v5084_v30, %v106_v34  ;;  %v200_v3 = vmul.f32 %v5084_v30, %v113_v36 }
  0x26   :  { %v166_v8 = vrot.slane %v165_v60, 2  ;;  %v173_v17 = vrot.slane %v172_v32, 2  ;;  %v180_v18 = vrot.slane %v179_v61, 2  ;;  %v187_v19 = vrot.slane %v186_v62, 2 }
  0x27   :  { %v154_v20 = vrot.slane %v153_v0, 1  ;;  %v161_v23 = vrot.slane %v160_v1, 1  ;;  %v201_v24 = vmul.f32 %v5084_v30, %v120_v40  ;;  %v202_v25 = vmul.f32 %v5084_v30, %v127_v41 }
  0x28   :  { %v167_v27 = vadd.f32 %v166_v8, %v165_v60  ;;  %v174_v35 = vadd.f32 %v173_v17, %v172_v32  ;;  %v181_v37 = vadd.f32 %v180_v18, %v179_v61  ;;  %v188_v33 = vadd.f32 %v187_v19, %v186_v62  ;;  %v5566_v8 = vld [vmem:[%s7597_s29 + $0x8] sm:$0x7f]  ;;  %s5296_s29 = smov [#allocation2]  }
  0x29   :  { %v155_v38 = vadd.f32 %v154_v20, %v153_v0  ;;  %v162_v39 = vadd.f32 %v161_v23, %v160_v1  ;;  %v203_v42 = vmul.f32 %v5084_v30, %v134_v51  ;;  %v204_v43 = vmul.f32 %v5084_v30, %v141_v52  ;;  %v233_v1 = vld [vmem:[%s7528_s4] sm:$0x7f] }
  0x2a   :  { %v168_v44 = vrot.slane %v167_v27, 1  ;;  %v175_v45 = vrot.slane %v174_v35, 1  ;;  %v182_v34 = vrot.slane %v181_v37, 1  ;;  %v189_v36 = vrot.slane %v188_v33, 1 }
  0x2b   :  { %v205_v47 = vmul.f32 %v5084_v30, %v148_v57  ;;  %v206_v14 = vmul.f32 %v5084_v30, %v155_v38  ;;  %v207_v40 = vmul.f32 %v5084_v30, %v162_v39  ;;  %v219_v41 = vadd.f32 %v5085_v46, %v198_v59 }
  0x2c   :  { %v169_v48 = vadd.f32 %v168_v44, %v167_v27  ;;  %v176_v49 = vadd.f32 %v175_v45, %v174_v35  ;;  %v183_v50 = vadd.f32 %v182_v34, %v181_v37  ;;  %v190_v28 = vadd.f32 %v189_v36, %v188_v33 }
  0x2d   :  { %v220_v53 = vadd.f32 %v5085_v46, %v199_v2  ;;  %v221_v29 = vadd.f32 %v5085_v46, %v200_v3  ;;  %v222_v51 = vadd.f32 %v5085_v46, %v201_v24  ;;  %v223_v52 = vadd.f32 %v5085_v46, %v202_v25  ;;  %v5093_v24 = vld [vmem:[%s7528_s4 + $0x8] sm:$0x7f] }
  0x2e   :  { %v208_v54 = vmul.f32 %v5084_v30, %v169_v48  ;;  %v209_v55 = vmul.f32 %v5084_v30, %v176_v49  ;;  %v210_v56 = vmul.f32 %v5084_v30, %v183_v50  ;;  %v211_v58 = vmul.f32 %v5084_v30, %v190_v28 }
  0x2f   :  { %v224_v31 = vadd.f32 %v5085_v46, %v203_v42  ;;  %v225_v60 = vadd.f32 %v5085_v46, %v204_v43  ;;  %v5543_v32 = vadd.f32 %v5085_v46, %v205_v47  ;;  %v5545_v57 = vadd.f32 %v5085_v46, %v206_v14 }
  0x30   :  { %v5547_v61 = vadd.f32 %v5085_v46, %v207_v40  ;;  %v5549_v59 = vadd.f32 %v5085_v46, %v208_v54  ;;  %v5551_v62 = vadd.f32 %v5085_v46, %v209_v55  ;;  %v5553_v0 = vadd.f32 %v5085_v46, %v210_v56 }
  0x31   :  { %v5558_v2 = vadd.f32 %v5085_v46, %v211_v58  ;;  %v235_v30 = vcombine.high %v233_v1, %v233_v1  ;;  %v5561_v3 = vsub.s32 0, %v5493_v26  ;;  %v5291_v17 = vmov 1966171168  }
  0x32   :  { %v237_v18 = vunpack.c.l.s4 %v5291_v17  ;;  %v5570_v19 = vmul.f32 %v5566_v8, %v5437_v10  ;;  %v5574_v20 = vmul.f32 %v5566_v8, %v5442_v11  ;;  %v5578_v23 = vmul.f32 %v5566_v8, %v5480_v21 }
  0x33   :  { %7600 = vst [vmem:[#allocation5_spill] sm:$0xff] %v5561_v3  ;;  %v5585_v25 = vmul.f32 %v5566_v8, %v5524_v63  ;;  %v537_v27 = vcombine.high %v5093_v24, %v5093_v24  ;;  %v744_v35 = vpack.c.bf16 %v219_v41, %v219_v41  ;;  %v745_v37 = vpack.c.bf16 %v220_v53, %v220_v53 }
  0x34   :  { %v238_v33 = vunpack.c.0.s8 %v237_v18  ;;  %v746_v38 = vpack.c.bf16 %v221_v29, %v221_v29  ;;  %v747_v39 = vpack.c.bf16 %v222_v51, %v222_v51  ;;  %v748_v42 = vpack.c.bf16 %v223_v52, %v223_v52 }
  0x35   :  { %7601 = vst [vmem:[#allocation6_spill] sm:$0xff] %v5585_v25  ;;  %v749_v43 = vpack.c.bf16 %v224_v31, %v224_v31  ;;  %v750_v44 = vpack.c.bf16 %v225_v60, %v225_v60  ;;  %v5604_v48 = vunpack.c.l.b16 %v744_v35  ;;  %v5606_v49 = vunpack.c.l.b16 %v745_v37  ;;  %v5119_v60 = vld [vmem:[%s7532_s8 + $0x1] ss:$0 sm:$0xff] }
  0x36   :  { %v5592_v36 = vsub.s32 %v238_v33, %v5493_v26  ;;  %v5612_v29 = vunpack.c.l.b16 %v746_v38  ;;  %v5614_v51 = vunpack.c.l.b16 %v747_v39  ;;  %v5616_v52 = vunpack.c.l.b16 %v748_v42  ;;  %2391 = vrot.lane.b32.xlu0 %v5119_v60, %s5292_s23  ;;  %v5121_v38 = vld [vmem:[%s7533_s9 + $0x1] ss:$0 sm:$0xff] }
  0x37   :  { %v5618_v54 = vunpack.c.l.b16 %v749_v43  ;;  %v5626_v18 = vunpack.c.l.b16 %v750_v44  ;;  %vm913_vm1 = vcmask 1041409   ;;  %vm916_vm2 = vcmask 1042434  }
  0x38   :  { %7602 = vst [vmem:[#allocation7_spill] sm:$0xff] %v5592_v36  ;;  %v242_v26 = vrot.slane %v233_v1, %v5592_v36  ;;  %v249_v50 = vrot.slane %v235_v30, %v5592_v36  ;;  %v544_v28 = vrot.slane %v5093_v24, %v5592_v36  ;;  %v551_v53 = vrot.slane %v537_v27, %v5592_v36  ;;  %v5123_v24 = vld [vmem:[%s7534_s10 + $0x1] ss:$0 sm:$0xff] }
  0x39   :  { %2419 = vrot.lane.b32.xlu1 %v5123_v24, %s5292_s23  ;;  %vm919_vm3 = vcmask 1043459   ;;  %vm922_vm4 = vcmask 1044484   ;;  %vm925_vm5 = vcmask 1045509   ;;  %vm928_vm6 = vcmask 1046534  }
  0x3a   :  { %v250_v55 = vcombine.high %v242_v26, %v242_v26  ;;  %v251_v56 = vcombine.high %v249_v50, %v249_v50  ;;  %v258_v58 = vrot.slane %v242_v26, %v5592_v36  ;;  %v265_v31 = vrot.slane %v249_v50, %v5592_v36  ;;  %2405 = vrot.lane.b32.xlu0 %v5121_v38, %s5292_s23 }
  0x3b   :  { %v552_v1 = vcombine.high %v544_v28, %v544_v28  ;;  %v553_v30 = vcombine.high %v551_v53, %v551_v53  ;;  %v560_v17 = vrot.slane %v544_v28, %v5592_v36  ;;  %v567_v43 = vrot.slane %v551_v53, %v5592_v36 }
  0x3c   :  { %v272_v27 = vrot.slane %v250_v55, %v5592_v36  ;;  %v279_v35 = vrot.slane %v251_v56, %v5592_v36  ;;  %v280_v37 = vcombine.high %v258_v58, %v258_v58  ;;  %v281_v33 = vcombine.high %v265_v31, %v265_v31 }
  0x3d   :  { %v286_v39 = vrot.slane %v258_v58, %v5561_v3  ;;  %v302_v42 = vrot.slane %v265_v31, %v5561_v3  ;;  %v574_v44 = vrot.slane %v552_v1, %v5592_v36  ;;  %v581_v58 = vrot.slane %v553_v30, %v5592_v36 }
  0x3e   :  { %v282_v26 = vcombine.high %v272_v27, %v272_v27  ;;  %v290_v50 = vrot.slane %v272_v27, %v5561_v3  ;;  %v294_v28 = vrot.slane %v280_v37, %v5561_v3  ;;  %v306_v55 = vrot.slane %v279_v35, %v5561_v3 }
  0x3f   :  { %v310_v56 = vrot.slane %v281_v33, %v5561_v3  ;;  %v318_v60 = vmul.f32 %v286_v39, %v5412_v4  ;;  %v322_v24 = vmul.f32 %v302_v42, %v5432_v9  ;;  %v325_v35 = vmul.f32 %v286_v39, %v5480_v21 }
  0x40   :  { %v298_v53 = vrot.slane %v282_v26, %v5561_v3  ;;  %v319_v31 = vmul.f32 %v290_v50, %v5417_v5  ;;  %v320_v1 = vmul.f32 %v294_v28, %v5422_v6  ;;  %v323_v27 = vmul.f32 %v306_v55, %v5437_v10 }
  0x41   :  { %v324_v37 = vmul.f32 %v310_v56, %v5442_v11  ;;  %v326_v33 = vmul.f32 %v290_v50, %v5485_v22  ;;  %v327_v41 = vmul.f32 %v294_v28, %v5447_v12  ;;  %v329_v38 = vmul.f32 %v302_v42, %v5462_v15 }
  0x42   :  { %v321_v40 = vmul.f32 %v298_v53, %v5427_v7  ;;  %v328_v30 = vmul.f32 %v298_v53, %v5452_v13  ;;  %v330_v26 = vmul.f32 %v306_v55, %v5467_v16  ;;  %v331_v14 = vmul.f32 %v310_v56, %v5524_v63 }
  0x43   :  { %v332_v47 = vsel %vm92_vm0, %v318_v60, 0.0  ;;  %v333_v46 = vsel %vm92_vm0, %v319_v31, 0.0  ;;  %v335_v39 = vsel %vm92_vm0, %v320_v1, 0.0  ;;  %v339_v28 = vsel %vm92_vm0, %v322_v24, 0.0 }
  0x44   :  { %v334_v34 = vadd.f32 %v333_v46, %v332_v47  ;;  %v337_v50 = vsel %vm92_vm0, %v321_v40, 0.0  ;;  %v341_v45 = vsel %vm92_vm0, %v323_v27, 0.0  ;;  %v343_v53 = vsel %vm92_vm0, %v324_v37, 0.0 }
  0x45   :  { %v345_v42 = vsel %vm92_vm0, %v325_v35, 0.0  ;;  %v346_v55 = vsel %vm92_vm0, %v326_v33, 0.0  ;;  %v348_v56 = vsel %vm92_vm0, %v327_v41, 0.0  ;;  %v350_v31 = vsel %vm92_vm0, %v328_v30, 0.0 }
  0x46   :  { %v336_v60 = vadd.f32 %v335_v39, %v334_v34  ;;  %v347_v36 = vadd.f32 %v346_v55, %v345_v42  ;;  %v352_v46 = vsel %vm92_vm0, %v329_v38, 0.0  ;;  %v354_v47 = vsel %vm92_vm0, %v330_v26, 0.0 }
  0x47   :  { %v582_v40 = vcombine.high %v560_v17, %v560_v17  ;;  %v583_v24 = vcombine.high %v567_v43, %v567_v43  ;;  %v584_v1 = vcombine.high %v574_v44, %v574_v44  ;;  %v588_v37 = vrot.slane %v560_v17, %v5561_v3 }
  0x48   :  { %v338_v27 = vadd.f32 %v337_v50, %v336_v60  ;;  %v349_v25 = vadd.f32 %v348_v56, %v347_v36  ;;  %v592_v35 = vrot.slane %v574_v44, %v5561_v3  ;;  %v604_v41 = vrot.slane %v567_v43, %v5561_v3 }
  0x49   :  { %v596_v33 = vrot.slane %v582_v40, %v5561_v3  ;;  %v600_v34 = vrot.slane %v584_v1, %v5561_v3  ;;  %v608_v30 = vrot.slane %v581_v58, %v5561_v3  ;;  %v356_v26 = vsel %vm92_vm0, %v331_v14, 0.0 }
  0x4a   :  { %v340_v38 = vadd.f32 %v339_v28, %v338_v27  ;;  %v351_v39 = vadd.f32 %v350_v31, %v349_v25  ;;  %v612_v42 = vrot.slane %v583_v24, %v5561_v3  ;;  %v620_v36 = vmul.f32 %v588_v37, %v5412_v4  ;;  %v5086_v25 = vld [vmem:[%s7529_s5] ss:$0 sm:$0xff] }
  0x4b   :  { %v621_v17 = vmul.f32 %v592_v35, %v5417_v5  ;;  %v622_v44 = vmul.f32 %v596_v33, %v5422_v6  ;;  %v623_v50 = vmul.f32 %v600_v34, %v5427_v7  ;;  %v624_v43 = vmul.f32 %v604_v41, %v5432_v9 }
  0x4c   :  { %v342_v55 = vadd.f32 %v341_v45, %v340_v38  ;;  %v353_v56 = vadd.f32 %v352_v46, %v351_v39  ;;  %v625_v58 = vmul.f32 %v608_v30, %v5437_v10  ;;  %v626_v14 = vmul.f32 %v612_v42, %v5442_v11 }
  0x4d   :  { %v627_v28 = vmul.f32 %v588_v37, %v5480_v21  ;;  %v628_v60 = vmul.f32 %v592_v35, %v5485_v22  ;;  %v629_v31 = vmul.f32 %v596_v33, %v5447_v12  ;;  %v630_v45 = vmul.f32 %v600_v34, %v5452_v13 }
  0x4e   :  { %v344_v40 = vadd.f32 %v343_v53, %v342_v55  ;;  %v355_v24 = vadd.f32 %v354_v47, %v353_v56  ;;  %v631_v46 = vmul.f32 %v604_v41, %v5462_v15  ;;  %v632_v10 = vmul.f32 %v608_v30, %v5467_v16  ;;  %v5087_v53 = vld [vmem:[%s7530_s6] ss:$0 sm:$0xff] }
  0x4f   :  { %v634_v1 = vsel %vm92_vm0, %v620_v36, 0.0  ;;  %v635_v27 = vsel %vm92_vm0, %v621_v17, 0.0  ;;  %v637_v11 = vsel %vm92_vm0, %v622_v44, 0.0  ;;  %v633_v47 = vmul.f32 %v612_v42, %v5524_v63 }
  0x50   :  { %v357_v21 = vadd.f32 %v356_v26, %v355_v24  ;;  %v365_v37 = vmul.f32 %v5086_v25, %v344_v40  ;;  %v636_v35 = vadd.f32 %v635_v27, %v634_v1  ;;  %v639_v33 = vsel %vm92_vm0, %v623_v50, 0.0 }
  0x51   :  { %v641_v34 = vsel %vm92_vm0, %v624_v43, 0.0  ;;  %v643_v41 = vsel %vm92_vm0, %v625_v58, 0.0  ;;  %v647_v30 = vsel %vm92_vm0, %v627_v28, 0.0  ;;  %v645_v26 = vsel %vm92_vm0, %v626_v14, 0.0 }
  0x52   :  { %v366_v38 = vmul.f32 %v5086_v25, %v357_v21  ;;  %v638_v39 = vadd.f32 %v637_v11, %v636_v35  ;;  %v648_v36 = vsel %vm92_vm0, %v628_v60, 0.0  ;;  %v5710_v17 = vadd.f32 %v5087_v53, %v365_v37 }
  0x53   :  { %v649_v44 = vadd.f32 %v648_v36, %v647_v30  ;;  %v650_v63 = vsel %vm92_vm0, %v629_v31, 0.0  ;;  %v652_v42 = vsel %vm92_vm0, %v630_v45, 0.0  ;;  %v654_v56 = vsel %vm92_vm0, %v631_v46, 0.0 }
  0x54   :  { %v5714_v50 = vadd.f32 %v5087_v53, %v366_v38  ;;  %v640_v55 = vadd.f32 %v639_v33, %v638_v39  ;;  %v656_v43 = vsel %vm92_vm0, %v632_v10, 0.0  ;;  %v5719_v25 = vsel %vm92_vm0, %v633_v47, 0.0 }
  0x55   :  { %v651_v58 = vadd.f32 %v650_v63, %v649_v44  ;;  %v682_v14 = vrot.slane %v5710_v17, 1  ;;  %v758_v28 = vpack.c.bf16 %v5710_v17, %v5710_v17  ;;  %v7603_v31 = vpack.c.bf16 %v5543_v32, %v5543_v32 }
  0x56   :  { %v642_v60 = vadd.f32 %v641_v34, %v640_v55  ;;  %v7604_v24 = vpack.c.bf16 %v5545_v57, %v5545_v57  ;;  %v7605_v46 = vpack.c.bf16 %v5547_v61, %v5547_v61  ;;  %v7606_v11 = vpack.c.bf16 %v5549_v59, %v5549_v59 }
  0x57   :  { %v863_v40 = vunpack.c.l.b16 %v7603_v31  ;;  %v653_v1 = vadd.f32 %v652_v42, %v651_v58  ;;  %v759_v27 = vpack.c.bf16 %v682_v14, %v682_v14  ;;  %v7607_v37 = vpack.c.bf16 %v5551_v62, %v5551_v62  ;;  %v5751_v62 = vld [vmem:[%s7529_s5 + $0x1] ss:$0 sm:$0xff] }
  0x58   :  { %v864_v45 = vunpack.c.l.b16 %v7604_v24  ;;  %v865_v10 = vunpack.c.l.b16 %v7605_v46  ;;  %v866_v21 = vunpack.c.l.b16 %v7606_v11  ;;  %v644_v32 = vadd.f32 %v643_v41, %v642_v60 }
  0x59   :  { %v867_v53 = vunpack.c.l.b16 %v7607_v37  ;;  %v7608_v47 = vpack.c.bf16 %v5553_v0, %v5553_v0  ;;  %v7609_v35 = vpack.c.bf16 %v5558_v2, %v5558_v2  ;;  %v912_v33 = vrot.slane %v5606_v49, 7 }
  0x5a   :  { %v655_v34 = vadd.f32 %v654_v56, %v653_v1  ;;  %v870_v30 = vunpack.c.l.b16 %v758_v28  ;;  %v915_v59 = vrot.slane %v5612_v29, 6  ;;  %v918_v38 = vrot.slane %v5614_v51, 5 }
  0x5b   :  { %v868_v57 = vunpack.c.l.b16 %v7608_v47  ;;  %v869_v61 = vunpack.c.l.b16 %v7609_v35  ;;  %v646_v39 = vadd.f32 %v645_v26, %v644_v32  ;;  %v914_v0 = vsel %vm913_vm1, %v912_v33, %v5604_v48 }
  0x5c   :  { %v921_v2 = vrot.slane %v5616_v52, 4  ;;  %v871_v41 = vunpack.c.l.b16 %v759_v27  ;;  %v917_v49 = vsel %vm916_vm2, %v915_v59, %v914_v0  ;;  %v924_v29 = vrot.slane %v5618_v54, 3 }
  0x5d   :  { %v5758_v36 = vadd.f32 %v656_v43, %v655_v34  ;;  %v920_v51 = vsel %vm919_vm3, %v918_v38, %v917_v49  ;;  %v927_v26 = vrot.slane %v5626_v18, 2  ;;  %v5763_v44 = vmul.f32 %v5751_v62, %v646_v39 }
  0x5e   :  { %v923_v48 = vsel %vm922_vm4, %v921_v2, %v920_v51  ;;  %v930_v52 = vrot.slane %v863_v40, 1  ;;  %vm931_vm7 = vcmask 1047559   ;;  %v933_v42 = vrot.slane %v865_v10, 7 }
  0x5f   :  { %v926_v63 = vsel %vm925_vm5, %v924_v29, %v923_v48  ;;  %v935_v55 = vrot.slane %v866_v21, 6  ;;  %v937_v56 = vrot.slane %v867_v53, 5  ;;  %v939_v43 = vrot.slane %v868_v57, 4 }
  0x60   :  { %v929_v54 = vsel %vm928_vm6, %v927_v26, %v926_v63  ;;  %v941_v58 = vrot.slane %v869_v61, 3  ;;  %v934_v18 = vsel %vm913_vm1, %v933_v42, %v864_v45  ;;  %v943_v28 = vrot.slane %v870_v30, 2 }
  0x61   :  { %v932_v14 = vsel %vm931_vm7, %v930_v52, %v929_v54  ;;  %v945_v60 = vrot.slane %v871_v41, 1  ;;  %v936_v31 = vsel %vm916_vm2, %v935_v55, %v934_v18  ;;  %vm1045_vm8 = vcmask 523264  }
  0x62   :  { %v378_v40 = vmul.f32 %v5566_v8, %v5412_v4  ;;  %v379_v24 = vmul.f32 %v5566_v8, %v5417_v5  ;;  %v938_v46 = vsel %vm919_vm3, %v937_v56, %v936_v31  ;;  %v380_v10 = vmul.f32 %v5566_v8, %v5422_v6  ;;  %v5803_v31 = vld [vmem:[%s7598_s27 + $0x1] ss:$0 sm:$0xff]  ;;  %s5074_s27 = sshll.u32 %s5296_s29, 4  ;;  %s5075_s27 = int_to_ptr.vmem [resolvable:$true] %s5074_s27 }
  0x63   :  { %v381_v1 = vmul.f32 %v5566_v8, %v5427_v7  ;;  %v683_v45 = vrot.slane %v5710_v17, 2  ;;  %v940_v27 = vsel %vm922_vm4, %v939_v43, %v938_v46  ;;  %v684_v4 = vrot.slane %v5710_v17, 3  ;;  %p5272_p1 = scmp.lt.s32.totalorder %s5075_s27, %s5075_s27 }
  0x64   :  { %v392_v11 = vsel %vm92_vm0, %v378_v40, 0.0  ;;  %v399_v21 = vsel %vm92_vm0, %v379_v24, 0.0  ;;  %v942_v5 = vsel %vm925_vm5, %v941_v58, %v940_v27  ;;  %v406_v32 = vsel %vm92_vm0, %v380_v10, 0.0 }
  0x65   :  { %v393_v37 = vrot.slane %v392_v11, 4  ;;  %v400_v53 = vrot.slane %v399_v21, 4  ;;  %v944_v6 = vsel %vm928_vm6, %v943_v28, %v942_v5  ;;  %v407_v47 = vrot.slane %v406_v32, 4 }
  0x66   :  { %v413_v7 = vsel %vm92_vm0, %v381_v1, 0.0  ;;  %v685_v57 = vrot.slane %v5710_v17, 4  ;;  %v946_v35 = vsel %vm931_vm7, %v945_v60, %v944_v6  ;;  %v686_v38 = vrot.slane %v5710_v17, 5 }
  0x67   :  { %v394_v61 = vadd.f32 %v393_v37, %v392_v11  ;;  %v401_v33 = vadd.f32 %v400_v53, %v399_v21  ;;  %v414_v34 = vrot.slane %v413_v7, 4  ;;  %v1017_v30 = vpack.c.b16 %v946_v35, %v932_v14  ;;  %v5810_v21 = vld [vmem:[%s7599_s30 + $0x1] ss:$0 sm:$0xff]  ;;  %s5267_s30 = scalar_lea.vmem %s5075_s27, 32 }
  0x68   :  { %v408_v59 = vadd.f32 %v407_v47, %v406_v32  ;;  %v687_v39 = vrot.slane %v5710_v17, 6  ;;  %v688_v49 = vrot.slane %v5714_v50, 1  ;;  %v689_v51 = vrot.slane %v5714_v50, 2  ;;  %p5268_p0 = scmp.ne.s32.totalorder %s5075_s27, %s5267_s30  ;;  %p5273_p2 = scmp.lt.s32.totalorder %s5267_s30, %s5267_s30 }
  0x69   :  { %v395_v0 = vrot.slane %v394_v61, 2  ;;  %v402_v2 = vrot.slane %v401_v33, 2  ;;  %v415_v41 = vadd.f32 %v414_v34, %v413_v7  ;;  %5177 = vmatprep.mubr.msk.bf16.mxu0 %vm1045_vm8, %v1017_v30  ;;  %v690_v26 = vrot.slane %v5714_v50, 3 }
  0x6a   :  { %v409_v29 = vrot.slane %v408_v59, 2  ;;  %v691_v48 = vrot.slane %v5714_v50, 4  ;;  %v692_v55 = vrot.slane %v5714_v50, 5  ;;  %v693_v54 = vrot.slane %v5714_v50, 6  ;;  %p5274_p3 = por %p5273_p2, %p5272_p1 }
  0x6b   :  { %v396_v52 = vadd.f32 %v395_v0, %v394_v61  ;;  %v403_v63 = vadd.f32 %v402_v2, %v401_v33  ;;  %v416_v42 = vrot.slane %v415_v41, 2  ;;  %v760_v56 = vpack.c.bf16 %v683_v45, %v683_v45 }
  0x6c   :  { %v410_v17 = vadd.f32 %v409_v29, %v408_v59  ;;  %v761_v43 = vpack.c.bf16 %v684_v4, %v684_v4  ;;  %v762_v28 = vpack.c.bf16 %v685_v57, %v685_v57  ;;  %v763_v40 = vpack.c.bf16 %v686_v38, %v686_v38  ;;  %p5275_p4 = pnand %p5274_p3, %p5268_p0 }
  0x6d   :  { %v397_v58 = vrot.slane %v396_v52, 1  ;;  %v404_v14 = vrot.slane %v403_v63, 1  ;;  %v417_v18 = vadd.f32 %v416_v42, %v415_v41  ;;  %v764_v24 = vpack.c.bf16 %v687_v39, %v687_v39 }
  0x6e   :  { %v411_v60 = vrot.slane %v410_v17, 1  ;;  %v765_v46 = vpack.c.bf16 %v5714_v50, %v5714_v50  ;;  %v766_v45 = vpack.c.bf16 %v688_v49, %v688_v49  ;;  %v767_v4 = vpack.c.bf16 %v689_v51, %v689_v51 }
  0x6f   :  { %v398_v10 = vadd.f32 %v397_v58, %v396_v52  ;;  %v405_v1 = vadd.f32 %v404_v14, %v403_v63  ;;  %v418_v27 = vrot.slane %v417_v18, 1  ;;  %v768_v5 = vpack.c.bf16 %v690_v26, %v690_v26 }
  0x70   :  { %v412_v11 = vadd.f32 %v411_v60, %v410_v17  ;;  %v769_v37 = vpack.c.bf16 %v691_v48, %v691_v48  ;;  %v770_v47 = vpack.c.bf16 %v692_v55, %v692_v55  ;;  %v771_v7 = vpack.c.bf16 %v693_v54, %v693_v54 }
  0x71   :  { %v419_v53 = vadd.f32 %v418_v27, %v417_v18  ;;  %v498_v32 = vmul.f32 %v5803_v31, %v398_v10  ;;  %v499_v6 = vmul.f32 %v5803_v31, %v405_v1  ;;  %v872_v57 = vunpack.c.l.b16 %v760_v56 }
  0x72   :  { %v500_v50 = vmul.f32 %v5803_v31, %v412_v11  ;;  %v873_v35 = vunpack.c.l.b16 %v761_v43  ;;  %v874_v30 = vunpack.c.l.b16 %v762_v28  ;;  %v875_v38 = vunpack.c.l.b16 %v763_v40 }
  0x73   :  { %v501_v61 = vmul.f32 %v5803_v31, %v419_v53  ;;  %v520_v33 = vadd.f32 %v5810_v21, %v498_v32  ;;  %v521_v34 = vadd.f32 %v5810_v21, %v499_v6  ;;  %v876_v39 = vunpack.c.l.b16 %v764_v24 }
  0x74   :  { %v522_v59 = vadd.f32 %v5810_v21, %v500_v50  ;;  %v877_v0 = vunpack.c.l.b16 %v765_v46  ;;  %v878_v29 = vunpack.c.l.b16 %v766_v45  ;;  %v879_v26 = vunpack.c.l.b16 %v767_v4 }
  0x75   :  { %v523_v2 = vadd.f32 %v5810_v21, %v501_v61  ;;  %v772_v41 = vpack.c.bf16 %v520_v33, %v520_v33  ;;  %v773_v49 = vpack.c.bf16 %v521_v34, %v521_v34  ;;  %v880_v48 = vunpack.c.l.b16 %v768_v5 }
  0x76   :  { %v774_v51 = vpack.c.bf16 %v522_v59, %v522_v59  ;;  %v881_v52 = vunpack.c.l.b16 %v769_v37  ;;  %v882_v42 = vunpack.c.l.b16 %v770_v47  ;;  %v883_v55 = vunpack.c.l.b16 %v771_v7 }
  0x77   :  { %v775_v63 = vpack.c.bf16 %v523_v2, %v523_v2  ;;  %v884_v17 = vunpack.c.l.b16 %v772_v41  ;;  %v885_v54 = vunpack.c.l.b16 %v773_v49  ;;  %v947_v43 = vrot.slane %v873_v35, 7 }
  0x78   :  { %v886_v56 = vunpack.c.l.b16 %v774_v51  ;;  %v949_v58 = vrot.slane %v874_v30, 6  ;;  %v951_v18 = vrot.slane %v875_v38, 5  ;;  %v953_v28 = vrot.slane %v876_v39, 4 }
  0x79   :  { %v887_v14 = vunpack.c.l.b16 %v775_v63  ;;  %v955_v60 = vrot.slane %v877_v0, 3  ;;  %v948_v40 = vsel %vm913_vm1, %v947_v43, %v872_v57  ;;  %v957_v24 = vrot.slane %v878_v29, 2 }
  0x7a   :  { %v959_v46 = vrot.slane %v879_v26, 1  ;;  %v961_v10 = vrot.slane %v881_v52, 7  ;;  %v950_v1 = vsel %vm916_vm2, %v949_v58, %v948_v40  ;;  %v963_v27 = vrot.slane %v882_v42, 6 }
  0x7b   :  { %v965_v45 = vrot.slane %v883_v55, 5  ;;  %v967_v11 = vrot.slane %v884_v17, 4  ;;  %v952_v4 = vsel %vm919_vm3, %v951_v18, %v950_v1  ;;  %v969_v37 = vrot.slane %v885_v54, 3 }
  0x7c   :  { %v962_v5 = vsel %vm913_vm1, %v961_v10, %v880_v48  ;;  %v971_v53 = vrot.slane %v886_v56, 2  ;;  %v954_v32 = vsel %vm922_vm4, %v953_v28, %v952_v4  ;;  %v973_v47 = vrot.slane %v887_v14, 1 }
  0x7d   :  { %v964_v6 = vsel %vm916_vm2, %v963_v27, %v962_v5  ;;  %v382_v50 = vmul.f32 %v5566_v8, %v5432_v9  ;;  %v956_v7 = vsel %vm925_vm5, %v955_v60, %v954_v32  ;;  %v386_v35 = vmul.f32 %v5566_v8, %v5485_v22 }
  0x7e   :  { %v966_v57 = vsel %vm919_vm3, %v965_v45, %v964_v6  ;;  %v387_v61 = vmul.f32 %v5566_v8, %v5447_v12  ;;  %v958_v33 = vsel %vm928_vm6, %v957_v24, %v956_v7  ;;  %v388_v30 = vmul.f32 %v5566_v8, %v5452_v13 }
  0x7f   :  { %v968_v34 = vsel %vm922_vm4, %v967_v11, %v966_v57  ;;  %v389_v9 = vmul.f32 %v5566_v8, %v5462_v15  ;;  %v960_v59 = vsel %vm931_vm7, %v959_v46, %v958_v33  ;;  %v390_v22 = vmul.f32 %v5566_v8, %v5467_v16 }
  0x80   :  { %v970_v38 = vsel %vm925_vm5, %v969_v37, %v968_v34  ;;  %v420_v39 = vsel %vm92_vm0, %v382_v50, 0.0  ;;  %v427_v2 = vsel %vm92_vm0, %v5570_v19, 0.0  ;;  %v434_v13 = vsel %vm92_vm0, %v5574_v20, 0.0 }
  0x81   :  { %v972_v12 = vsel %vm928_vm6, %v971_v53, %v970_v38  ;;  %v421_v0 = vrot.slane %v420_v39, 4  ;;  %v428_v41 = vrot.slane %v427_v2, 4  ;;  %v435_v49 = vrot.slane %v434_v13, 4 }
  0x82   :  { %v974_v15 = vsel %vm931_vm7, %v973_v47, %v972_v12  ;;  %v441_v29 = vsel %vm92_vm0, %v5578_v23, 0.0  ;;  %v448_v26 = vsel %vm92_vm0, %v386_v35, 0.0  ;;  %v455_v19 = vsel %vm92_vm0, %v387_v61, 0.0 }
  0x83   :  { %v1018_v51 = vpack.c.b16 %v974_v15, %v960_v59  ;;  %v422_v16 = vadd.f32 %v421_v0, %v420_v39  ;;  %v442_v8 = vrot.slane %v441_v29, 4  ;;  %v429_v48 = vadd.f32 %v428_v41, %v427_v2  ;;  %v7610_v39 = vld [vmem:[#allocation6_spill] sm:$0xff] }
  0x84   :  { %v436_v52 = vadd.f32 %v435_v49, %v434_v13  ;;  %v449_v63 = vrot.slane %v448_v26, 4  ;;  %v456_v55 = vrot.slane %v455_v19, 4  ;;  %v462_v17 = vsel %vm92_vm0, %v388_v30, 0.0 }
  0x85   :  { %5178 = vmatmul.mubr.msk.bf16.vlgmr.msra.gmra.mrb[0].mxu0 %vm1045_vm8, %v1018_v51  ;;  %v423_v20 = vrot.slane %v422_v16, 2  ;;  %v443_v42 = vadd.f32 %v442_v8, %v441_v29  ;;  %v430_v54 = vrot.slane %v429_v48, 2  ;;  %v463_v43 = vrot.slane %v462_v17, 4 }
  0x86   :  { %v437_v56 = vrot.slane %v436_v52, 2  ;;  %v450_v23 = vadd.f32 %v449_v63, %v448_v26  ;;  %v457_v18 = vadd.f32 %v456_v55, %v455_v19  ;;  %v469_v28 = vsel %vm92_vm0, %v389_v9, 0.0 }
  0x87   :  { %v424_v58 = vadd.f32 %v423_v20, %v422_v16  ;;  %v444_v14 = vrot.slane %v443_v42, 2  ;;  %v431_v60 = vadd.f32 %v430_v54, %v429_v48  ;;  %v464_v46 = vadd.f32 %v463_v43, %v462_v17  ;;  %v5872_v20 = vld [vmem:[%s7530_s6 + $0x1] ss:$0 sm:$0xff] }
  0x88   :  { %v438_v40 = vadd.f32 %v437_v56, %v436_v52  ;;  %v451_v24 = vrot.slane %v450_v23, 2  ;;  %v458_v27 = vrot.slane %v457_v18, 2  ;;  %v470_v45 = vrot.slane %v469_v28, 4 }
  0x89   :  { %v425_v10 = vrot.slane %v424_v58, 1  ;;  %v445_v1 = vadd.f32 %v444_v14, %v443_v42  ;;  %v432_v11 = vrot.slane %v431_v60, 1  ;;  %v465_v37 = vrot.slane %v464_v46, 2 }
  0x8a   :  { %v439_v4 = vrot.slane %v438_v40, 1  ;;  %v452_v5 = vadd.f32 %v451_v24, %v450_v23  ;;  %v459_v6 = vadd.f32 %v458_v27, %v457_v18  ;;  %v471_v47 = vadd.f32 %v470_v45, %v469_v28 }
  0x8b   :  { %v426_v53 = vadd.f32 %v425_v10, %v424_v58  ;;  %v446_v32 = vrot.slane %v445_v1, 1  ;;  %v433_v50 = vadd.f32 %v432_v11, %v431_v60  ;;  %v466_v35 = vadd.f32 %v465_v37, %v464_v46 }
  0x8c   :  { %v440_v7 = vadd.f32 %v439_v4, %v438_v40  ;;  %v453_v57 = vrot.slane %v452_v5, 1  ;;  %v460_v33 = vrot.slane %v459_v6, 1  ;;  %v472_v34 = vrot.slane %v471_v47, 2 }
  0x8d   :  { %v447_v61 = vadd.f32 %v446_v32, %v445_v1  ;;  %v476_v30 = vsel %vm92_vm0, %v390_v22, 0.0  ;;  %v467_v59 = vrot.slane %v466_v35, 1  ;;  %v483_v12 = vsel %vm92_vm0, %v7610_v39, 0.0 }
  0x8e   :  { %v454_v9 = vadd.f32 %v453_v57, %v452_v5  ;;  %v477_v38 = vrot.slane %v476_v30, 4  ;;  %v461_v0 = vadd.f32 %v460_v33, %v459_v6  ;;  %v473_v2 = vadd.f32 %v472_v34, %v471_v47 }
  0x8f   :  { %v484_v13 = vrot.slane %v483_v12, 4  ;;  %v502_v15 = vmul.f32 %v5803_v31, %v426_v53  ;;  %v468_v41 = vadd.f32 %v467_v59, %v466_v35  ;;  %v503_v29 = vmul.f32 %v5803_v31, %v433_v50 }
  0x90   :  { %v478_v49 = vadd.f32 %v477_v38, %v476_v30  ;;  %v504_v51 = vmul.f32 %v5803_v31, %v440_v7  ;;  %v474_v16 = vrot.slane %v473_v2, 1  ;;  %v505_v22 = vmul.f32 %v5803_v31, %v447_v61 }
  0x91   :  { %v485_v8 = vadd.f32 %v484_v13, %v483_v12  ;;  %v506_v26 = vmul.f32 %v5803_v31, %v454_v9  ;;  %v507_v52 = vmul.f32 %v5803_v31, %v461_v0  ;;  %v508_v63 = vmul.f32 %v5803_v31, %v468_v41 }
  0x92   :  { %v479_v48 = vrot.slane %v478_v49, 2  ;;  %v524_v19 = vadd.f32 %v5810_v21, %v502_v15  ;;  %v5876_v42 = vadd.f32 %v5719_v25, %v5758_v36  ;;  %v475_v55 = vadd.f32 %v474_v16, %v473_v2 }
  0x93   :  { %v486_v17 = vrot.slane %v485_v8, 2  ;;  %v525_v54 = vadd.f32 %v5810_v21, %v503_v29  ;;  %v526_v23 = vadd.f32 %v5810_v21, %v504_v51  ;;  %v527_v43 = vadd.f32 %v5810_v21, %v505_v22 }
  0x94   :  { %v480_v56 = vadd.f32 %v479_v48, %v478_v49  ;;  %v528_v58 = vadd.f32 %v5810_v21, %v506_v26  ;;  %v509_v18 = vmul.f32 %v5803_v31, %v475_v55  ;;  %v529_v28 = vadd.f32 %v5810_v21, %v507_v52 }
  0x95   :  { %v487_v14 = vadd.f32 %v486_v17, %v485_v8  ;;  %v5886_v25 = vadd.f32 %v5872_v20, %v5763_v44  ;;  %v530_v60 = vadd.f32 %v5810_v21, %v508_v63  ;;  %v776_v40 = vpack.c.bf16 %v524_v19, %v524_v19 }
  0x96   :  { %v481_v36 = vrot.slane %v480_v56, 1  ;;  %v777_v24 = vpack.c.bf16 %v525_v54, %v525_v54  ;;  %v531_v10 = vadd.f32 %v5810_v21, %v509_v18  ;;  %v778_v37 = vpack.c.bf16 %v526_v23, %v526_v23 }
  0x97   :  { %v488_v46 = vrot.slane %v487_v14, 1  ;;  %v710_v1 = vrot.slane %v5886_v25, 1  ;;  %v711_v27 = vrot.slane %v5886_v25, 2  ;;  %v712_v11 = vrot.slane %v5886_v25, 3 }
  0x98   :  { %v482_v45 = vadd.f32 %v481_v36, %v480_v56  ;;  %v713_v4 = vrot.slane %v5886_v25, 4  ;;  %v714_v44 = vrot.slane %v5886_v25, 5  ;;  %v779_v53 = vpack.c.bf16 %v527_v43, %v527_v43 }
  0x99   :  { %v489_v5 = vadd.f32 %v488_v46, %v487_v14  ;;  %v780_v32 = vpack.c.bf16 %v528_v58, %v528_v58  ;;  %v781_v47 = vpack.c.bf16 %v529_v28, %v529_v28  ;;  %v782_v50 = vpack.c.bf16 %v530_v60, %v530_v60 }
  0x9a   :  { %v510_v6 = vmul.f32 %v5803_v31, %v482_v45  ;;  %v783_v7 = vpack.c.bf16 %v531_v10, %v531_v10  ;;  %v786_v35 = vpack.c.bf16 %v5886_v25, %v5886_v25  ;;  %v787_v61 = vpack.c.bf16 %v710_v1, %v710_v1 }
  0x9b   :  { %v511_v57 = vmul.f32 %v5803_v31, %v489_v5  ;;  %v788_v33 = vpack.c.bf16 %v711_v27, %v711_v27  ;;  %v789_v30 = vpack.c.bf16 %v712_v11, %v712_v11  ;;  %v790_v9 = vpack.c.bf16 %v713_v4, %v713_v4 }
  0x9c   :  { %v532_v34 = vadd.f32 %v5810_v21, %v510_v6  ;;  %v791_v59 = vpack.c.bf16 %v714_v44, %v714_v44  ;;  %v888_v39 = vunpack.c.l.b16 %v776_v40  ;;  %v889_v12 = vunpack.c.l.b16 %v777_v24 }
  0x9d   :  { %v533_v38 = vadd.f32 %v5810_v21, %v511_v57  ;;  %v890_v0 = vunpack.c.l.b16 %v778_v37  ;;  %v891_v13 = vunpack.c.l.b16 %v779_v53  ;;  %v892_v15 = vunpack.c.l.b16 %v780_v32 }
  0x9e   :  { %v784_v2 = vpack.c.bf16 %v532_v34, %v532_v34  ;;  %v893_v41 = vunpack.c.l.b16 %v781_v47  ;;  %v894_v49 = vunpack.c.l.b16 %v782_v50  ;;  %v895_v29 = vunpack.c.l.b16 %v783_v7 }
  0x9f   :  { %v785_v31 = vpack.c.bf16 %v533_v38, %v533_v38  ;;  %v898_v51 = vunpack.c.l.b16 %v786_v35  ;;  %v899_v8 = vunpack.c.l.b16 %v787_v61  ;;  %v900_v22 = vunpack.c.l.b16 %v788_v33 }
  0xa0   :  { %v896_v16 = vunpack.c.l.b16 %v784_v2  ;;  %v901_v26 = vunpack.c.l.b16 %v789_v30  ;;  %v902_v52 = vunpack.c.l.b16 %v790_v9  ;;  %v975_v63 = vrot.slane %v889_v12, 7 }
  0xa1   :  { %v897_v48 = vunpack.c.l.b16 %v785_v31  ;;  %v977_v19 = vrot.slane %v890_v0, 6  ;;  %v903_v21 = vunpack.c.l.b16 %v791_v59  ;;  %v979_v55 = vrot.slane %v891_v13, 5 }
  0xa2   :  { %v981_v17 = vrot.slane %v892_v15, 4  ;;  %v983_v54 = vrot.slane %v893_v41, 3  ;;  %v976_v56 = vsel %vm913_vm1, %v975_v63, %v888_v39  ;;  %v985_v23 = vrot.slane %v894_v49, 2 }
  0xa3   :  { %v989_v43 = vrot.slane %v897_v48, 7  ;;  %v991_v58 = vrot.slane %v898_v51, 6  ;;  %v978_v14 = vsel %vm916_vm2, %v977_v19, %v976_v56  ;;  %v987_v18 = vrot.slane %v895_v29, 1 }
  0xa4   :  { %v993_v28 = vrot.slane %v899_v8, 5  ;;  %v995_v36 = vrot.slane %v900_v22, 4  ;;  %v980_v60 = vsel %vm919_vm3, %v979_v55, %v978_v14  ;;  %v997_v24 = vrot.slane %v901_v26, 3  ;;  %v5106_v14 = vld [vmem:[%s7532_s8] ss:$0 sm:$0xff] }
  0xa5   :  { %v990_v40 = vsel %vm913_vm1, %v989_v43, %v896_v16  ;;  %v999_v46 = vrot.slane %v902_v52, 2  ;;  %v982_v10 = vsel %vm922_vm4, %v981_v17, %v980_v60  ;;  %v669_v27 = vmul.f32 %v5751_v62, %v5876_v42 }
  0xa6   :  { %v992_v1 = vsel %vm916_vm2, %v991_v58, %v990_v40  ;;  %v715_v45 = vrot.slane %v5886_v25, 6  ;;  %v984_v11 = vsel %vm925_vm5, %v983_v54, %v982_v10  ;;  %v1001_v44 = vrot.slane %v903_v21, 1  ;;  %v5108_v40 = vld [vmem:[%s7534_s10] ss:$0 sm:$0xff] }
  0xa7   :  { %v994_v4 = vsel %vm919_vm3, %v993_v28, %v992_v1  ;;  %v986_v5 = vsel %vm928_vm6, %v985_v23, %v984_v11  ;;  %v679_v53 = vadd.f32 %v5872_v20, %v669_v27  ;;  %v1175_v23 = vld [vmem:[%s7535_s11] sm:$0xf]  ;;  %vm1188_vm9 = vcmask 1043456  }
  0xa8   :  { %v996_v37 = vsel %vm922_vm4, %v995_v36, %v994_v4  ;;  %v988_v32 = vsel %vm931_vm7, %v987_v18, %v986_v5  ;;  %v792_v47 = vpack.c.bf16 %v715_v45, %v715_v45  ;;  %v5293_v43 = vmov 0.0   ;;  %v5107_v28 = vld [vmem:[%s7533_s9] ss:$0 sm:$0xff] }
  0xa9   :  { %v998_v6 = vsel %vm925_vm5, %v997_v24, %v996_v37  ;;  %v716_v42 = vrot.slane %v679_v53, 1  ;;  %v717_v25 = vrot.slane %v679_v53, 2  ;;  %v718_v50 = vrot.slane %v679_v53, 3  ;;  %5185 = vmatprep.subr.bf16.mxu1 %v5293_v43 }
  0xaa   :  { %v1000_v62 = vsel %vm928_vm6, %v999_v46, %v998_v6  ;;  %v719_v57 = vrot.slane %v679_v53, 4  ;;  %v720_v35 = vrot.slane %v679_v53, 5  ;;  %v721_v61 = vrot.slane %v679_v53, 6 }
  0xab   :  { %v1002_v7 = vsel %vm931_vm7, %v1001_v44, %v1000_v62  ;;  %v793_v34 = vpack.c.bf16 %v679_v53, %v679_v53  ;;  %v794_v30 = vpack.c.bf16 %v716_v42, %v716_v42  ;;  %v795_v9 = vpack.c.bf16 %v717_v25, %v717_v25 }
  0xac   :  { %v1019_v33 = vpack.c.b16 %v1002_v7, %v988_v32  ;;  %v796_v20 = vpack.c.bf16 %v718_v50, %v718_v50  ;;  %v797_v59 = vpack.c.bf16 %v719_v57, %v719_v57  ;;  %v798_v38 = vpack.c.bf16 %v720_v35, %v720_v35 }
  0xad   :  { %v799_v39 = vpack.c.bf16 %v721_v61, %v721_v61  ;;  %v904_v12 = vunpack.c.l.b16 %v792_v47  ;;  %v905_v0 = vunpack.c.l.b16 %v793_v34  ;;  %v906_v2 = vunpack.c.l.b16 %v794_v30 }
  0xae   :  { %5181 = vmatprep.mubr.msk.bf16.mxu0 %vm1045_vm8, %v1019_v33  ;;  %v907_v13 = vunpack.c.l.b16 %v795_v9  ;;  %v908_v15 = vunpack.c.l.b16 %v796_v20  ;;  %v909_v41 = vunpack.c.l.b16 %v797_v59  ;;  %v910_v31 = vunpack.c.l.b16 %v798_v38 }
  0xaf   :  { %v911_v49 = vunpack.c.l.b16 %v799_v39  ;;  %v1003_v29 = vrot.slane %v905_v0, 7  ;;  %v1005_v51 = vrot.slane %v906_v2, 6  ;;  %v1190_v58 = vsel %vm1188_vm9, %v1175_v23, 0  ;;  %v1245_v39 = vld [vmem:[%s7537_s13] sm:$0xf] }
  0xb0   :  { %v1007_v16 = vrot.slane %v907_v13, 5  ;;  %v1009_v8 = vrot.slane %v908_v15, 4  ;;  %v1011_v26 = vrot.slane %v909_v41, 3  ;;  %v1013_v52 = vrot.slane %v910_v31, 2  ;;  %5186 = vmatpush3.bf16.msra.mxu1 %v1190_v58 }
  0xb1   :  { %v1004_v22 = vsel %vm913_vm1, %v1003_v29, %v904_v12  ;;  %v1015_v19 = vrot.slane %v911_v49, 1  ;;  %5191 = vmatprep.subr.bf16.mxu1 %v5293_v43  ;;  %vm5294_vm10 = vmmov 0   ;;  %vm1184_vm11 = vcmask 64512  }
  0xb2   :  { %v1006_v48 = vsel %vm916_vm2, %v1005_v51, %v1004_v22  ;;  %5187 = vmatprep.mubr.msk.bf16.mxu1 %vm5294_vm10, %v5293_v43  ;;  %v1265_v31 = vsel %vm1188_vm9, %v1245_v39, 0  ;;  %vm1257_vm12 = vcmask 1044480   ;;  %v2392_v22 = vpop.permute.xlu0 %2391  ;;  %vm2460_vm13 = vcmask 1045504  }
  0xb3   :  { %v1008_v63 = vsel %vm919_vm3, %v1007_v16, %v1006_v48  ;;  %v5124_v16 = vld [vmem:[%s7535_s11 + $0x4] sm:$0xf]  ;;  %s5295_s11 = smov 120   ;;  %vm4954_vm14 = vcmask 517120   ;;  %vm4939_vm15 = vcmask 1040384  }
  0xb4   :  { %v1010_v21 = vsel %vm922_vm4, %v1009_v8, %v1008_v63  ;;  %v2470_v8 = vsel %vm1188_vm9, %v5124_v16, 0  ;;  %v2420_v63 = vpop.permute.xlu1 %2419 }
  0xb5   :  { %v1012_v55 = vsel %vm925_vm5, %v1011_v26, %v1010_v21 }
  0xb6   :  { %v1014_v17 = vsel %vm928_vm6, %v1013_v52, %v1012_v55  ;;  %v2406_v48 = vpop.permute.xlu0 %2405 }
  0xb7   :  { %v1016_v54 = vsel %vm931_vm7, %v1015_v19, %v1014_v17 }
  0xb8   :  { %v1020_v56 = vpack.c.b16 %v1016_v54, %v1016_v54 }
  0xba   :  { %5182 = vmatmul.mubr.msk.bf16.gmra.mrb[4].mxu0 %vm1045_vm8, %v1020_v56 }
 0x158   :  { %v5179_v18 = vpop.f32.mrb[0].mxu0 }
 0x159   :  { %v1131_v36 = vadd.f32 %v5179_v18, %v5106_v14  ;;  %v1092_v60 = vpop.f32.mrb[1].mxu0 }
 0x15a   :  { %v1129_v24 = vadd.f32 %v5106_v14, %v1092_v60  ;;  %v5180_v46 = vpop.f32.mrb[2].mxu0 }
 0x15b   :  { %v1142_v10 = vmul.f32 %v5107_v28, %v1131_v36  ;;  %v1132_v1 = vadd.f32 %v5180_v46, %v5106_v14  ;;  %v1095_v27 = vpop.f32.mrb[3].mxu0  ;;  %v2394_v26 = vadd.f32 %v5180_v46, %v2392_v22 }
 0x15c   :  { %v1140_v45 = vmul.f32 %v5107_v28, %v1129_v24  ;;  %v1130_v11 = vadd.f32 %v5106_v14, %v1095_v27 }
 0x15d   :  { %v1153_v4 = vadd.f32 %v5108_v40, %v1142_v10  ;;  %v1143_v44 = vmul.f32 %v5107_v28, %v1132_v1  ;;  %v2408_v52 = vmul.f32 %v2406_v48, %v2394_v26 }
 0x15e   :  { %v1151_v5 = vadd.f32 %v5108_v40, %v1140_v45  ;;  %v1141_v37 = vmul.f32 %v5107_v28, %v1130_v11 }
 0x15f   :  { %v1157_v53 = vadd.f32 3.0, %v1153_v4  ;;  %v1154_v32 = vadd.f32 %v5108_v40, %v1143_v44  ;;  %v2422_v19 = vadd.f32 %v2420_v63, %v2408_v52 }
 0x160   :  { %v1155_v6 = vadd.f32 3.0, %v1151_v5  ;;  %v1152_v47 = vadd.f32 %v5108_v40, %v1141_v37 }
 0x161   :  { %v1161_v62 = vmax.f32 %v1157_v53, 0.0  ;;  %v1158_v42 = vadd.f32 3.0, %v1154_v32  ;;  %v2426_v21 = vadd.f32 3.0, %v2422_v19 }
 0x162   :  { %v1159_v25 = vmax.f32 %v1155_v6, 0.0  ;;  %v1156_v50 = vadd.f32 3.0, %v1152_v47 }
 0x163   :  { %v1165_v7 = vmin.f32 %v1161_v62, 6.0  ;;  %v1162_v57 = vmax.f32 %v1158_v42, 0.0  ;;  %v2430_v18 = vmax.f32 %v2426_v21, 0.0 }
 0x164   :  { %v1163_v35 = vmin.f32 %v1159_v25, 6.0  ;;  %v1160_v61 = vmax.f32 %v1156_v50, 0.0 }
 0x165   :  { %v1166_v33 = vmin.f32 %v1162_v57, 6.0  ;;  %v1169_v34 = vmul.f32 0.16666667, %v1165_v7  ;;  %v2434_v46 = vmin.f32 %v2430_v18, 6.0 }
 0x166   :  { %v1167_v30 = vmul.f32 0.16666667, %v1163_v35  ;;  %v1164_v9 = vmin.f32 %v1160_v61, 6.0 }
 0x167   :  { %v1170_v20 = vmul.f32 0.16666667, %v1166_v33  ;;  %v1173_v12 = vmul.f32 %v1169_v34, %v1153_v4 }
 0x168   :  { %v1168_v59 = vmul.f32 0.16666667, %v1164_v9  ;;  %v1171_v0 = vmul.f32 %v1167_v30, %v1151_v5  ;;  %v2438_v5 = vmul.f32 0.16666667, %v2434_v46 }
 0x169   :  { %v1174_v38 = vmul.f32 %v1170_v20, %v1154_v32  ;;  %v5130_v20 = vld [vmem:[%s7537_s13 + $0x4] sm:$0xf] }
 0x16a   :  { %v1172_v2 = vmul.f32 %v1168_v59, %v1152_v47  ;;  %v2442_v62 = vmul.f32 %v2438_v5, %v2422_v19  ;;  %v2544_v59 = vsel %vm1188_vm9, %v5130_v20, 0 }
 0x16b   :  { %v1247_v13 = vpack.c.bf16 %v1174_v38, %v1174_v38 }
 0x16c   :  { %v1246_v15 = vpack.c.bf16 %v1173_v12, %v1172_v2  ;;  %v1176_v41 = vpack.c.bf16 %v1172_v2, %v1171_v0  ;;  %v5109_v12 = vld [vmem:[%s7536_s12] ss:$0 sm:$0xff] }
 0x16d   :  { %v1259_v49 = vrot.slane %v1247_v13, 3 }
 0x16e   :  { %v1258_v29 = vrot.slane %v1246_v15, 3  ;;  %5188 = vmatmul.mubr.msk.bf16.vlgmr.msra.gmra.mrb[0].mxu1 %vm1184_vm11, %v1176_v41 }
 0x16f   :  { %5192 = vmatpush3.bf16.msra.mxu1 %v1265_v31  ;;  %5193 = vmatprep.mubr.msk.bf16.mxu1 %vm5294_vm10, %v5293_v43 }
 0x170   :  { %v1260_v51 = vsel %vm1257_vm12, %v1258_v29, %v1259_v49  ;;  %5197 = vmatprep.subr.bf16.mxu1 %v5293_v43 }
 0x176   :  { %5194 = vmatmul.mubr.msk.bf16.vlgmr.msra.gmra.mrb[4].mxu1 %vm1184_vm11, %v1260_v51 }
 0x177   :  { %5198 = vmatpush3.bf16.msra.mxu1 %v2470_v8  ;;  %5199 = vmatprep.mubr.msk.bf16.mxu1 %vm5294_vm10, %v5293_v43 }
 0x178   :  { %5203 = vmatprep.subr.bf16.mxu1 %v5293_v43 }
 0x18d   :  { %v5183_v55 = vpop.f32.mrb[4].mxu0 }
 0x18e   :  { %v2397_v17 = vadd.f32 %v5183_v55, %v2392_v22  ;;  %v1108_v54 = vpop.f32.mrb[5].mxu0 }
 0x18f   :  { %v2395_v56 = vadd.f32 %v2392_v22, %v1108_v54  ;;  %v5184_v23 = vpop.f32.mrb[6].mxu0 }
 0x190   :  { %v2411_v58 = vmul.f32 %v2406_v48, %v2397_v17  ;;  %v1111_v14 = vpop.f32.mrb[7].mxu0 }
 0x191   :  { %v2409_v28 = vmul.f32 %v2406_v48, %v2395_v56  ;;  %v2396_v36 = vadd.f32 %v2392_v22, %v1111_v14 }
 0x192   :  { %v2425_v60 = vadd.f32 %v2420_v63, %v2411_v58 }
 0x193   :  { %v2423_v40 = vadd.f32 %v2420_v63, %v2409_v28  ;;  %v2410_v24 = vmul.f32 %v2406_v48, %v2396_v36  ;;  %v7611_v28 = vld [vmem:[#allocation7_spill] sm:$0xff] }
 0x194   :  { %v2429_v10 = vadd.f32 3.0, %v2425_v60 }
 0x195   :  { %v2427_v1 = vadd.f32 3.0, %v2423_v40  ;;  %v2424_v27 = vadd.f32 %v2420_v63, %v2410_v24 }
 0x196   :  { %v2433_v45 = vmax.f32 %v2429_v10, 0.0 }
 0x197   :  { %v2431_v11 = vmax.f32 %v2427_v1, 0.0  ;;  %v2428_v4 = vadd.f32 3.0, %v2424_v27 }
 0x198   :  { %v2437_v44 = vmin.f32 %v2433_v45, 6.0 }
 0x199   :  { %v2435_v37 = vmin.f32 %v2431_v11, 6.0  ;;  %v2432_v53 = vmax.f32 %v2428_v4, 0.0 }
 0x19a   :  { %v2441_v32 = vmul.f32 0.16666667, %v2437_v44 }
 0x19b   :  { %v2439_v6 = vmul.f32 0.16666667, %v2435_v37  ;;  %v2436_v47 = vmin.f32 %v2432_v53, 6.0 }
 0x19c   :  { %v2445_v7 = vmul.f32 %v2441_v32, %v2425_v60 }
 0x19d   :  { %v2443_v42 = vmul.f32 %v2439_v6, %v2423_v40  ;;  %v2440_v25 = vmul.f32 0.16666667, %v2436_v47 }
 0x19f   :  { %v2444_v50 = vmul.f32 %v2440_v25, %v2424_v27  ;;  %v2448_v57 = vpack.c.bf16 %v2443_v42, %v2442_v62 }
 0x1a1   :  { %v2527_v35 = vpack.c.bf16 %v2445_v7, %v2444_v50  ;;  %v2449_v61 = vpack.c.bf16 %v2444_v50, %v2444_v50  ;;  %v2461_v34 = vrot.slane %v2448_v57, 2 }
 0x1a3   :  { %v2537_v33 = vrot.slane %v2527_v35, 1  ;;  %v2462_v30 = vrot.slane %v2449_v61, 2 }
 0x1a5   :  { %2538 = vrot.lane.b32.xlu0 %v2537_v33, %s5295_s11  ;;  %v2463_v9 = vsel %vm2460_vm13, %v2461_v34, %v2462_v30 }
 0x1a6   :  { %2464 = vrot.lane.b32.xlu1 %v2463_v9, %s5295_s11 }
 0x217   :  { %v2539_v39 = vpop.permute.xlu0 %2538 }
 0x218   :  { %v2465_v38 = vpop.permute.xlu1 %2464 }
 0x219   :  { %5200 = vmatmul.mubr.msk.bf16.vlgmr.msra.gmra.mrb[8].mxu1 %vm1184_vm11, %v2465_v38 }
 0x21a   :  { %5204 = vmatpush3.bf16.msra.mxu1 %v2544_v59  ;;  %5205 = vmatprep.mubr.msk.bf16.mxu1 %vm5294_vm10, %v5293_v43  ;;  %v5113_v43 = vld [vmem:[%s7538_s14] ss:$0 sm:$0xff] }
 0x221   :  { %5206 = vmatmul.mubr.msk.bf16.vlgmr.msra.gmra.mrb[12].mxu1 %vm1184_vm11, %v2539_v39 }
 0x241   :  { %v1226_v0 = vpop.f32.mrb[0].mxu1 }
 0x242   :  { %v1227_v2 = vadd.f32 %v5109_v12, %v1226_v0  ;;  %v5189_v13 = vpop.f32.mrb[1].mxu1 }
 0x243   :  { %v1229_v15 = vpop.f32.mrb[2].mxu1 }
 0x244   :  { %v5111_v41 = vmul.f32 -1.442695, %v1227_v2  ;;  %v1230_v31 = vadd.f32 %v5109_v12, %v1229_v15  ;;  %v5190_v49 = vpop.f32.mrb[3].mxu1 }
 0x246   :  { %5221 = vpow2.f32 %v5111_v41  ;;  %v5112_v29 = vmul.f32 -1.442695, %v1230_v31 }
 0x248   :  { %5223 = vpow2.f32 %v5112_v29 }
 0x249   :  { %v1301_v51 = vpop.f32.mrb[4].mxu1 }
 0x24a   :  { %v1302_v16 = vadd.f32 %v5113_v43, %v1301_v51  ;;  %v5195_v8 = vpop.f32.mrb[5].mxu1 }
 0x24b   :  { %v1304_v22 = vpop.f32.mrb[6].mxu1 }
 0x24c   :  { %v5115_v26 = vmul.f32 -1.442695, %v1302_v16  ;;  %v1305_v48 = vadd.f32 %v5113_v43, %v1304_v22  ;;  %v5196_v52 = vpop.f32.mrb[7].mxu1 }
 0x24e   :  { %5225 = vpow2.f32 %v5115_v26  ;;  %v5116_v63 = vmul.f32 -1.442695, %v1305_v48 }
 0x250   :  { %v5222_v19 = vpop.eup %5221  ;;  %5227 = vpow2.f32 %v5116_v63 }
 0x251   :  { %v1239_v21 = vadd.f32 1.0, %v5222_v19 }
 0x252   :  { %v5224_v55 = vpop.eup %5223 }
 0x253   :  { %5229 = vrcp.f32 %v1239_v21  ;;  %v1240_v17 = vadd.f32 1.0, %v5224_v55 }
 0x255   :  { %5231 = vrcp.f32 %v1240_v17 }
 0x258   :  { %v5226_v54 = vpop.eup %5225 }
 0x259   :  { %v1314_v56 = vadd.f32 1.0, %v5226_v54 }
 0x25a   :  { %v5228_v23 = vpop.eup %5227 }
 0x25b   :  { %5233 = vrcp.f32 %v1314_v56  ;;  %v1315_v58 = vadd.f32 1.0, %v5228_v23 }
 0x25d   :  { %v5230_v14 = vpop.eup %5229  ;;  %5235 = vrcp.f32 %v1315_v58 }
 0x25e   :  { %v1322_v18 = vcombine.high %v5230_v14, %v5230_v14  ;;  %v1329_v36 = vrot.slane %v5230_v14, %v7611_v28 }
 0x25f   :  { %v5232_v60 = vpop.eup %5231 }
 0x260   :  { %v1336_v40 = vrot.slane %v1322_v18, %v7611_v28  ;;  %v1337_v24 = vcombine.high %v1329_v36, %v1329_v36  ;;  %v5978_v10 = vrot.slane %v1329_v36, %v7611_v28  ;;  %v1371_v46 = vcombine.high %v5232_v60, %v5232_v60 }
 0x261   :  { %v1378_v11 = vrot.slane %v5232_v60, %v7611_v28 }
 0x262   :  { %v1338_v27 = vcombine.high %v1336_v40, %v1336_v40  ;;  %v5981_v45 = vrot.slane %v1336_v40, %v7611_v28  ;;  %v5985_v4 = vrot.slane %v1337_v24, %v7611_v28  ;;  %v1367_v5 = vcombine.high %v5978_v10, %v5978_v10 }
 0x263   :  { %v1519_v37 = vrot.slane %v5978_v10, %v5561_v3  ;;  %v5992_v53 = vrot.slane %v1371_v46, %v7611_v28  ;;  %v1386_v42 = vcombine.high %v1378_v11, %v1378_v11  ;;  %v6001_v25 = vrot.slane %v1378_v11, %v7611_v28 }
 0x264   :  { %v5996_v47 = vrot.slane %v1338_v27, %v7611_v28  ;;  %v1368_v62 = vcombine.high %v5981_v45, %v5981_v45  ;;  %v1369_v50 = vcombine.high %v5985_v4, %v5985_v4  ;;  %v1523_v61 = vrot.slane %v5985_v4, %v5561_v3 }
 0x265   :  { %v5234_v1 = vpop.eup %5233  ;;  %v1527_v33 = vrot.slane %v1367_v5, %v5561_v3  ;;  %v1535_v39 = vrot.slane %v5981_v45, %v5561_v3  ;;  %v1387_v12 = vcombine.high %v5992_v53, %v5992_v53  ;;  %v1408_v49 = vrot.slane %v1386_v42, %v7611_v28 }
 0x266   :  { %v1420_v32 = vcombine.high %v5234_v1, %v5234_v1  ;;  %v1427_v6 = vrot.slane %v5234_v1, %v7611_v28  ;;  %v1401_v21 = vrot.slane %v5992_v53, %v7611_v28  ;;  %v1370_v56 = vcombine.high %v5996_v47, %v5996_v47 }
 0x267   :  { %v5236_v44 = vpop.eup %5235  ;;  %v1531_v23 = vrot.slane %v1369_v50, %v5561_v3  ;;  %v1415_v18 = vrot.slane %v1387_v12, %v7611_v28  ;;  %v1416_v36 = vcombine.high %v6001_v25, %v6001_v25  ;;  %v1417_v60 = vcombine.high %v1408_v49, %v1408_v49 }
 0x268   :  { %v1434_v7 = vrot.slane %v1420_v32, %v7611_v28  ;;  %v1435_v57 = vcombine.high %v1427_v6, %v1427_v6  ;;  %v1469_v35 = vcombine.high %v5236_v44, %v5236_v44  ;;  %v1443_v34 = vrot.slane %v1427_v6, %v7611_v28 }
 0x269   :  { %v1476_v30 = vrot.slane %v5236_v44, %v7611_v28  ;;  %v1539_v45 = vrot.slane %v5996_v47, %v5561_v3  ;;  %v1543_v11 = vrot.slane %v1368_v62, %v5561_v3  ;;  %v1547_v5 = vrot.slane %v1370_v56, %v5561_v3 }
 0x26a   :  { %v1436_v9 = vcombine.high %v1434_v7, %v1434_v7  ;;  %v1450_v20 = vrot.slane %v1434_v7, %v7611_v28  ;;  %v1457_v59 = vrot.slane %v1435_v57, %v7611_v28  ;;  %v1483_v38 = vrot.slane %v1469_v35, %v7611_v28 }
 0x26b   :  { %v1484_v0 = vcombine.high %v1476_v30, %v1476_v30  ;;  %v1492_v2 = vrot.slane %v1476_v30, %v7611_v28  ;;  %v1551_v53 = vrot.slane %v6001_v25, %v5561_v3  ;;  %v1555_v42 = vrot.slane %v1408_v49, %v5561_v3 }
 0x26c   :  { %v1464_v13 = vrot.slane %v1436_v9, %v7611_v28  ;;  %v1466_v15 = vcombine.high %v1450_v20, %v1450_v20  ;;  %v1586_v41 = vcombine.low %v1443_v34, %v1457_v59  ;;  %v5117_v31 = vcombine.high %v1443_v34, %v1457_v59 }
 0x26d   :  { %v1485_v29 = vcombine.high %v1483_v38, %v1483_v38  ;;  %v1506_v43 = vrot.slane %v1484_v0, %v7611_v28  ;;  %v1514_v51 = vcombine.high %v1492_v2, %v1492_v2  ;;  %v1499_v26 = vrot.slane %v1483_v38, %v7611_v28 }
 0x26e   :  { %v1588_v16 = vcombine.low %v1450_v20, %v1464_v13  ;;  %v1595_v8 = vrot.slane %v1586_v41, %v7611_v28  ;;  %v1602_v22 = vrot.slane %v5117_v31, %v7611_v28  ;;  %v1468_v48 = vcombine.high %v1464_v13, %v1464_v13 }
 0x26f   :  { %v1513_v52 = vrot.slane %v1485_v29, %v7611_v28  ;;  %v1515_v63 = vcombine.high %v1506_v43, %v1506_v43  ;;  %v1635_v19 = vcombine.low %v1506_v43, %v1514_v51  ;;  %v1616_v17 = vrot.slane %v1466_v15, %v7611_v28 }
 0x270   :  { %v1609_v55 = vrot.slane %v1588_v16, %v7611_v28  ;;  %v1617_v54 = vcombine.low %v1595_v8, %v1602_v22  ;;  %v1634_v58 = vcombine.low %v1468_v48, %v1492_v2  ;;  %v1559_v50 = vrot.slane %v1416_v36, %v5561_v3 }
 0x271   :  { %v1636_v14 = vcombine.low %v1515_v63, %v1499_v26  ;;  %v1650_v46 = vrot.slane %v1635_v19, %v7611_v28  ;;  %v1664_v27 = vrot.slane %v1513_v52, %v7611_v28  ;;  %v1567_v7 = vrot.slane %v1401_v21, %v5561_v3 }
 0x272   :  { %v1618_v40 = vcombine.low %v1609_v55, %v1616_v17  ;;  %v1643_v24 = vrot.slane %v1634_v58, %v7611_v28  ;;  %v1625_v4 = vrot.slane %v1617_v54, %v7611_v28  ;;  %v1563_v62 = vrot.slane %v1417_v60, %v5561_v3 }
 0x273   :  { %v1657_v1 = vrot.slane %v1636_v14, %v7611_v28  ;;  %v1571_v57 = vrot.slane %v1415_v18, %v5561_v3 }
 0x274   :  { %v1632_v44 = vrot.slane %v1618_v40, %v7611_v28  ;;  %v1665_v32 = vcombine.low %v1643_v24, %v1650_v46 }
 0x275   :  { %v1666_v6 = vcombine.low %v1657_v1, %v1664_v27 }
 0x276   :  { %v1633_v47 = vcombine.low %v1625_v4, %v1632_v44  ;;  %v1673_v35 = vrot.slane %v1665_v32, %v7611_v28 }
 0x277   :  { %v1680_v34 = vrot.slane %v1666_v6, %v7611_v28 }
 0x278   :  { %v6058_v25 = vmul.f32 %v1633_v47, %v1519_v37  ;;  %v6060_v30 = vmul.f32 %v1633_v47, %v1523_v61  ;;  %v6062_v9 = vmul.f32 %v1633_v47, %v1527_v33  ;;  %v6064_v20 = vmul.f32 %v1633_v47, %v1531_v23 }
 0x279   :  { %v1681_v59 = vcombine.low %v1673_v35, %v1680_v34  ;;  %v6066_v38 = vmul.f32 %v1633_v47, %v1535_v39  ;;  %v6068_v12 = vmul.f32 %v1633_v47, %v1539_v45  ;;  %v6070_v0 = vmul.f32 %v1633_v47, %v1543_v11 }
 0x27a   :  { %7612 = vst [vmem:[#allocation6_spill] sm:$0xff] %v6058_v25  ;;  %7613 = vst [vmem:[#allocation7_spill] sm:$0xff] %v6060_v30  ;;  %v1712_v2 = vcombine.high %v6058_v25, %v6058_v25  ;;  %v1719_v10 = vrot.slane %v6058_v25, %v7611_v28  ;;  %v1760_v37 = vcombine.high %v6060_v30, %v6060_v30 }
 0x27b   :  { %7614 = vst [vmem:[#allocation8_spill] sm:$0xff] %v6062_v9  ;;  %7615 = vst [vmem:[#allocation9_spill] sm:$0xff] %v6064_v20  ;;  %v1767_v61 = vrot.slane %v6060_v30, %v7611_v28  ;;  %v6080_v33 = vmul.f32 %v1681_v59, %v1547_v5  ;;  %v6082_v39 = vmul.f32 %v1681_v59, %v1551_v53 }
 0x27c   :  { %7616 = vst [vmem:[#allocation10_spill] sm:$0xff] %v6066_v38  ;;  %7617 = vst [vmem:[#allocation11_spill] sm:$0xff] %v6068_v12  ;;  %v6084_v13 = vmul.f32 %v1681_v59, %v1555_v42  ;;  %v6086_v15 = vmul.f32 %v1681_v59, %v1559_v50  ;;  %v6088_v41 = vmul.f32 %v1681_v59, %v1563_v62 }
 0x27d   :  { %7618 = vst [vmem:[#allocation12_spill] sm:$0xff] %v6070_v0  ;;  %7619 = vst [vmem:[#allocation13_spill] sm:$0xff] %v6080_v33  ;;  %v6090_v31 = vmul.f32 %v1681_v59, %v1567_v7  ;;  %v6092_v49 = vmul.f32 %v1681_v59, %v1571_v57  ;;  %v1726_v29 = vrot.slane %v1712_v2, %v7611_v28 }
 0x27e   :  { %7620 = vst [vmem:[#allocation14_spill] sm:$0xff] %v6082_v39  ;;  %7621 = vst [vmem:[#allocation15_spill] sm:$0xff] %v6084_v13  ;;  %v1727_v43 = vcombine.high %v1719_v10, %v1719_v10  ;;  %v1774_v51 = vrot.slane %v1760_v37, %v7611_v28  ;;  %v1775_v16 = vcombine.high %v1767_v61, %v1767_v61 }
 0x27f   :  { %7622 = vst [vmem:[#allocation16_spill] sm:$0xff] %v6086_v15  ;;  %7623 = vst [vmem:[#allocation17_spill] sm:$0xff] %v6088_v41  ;;  %v1728_v8 = vcombine.high %v1726_v29, %v1726_v29  ;;  %v6097_v22 = vrot.slane %v1726_v29, %v7611_v28  ;;  %v6100_v26 = vrot.slane %v1767_v61, %v7611_v28 }
 0x280   :  { %7624 = vst [vmem:[#allocation18_spill] sm:$0xff] %v6090_v31  ;;  %7625 = vst [vmem:[#allocation19_spill] sm:$0xff] %v6092_v49  ;;  %v1808_v48 = vcombine.high %v6062_v9, %v6062_v9  ;;  %v6105_v52 = vrot.slane %v1719_v10, %v7611_v28  ;;  %v6108_v63 = vrot.slane %v1727_v43, %v7611_v28 }
 0x281   :  { %v1776_v19 = vcombine.high %v1774_v51, %v1774_v51  ;;  %v6111_v21 = vrot.slane %v1774_v51, %v7611_v28  ;;  %v1815_v55 = vrot.slane %v6062_v9, %v7611_v28  ;;  %v6116_v17 = vrot.slane %v1728_v8, %v7611_v28 }
 0x282   :  { %v6121_v56 = vrot.slane %v1775_v16, %v7611_v28  ;;  %v1822_v23 = vrot.slane %v1808_v48, %v7611_v28  ;;  %v1856_v18 = vcombine.high %v6064_v20, %v6064_v20  ;;  %v1863_v36 = vrot.slane %v6064_v20, %v7611_v28 }
 0x283   :  { %v1823_v14 = vcombine.high %v1815_v55, %v1815_v55  ;;  %v1904_v24 = vcombine.high %v6066_v38, %v6066_v38  ;;  %v1911_v46 = vrot.slane %v6066_v38, %v7611_v28  ;;  %v6138_v1 = vrot.slane %v1776_v19, %v7611_v28 }
 0x284   :  { %v1824_v60 = vcombine.high %v1822_v23, %v1822_v23  ;;  %v6131_v40 = vrot.slane %v1822_v23, %v7611_v28  ;;  %v1870_v27 = vrot.slane %v1856_v18, %v7611_v28  ;;  %v1871_v45 = vcombine.high %v1863_v36, %v1863_v36 }
 0x285   :  { %v6142_v11 = vrot.slane %v1863_v36, %v7611_v28  ;;  %v1918_v5 = vrot.slane %v1904_v24, %v7611_v28  ;;  %v1919_v53 = vcombine.high %v1911_v46, %v1911_v46  ;;  %v6150_v32 = vrot.slane %v1815_v55, %v7611_v28 }
 0x286   :  { %v6153_v6 = vrot.slane %v1823_v14, %v7611_v28  ;;  %v1872_v42 = vcombine.high %v1870_v27, %v1870_v27  ;;  %v6156_v50 = vrot.slane %v1870_v27, %v7611_v28  ;;  %v6159_v7 = vrot.slane %v1824_v60, %v7611_v28 }
 0x287   :  { %v6164_v62 = vrot.slane %v1871_v45, %v7611_v28  ;;  %v1920_v35 = vcombine.high %v1918_v5, %v1918_v5  ;;  %v6169_v34 = vrot.slane %v1911_v46, %v7611_v28  ;;  %v6172_v59 = vrot.slane %v1918_v5, %v7611_v28 }
 0x288   :  { %v1952_v2 = vcombine.high %v6068_v12, %v6068_v12  ;;  %v6177_v10 = vrot.slane %v1872_v42, %v7611_v28  ;;  %v6180_v37 = vrot.slane %v1919_v53, %v7611_v28  ;;  %v1959_v61 = vrot.slane %v6068_v12, %v7611_v28 }
 0x289   :  { %v2000_v29 = vcombine.high %v6070_v0, %v6070_v0  ;;  %v2007_v16 = vrot.slane %v6070_v0, %v7611_v28  ;;  %v2048_v8 = vcombine.high %v6080_v33, %v6080_v33  ;;  %v2055_v23 = vrot.slane %v6080_v33, %v7611_v28 }
 0x28a   :  { %v1966_v51 = vrot.slane %v1952_v2, %v7611_v28  ;;  %v1967_v48 = vcombine.high %v1959_v61, %v1959_v61  ;;  %v6194_v19 = vrot.slane %v1959_v61, %v7611_v28  ;;  %v6205_v24 = vrot.slane %v1920_v35, %v7611_v28 }
 0x28b   :  { %v2014_v55 = vrot.slane %v2000_v29, %v7611_v28  ;;  %v2015_v60 = vcombine.high %v2007_v16, %v2007_v16  ;;  %v2096_v45 = vcombine.high %v6082_v39, %v6082_v39  ;;  %v6217_v42 = vrot.slane %v2007_v16, %v7611_v28 }
 0x28c   :  { %v1968_v18 = vcombine.high %v1966_v51, %v1966_v51  ;;  %v6202_v36 = vrot.slane %v1966_v51, %v7611_v28  ;;  %v6210_v27 = vrot.slane %v1967_v48, %v7611_v28  ;;  %v2062_v2 = vrot.slane %v2048_v8, %v7611_v28 }
 0x28d   :  { %v2016_v53 = vcombine.high %v2014_v55, %v2014_v55  ;;  %v6226_v29 = vrot.slane %v2014_v55, %v7611_v28  ;;  %v2063_v51 = vcombine.high %v2055_v23, %v2055_v23  ;;  %v6231_v5 = vrot.slane %v2015_v60, %v7611_v28 }
 0x28e   :  { %v6221_v35 = vrot.slane %v1968_v18, %v7611_v28  ;;  %v2064_v16 = vcombine.high %v2062_v2, %v2062_v2  ;;  %v2103_v8 = vrot.slane %v6082_v39, %v7611_v28  ;;  %v6236_v18 = vrot.slane %v2062_v2, %v7611_v28 }
 0x28f   :  { %v2110_v46 = vrot.slane %v2096_v45, %v7611_v28  ;;  %v2144_v55 = vcombine.high %v6084_v13, %v6084_v13  ;;  %v2151_v61 = vrot.slane %v6084_v13, %v7611_v28  ;;  %v6244_v48 = vrot.slane %v2016_v53, %v7611_v28 }
 0x290   :  { %v6247_v60 = vrot.slane %v2055_v23, %v7611_v28  ;;  %v2111_v43 = vcombine.high %v2103_v8, %v2103_v8  ;;  %v6250_v14 = vrot.slane %v2103_v8, %v7611_v28  ;;  %v6253_v2 = vrot.slane %v2063_v51, %v7611_v28 }
 0x291   :  { %v2112_v45 = vcombine.high %v2110_v46, %v2110_v46  ;;  %v6256_v57 = vrot.slane %v2110_v46, %v7611_v28  ;;  %v2158_v47 = vrot.slane %v2144_v55, %v7611_v28  ;;  %v6260_v4 = vrot.slane %v2064_v16, %v7611_v28 }
 0x292   :  { %v6263_v53 = vrot.slane %v2111_v43, %v7611_v28  ;;  %v2159_v23 = vcombine.high %v2151_v61, %v2151_v61  ;;  %v2192_v8 = vcombine.high %v6086_v15, %v6086_v15  ;;  %v6275_v55 = vrot.slane %v2151_v61, %v7611_v28 }
 0x293   :  { %v6270_v44 = vrot.slane %v2112_v45, %v7611_v28  ;;  %v2160_v16 = vcombine.high %v2158_v47, %v2158_v47  ;;  %v6278_v43 = vrot.slane %v2158_v47, %v7611_v28  ;;  %v2199_v58 = vrot.slane %v6086_v15, %v7611_v28 }
 0x294   :  { %v2206_v54 = vrot.slane %v2192_v8, %v7611_v28  ;;  %v2240_v46 = vcombine.high %v6088_v41, %v6088_v41  ;;  %v2247_v61 = vrot.slane %v6088_v41, %v7611_v28  ;;  %v6292_v47 = vrot.slane %v2159_v23, %v7611_v28 }
 0x295   :  { %v2207_v0 = vcombine.high %v2199_v58, %v2199_v58  ;;  %v6295_v15 = vrot.slane %v2199_v58, %v7611_v28  ;;  %v2288_v38 = vcombine.high %v6090_v31, %v6090_v31  ;;  %v6304_v13 = vrot.slane %v2160_v16, %v7611_v28 }
 0x296   :  { %v2208_v12 = vcombine.high %v2206_v54, %v2206_v54  ;;  %v6298_v8 = vrot.slane %v2206_v54, %v7611_v28  ;;  %v2254_v51 = vrot.slane %v2240_v46, %v7611_v28  ;;  %v2255_v45 = vcombine.high %v2247_v61, %v2247_v61 }
 0x297   :  { %v6309_v41 = vrot.slane %v2207_v0, %v7611_v28  ;;  %v6312_v58 = vrot.slane %v2247_v61, %v7611_v28  ;;  %v2295_v16 = vrot.slane %v6090_v31, %v7611_v28  ;;  %v2302_v23 = vrot.slane %v2288_v38, %v7611_v28 }
 0x298   :  { %v6315_v54 = vrot.slane %v2208_v12, %v7611_v28  ;;  %v2256_v46 = vcombine.high %v2254_v51, %v2254_v51  ;;  %v6318_v39 = vrot.slane %v2254_v51, %v7611_v28  ;;  %v2336_v0 = vcombine.high %v6092_v49, %v6092_v49 }
 0x299   :  { %v6329_v61 = vrot.slane %v6092_v49, %v7611_v28  ;;  %v6334_v51 = vrot.slane %v2255_v45, %v7611_v28  ;;  %v2303_v20 = vcombine.high %v2295_v16, %v2295_v16  ;;  %v6337_v31 = vrot.slane %v2295_v16, %v7611_v28 }
 0x29a   :  { %v2304_v33 = vcombine.high %v2302_v23, %v2302_v23  ;;  %v6342_v9 = vrot.slane %v2302_v23, %v7611_v28  ;;  %v6345_v49 = vrot.slane %v2336_v0, %v7611_v28  ;;  %v6348_v30 = vrot.slane %v2256_v46, %v7611_v28 }
 0x29b   :  { %v6353_v12 = vrot.slane %v2303_v20, %v7611_v28  ;;  %v3677_v16 = vcombine.low %v6105_v52, %v6108_v63  ;;  %v6366_v46 = vrot.slane %v6329_v61, %v7611_v28  ;;  %v3679_v25 = vcombine.low %v6097_v22, %v6116_v17 }
 0x29c   :  { %v6358_v38 = vrot.slane %v2304_v33, %v7611_v28  ;;  %v5137_v33 = vcombine.high %v6105_v52, %v6108_v63  ;;  %v6380_v0 = vrot.slane %v6345_v49, %v7611_v28  ;;  %v7629_v20 = vcombine.high %v6097_v22, %v6097_v22 }
 0x29d   :  { %7627 = vst [vmem:[#allocation21_spill] sm:$0xff] %v6366_v46  ;;  %v3687_v45 = vrot.slane %v3677_v16, %v7611_v28  ;;  %v3701_v52 = vrot.slane %v3679_v25, %v7611_v28  ;;  %v7630_v63 = vcombine.high %v6100_v26, %v6100_v26  ;;  %v7631_v23 = vcombine.high %v6121_v56, %v6121_v56 }
 0x29e   :  { %7626 = vst [vmem:[#allocation20_spill] sm:$0xff] %v6358_v38  ;;  %7628 = vst [vmem:[#allocation22_spill] sm:$0xff] %v6380_v0  ;;  %v3680_v3 = vcombine.low %v7629_v20, %v6100_v26  ;;  %v3694_v46 = vrot.slane %v5137_v33, %v7611_v28  ;;  %v7632_v22 = vcombine.high %v6111_v21, %v6111_v21 }
 0x29f   :  { %v3726_v17 = vcombine.low %v6121_v56, %v7630_v63  ;;  %v3727_v0 = vcombine.low %v7631_v23, %v6111_v21  ;;  %v3729_v25 = vcombine.low %v6150_v32, %v6153_v6  ;;  %v5138_v26 = vcombine.high %v6150_v32, %v6153_v6 }
 0x2a0   :  { %v3708_v38 = vrot.slane %v3680_v3, %v7611_v28  ;;  %v3728_v16 = vcombine.low %v6138_v1, %v7632_v22  ;;  %v3709_v20 = vcombine.low %v3687_v45, %v3694_v46  ;;  %v3776_v56 = vcombine.low %v6131_v40, %v6159_v7 }
 0x2a1   :  { %v3736_v33 = vrot.slane %v3726_v17, %v7611_v28  ;;  %v3743_v63 = vrot.slane %v3727_v0, %v7611_v28  ;;  %v3757_v21 = vrot.slane %v3729_v25, %v7611_v28  ;;  %v7633_v1 = vcombine.high %v6131_v40, %v6131_v40 }
 0x2a2   :  { %v3710_v3 = vcombine.low %v3701_v52, %v3708_v38  ;;  %v3750_v23 = vrot.slane %v3728_v16, %v7611_v28  ;;  %v3717_v32 = vrot.slane %v3709_v20, %v7611_v28  ;;  %v7634_v45 = vcombine.high %v6142_v11, %v6142_v11 }
 0x2a3   :  { %v3777_v22 = vcombine.low %v7633_v1, %v6142_v11  ;;  %v3758_v6 = vcombine.low %v3736_v33, %v3743_v63  ;;  %v3785_v7 = vrot.slane %v5138_v26, %v7611_v28  ;;  %v3792_v52 = vrot.slane %v3776_v56, %v7611_v28 }
 0x2a4   :  { %v3778_v0 = vcombine.low %v6164_v62, %v7634_v45  ;;  %v3724_v38 = vrot.slane %v3710_v3, %v7611_v28  ;;  %v3759_v46 = vcombine.low %v3750_v23, %v3757_v21  ;;  %v7635_v25 = vcombine.high %v6164_v62, %v6164_v62 }
 0x2a5   :  { %v3799_v17 = vrot.slane %v3777_v22, %v7611_v28  ;;  %v3766_v40 = vrot.slane %v3758_v6, %v7611_v28  ;;  %v7636_v20 = vcombine.high %v6156_v50, %v6156_v50  ;;  %v3807_v56 = vcombine.low %v3785_v7, %v3792_v52 }
 0x2a6   :  { %v3806_v16 = vrot.slane %v3778_v0, %v7611_v28  ;;  %v3824_v11 = vcombine.low %v7635_v25, %v6156_v50  ;;  %v3725_v33 = vcombine.low %v3717_v32, %v3724_v38  ;;  %v3773_v63 = vrot.slane %v3759_v46, %v7611_v28 }
 0x2a7   :  { %v3825_v26 = vcombine.low %v6177_v10, %v7636_v20  ;;  %v3826_v3 = vcombine.low %v6169_v34, %v6180_v37  ;;  %v5139_v21 = vcombine.high %v6169_v34, %v6180_v37  ;;  %v3815_v50 = vrot.slane %v3807_v56, %v7611_v28 }
 0x2a8   :  { %v3808_v23 = vcombine.low %v3799_v17, %v3806_v16  ;;  %v3834_v1 = vrot.slane %v3824_v11, %v7611_v28  ;;  %v3774_v22 = vcombine.low %v3766_v40, %v3773_v63  ;;  %v3873_v32 = vcombine.low %v6172_v59, %v6205_v24  ;;  %4942 = vst.msk [vmem:[%s7542_s18] sm:$0xff] %vm1045_vm8, %v3725_v33 }
 0x2a9   :  { %v3841_v62 = vrot.slane %v3825_v26, %v7611_v28  ;;  %v3848_v10 = vrot.slane %v3826_v3, %v7611_v28  ;;  %v3855_v34 = vrot.slane %v5139_v21, %v7611_v28  ;;  %v7637_v45 = vcombine.high %v6172_v59, %v6172_v59 }
 0x2aa   :  { %v3822_v6 = vrot.slane %v3808_v23, %v7611_v28  ;;  %v7638_v7 = vcombine.high %v6194_v19, %v6194_v19  ;;  %v7639_v38 = vcombine.high %v6210_v27, %v6210_v27  ;;  %v3883_v52 = vrot.slane %v3873_v32, %v7611_v28  ;;  %4943 = vst.msk [vmem:[%s7542_s18 + $0x8] sm:$0xff] %vm1045_vm8, %v3774_v22 }
 0x2ab   :  { %v3856_v37 = vcombine.low %v3834_v1, %v3841_v62  ;;  %v3874_v0 = vcombine.low %v7637_v45, %v6194_v19  ;;  %v7640_v17 = vcombine.high %v6202_v36, %v6202_v36  ;;  %v3857_v19 = vcombine.low %v3848_v10, %v3855_v34 }
 0x2ac   :  { %v3875_v24 = vcombine.low %v6210_v27, %v7638_v7  ;;  %v3876_v46 = vcombine.low %v7639_v38, %v6202_v36  ;;  %v3823_v59 = vcombine.low %v3815_v50, %v3822_v6  ;;  %v3923_v36 = vcombine.low %v6217_v42, %v6231_v5 }
 0x2ad   :  { %v3922_v40 = vcombine.low %v6221_v35, %v7640_v17  ;;  %v3864_v16 = vrot.slane %v3856_v37, %v7611_v28  ;;  %v3890_v25 = vrot.slane %v3874_v0, %v7611_v28  ;;  %v5140_v35 = vcombine.high %v6217_v42, %v6231_v5 }
 0x2ae   :  { %v3897_v27 = vrot.slane %v3875_v24, %v7611_v28  ;;  %v3904_v11 = vrot.slane %v3876_v46, %v7611_v28  ;;  %v3871_v20 = vrot.slane %v3857_v19, %v7611_v28  ;;  %v3925_v33 = vcombine.low %v6226_v29, %v6244_v48  ;;  %4944 = vst.msk [vmem:[%s7542_s18 + $0x10] sm:$0xff] %vm1045_vm8, %v3823_v59 }
 0x2af   :  { %v3905_v26 = vcombine.low %v3883_v52, %v3890_v25  ;;  %v3932_v63 = vrot.slane %v3922_v40, %v7611_v28  ;;  %v7641_v56 = vcombine.high %v6329_v61, %v6329_v61  ;;  %v3939_v42 = vrot.slane %v3923_v36, %v7611_v28 }
 0x2b0   :  { %v3906_v5 = vcombine.low %v3897_v27, %v3904_v11  ;;  %v3946_v23 = vrot.slane %v5140_v35, %v7611_v28  ;;  %v3872_v21 = vcombine.low %v3864_v16, %v3871_v20  ;;  %v3953_v1 = vrot.slane %v3925_v33, %v7611_v28 }
 0x2b1   :  { %v6493_v3 = vrot.slane %v7641_v56, %v7611_v28  ;;  %v3913_v48 = vrot.slane %v3905_v26, %v7611_v28  ;;  %v3985_v62 = vcombine.low %v6247_v60, %v6253_v2  ;;  %v7642_v22 = vcombine.high %v6345_v49, %v6345_v49 }
 0x2b2   :  { %v3920_v50 = vrot.slane %v3906_v5, %v7611_v28  ;;  %v3954_v10 = vcombine.low %v3932_v63, %v3939_v42  ;;  %v5141_v32 = vcombine.high %v6247_v60, %v6253_v2  ;;  %v3955_v6 = vcombine.low %v3946_v23, %v3953_v1  ;;  %4945 = vst.msk [vmem:[%s7542_s18 + $0x18] sm:$0xff] %vm1045_vm8, %v3872_v21 }
 0x2b3   :  { %v6505_v61 = vrot.slane %v7642_v22, %v7611_v28  ;;  %v3987_v34 = vcombine.low %v6236_v18, %v6260_v4  ;;  %v7643_v37 = vcombine.high %v6236_v18, %v6236_v18  ;;  %v3995_v0 = vrot.slane %v3985_v62, %v7611_v28 }
 0x2b4   :  { %v3921_v49 = vcombine.low %v3913_v48, %v3920_v50  ;;  %v3962_v7 = vrot.slane %v3954_v10, %v7611_v28  ;;  %v4002_v60 = vrot.slane %v5141_v32, %v7611_v28  ;;  %v7644_v4 = vcombine.high %v6250_v14, %v6250_v14 }
 0x2b5   :  { %v3988_v45 = vcombine.low %v7643_v37, %v6250_v14  ;;  %v3969_v18 = vrot.slane %v3955_v6, %v7611_v28  ;;  %v4009_v24 = vrot.slane %v3987_v34, %v7611_v28  ;;  %v7645_v46 = vcombine.high %v6263_v53, %v6263_v53 }
 0x2b6   :  { %v4034_v2 = vcombine.low %v6263_v53, %v7644_v4  ;;  %v4017_v17 = vcombine.low %v3995_v0, %v4002_v60  ;;  %v7646_v40 = vcombine.high %v6256_v57, %v6256_v57  ;;  %v4037_v14 = vcombine.low %v6275_v55, %v6292_v47  ;;  %4946 = vst.msk [vmem:[%s7542_s18 + $0x20] sm:$0xff] %vm1045_vm8, %v3921_v49 }
 0x2b7   :  { %v4016_v38 = vrot.slane %v3988_v45, %v7611_v28  ;;  %v4035_v52 = vcombine.low %v7645_v46, %v6256_v57  ;;  %v3970_v16 = vcombine.low %v3962_v7, %v3969_v18  ;;  %v5142_v27 = vcombine.high %v6275_v55, %v6292_v47 }
 0x2b8   :  { %v4036_v59 = vcombine.low %v6270_v44, %v7646_v40  ;;  %v4044_v19 = vrot.slane %v4034_v2, %v7611_v28  ;;  %v4025_v57 = vrot.slane %v4017_v17, %v7611_v28  ;;  %v4065_v11 = vrot.slane %v4037_v14, %v7611_v28  ;;  %v7656_v40 = vld [vmem:[#allocation21_spill] sm:$0xff] }
 0x2b9   :  { %v4018_v25 = vcombine.low %v4009_v24, %v4016_v38  ;;  %v4051_v53 = vrot.slane %v4035_v52, %v7611_v28  ;;  %v4084_v36 = vcombine.low %v6278_v43, %v6304_v13  ;;  %v7647_v26 = vcombine.high %v6278_v43, %v6278_v43  ;;  %4947 = vst.msk [vmem:[%s7542_s18 + $0x28] sm:$0xff] %vm1045_vm8, %v3970_v16  ;;  %v7655_v24 = vld [vmem:[#allocation20_spill] sm:$0xff]  ;;  %v7657_v16 = vld [vmem:[#allocation22_spill] sm:$0xff] }
 0x2ba   :  { %v4058_v44 = vrot.slane %v4036_v59, %v7611_v28  ;;  %v7648_v55 = vcombine.high %v6295_v15, %v6295_v15  ;;  %v4093_v13 = vrot.slane %v5142_v27, %v7611_v28  ;;  %v7649_v43 = vcombine.high %v6309_v41, %v6309_v41 }
 0x2bb   :  { %v4032_v35 = vrot.slane %v4018_v25, %v7611_v28  ;;  %v4066_v20 = vcombine.low %v4044_v19, %v4051_v53  ;;  %v4085_v33 = vcombine.low %v7647_v26, %v6295_v15  ;;  %v4100_v56 = vrot.slane %v4084_v36, %v7611_v28 }
 0x2bc   :  { %v4086_v47 = vcombine.low %v6309_v41, %v7648_v55  ;;  %v4067_v63 = vcombine.low %v4058_v44, %v4065_v11  ;;  %v4132_v5 = vcombine.low %v7649_v43, %v6298_v8  ;;  %v7650_v62 = vcombine.high %v6298_v8, %v6298_v8 }
 0x2bd   :  { %v4033_v42 = vcombine.low %v4025_v57, %v4032_v35  ;;  %v4074_v15 = vrot.slane %v4066_v20, %v7611_v28  ;;  %v4107_v23 = vrot.slane %v4085_v33, %v7611_v28  ;;  %v4115_v1 = vcombine.low %v4093_v13, %v4100_v56 }
 0x2be   :  { %v4114_v21 = vrot.slane %v4086_v47, %v7611_v28  ;;  %v4081_v48 = vrot.slane %v4067_v63, %v7611_v28  ;;  %v4133_v22 = vcombine.low %v6315_v54, %v7650_v62  ;;  %v4134_v50 = vcombine.low %v6312_v58, %v6334_v51  ;;  %v5126_v63 = vld [vmem:[%s7536_s12 + $0x1] ss:$0 sm:$0xff] }
 0x2bf   :  { %v5143_v10 = vcombine.high %v6312_v58, %v6334_v51  ;;  %v4142_v32 = vrot.slane %v4132_v5, %v7611_v28  ;;  %v4181_v6 = vcombine.low %v6318_v39, %v6348_v30  ;;  %4956 = vst.msk [vmem:[%s7542_s18 + $0x68] sm:$0xff] %vm1045_vm8, %v4033_v42  ;;  %v4123_v54 = vrot.slane %v4115_v1, %v7611_v28 }
 0x2c0   :  { %v4116_v41 = vcombine.low %v4107_v23, %v4114_v21  ;;  %v4082_v8 = vcombine.low %v4074_v15, %v4081_v48  ;;  %v4149_v34 = vrot.slane %v4133_v22, %v7611_v28  ;;  %v4156_v37 = vrot.slane %v4134_v50, %v7611_v28  ;;  %v5132_v48 = vld [vmem:[%s7538_s14 + $0x1] ss:$0 sm:$0xff] }
 0x2c1   :  { %v4163_v58 = vrot.slane %v5143_v10, %v7611_v28  ;;  %v7651_v30 = vcombine.high %v6318_v39, %v6318_v39  ;;  %v7652_v0 = vcombine.high %v6337_v31, %v6337_v31  ;;  %v7653_v60 = vcombine.high %v6353_v12, %v6353_v12 }
 0x2c2   :  { %v4130_v45 = vrot.slane %v4116_v41, %v7611_v28  ;;  %v4164_v7 = vcombine.low %v4142_v32, %v4149_v34  ;;  %v4191_v2 = vrot.slane %v4181_v6, %v7611_v28  ;;  %v7654_v18 = vcombine.high %v6342_v9, %v6342_v9  ;;  %4957 = vst.msk [vmem:[%s7542_s18 + $0x70] sm:$0xff] %vm1045_vm8, %v4082_v8 }
 0x2c3   :  { %v4182_v51 = vcombine.low %v7651_v30, %v6337_v31  ;;  %v4183_v49 = vcombine.low %v6353_v12, %v7652_v0  ;;  %v4184_v4 = vcombine.low %v7653_v60, %v6342_v9  ;;  %v4165_v31 = vcombine.low %v4156_v37, %v4163_v58 }
 0x2c4   :  { %v4230_v38 = vcombine.low %v7655_v24, %v7654_v18  ;;  %v4131_v39 = vcombine.low %v4123_v54, %v4130_v45  ;;  %v4172_v12 = vrot.slane %v4164_v7, %v7611_v28  ;;  %v4231_v9 = vcombine.low %v7656_v40, %v6493_v3 }
 0x2c5   :  { %v4198_v46 = vrot.slane %v4182_v51, %v7611_v28  ;;  %v4205_v52 = vrot.slane %v4183_v49, %v7611_v28  ;;  %v4212_v17 = vrot.slane %v4184_v4, %v7611_v28  ;;  %v5144_v59 = vcombine.high %v7656_v40, %v6493_v3 }
 0x2c6   :  { %v4179_v14 = vrot.slane %v4165_v31, %v7611_v28  ;;  %v4233_v25 = vcombine.low %v7657_v16, %v6505_v61  ;;  %v4240_v53 = vrot.slane %v4230_v38, %v7611_v28  ;;  %4958 = vst.msk [vmem:[%s7542_s18 + $0x78] sm:$0xff] %vm1045_vm8, %v4131_v39  ;;  %v4247_v57 = vrot.slane %v4231_v9, %v7611_v28 }
 0x2c7   :  { %v4213_v19 = vcombine.low %v4191_v2, %v4198_v46  ;;  %v4214_v27 = vcombine.low %v4205_v52, %v4212_v17  ;;  %v4254_v3 = vrot.slane %v5144_v59, %v7611_v28  ;;  %v2046_v2 = vcombine.high %v6226_v29, %v6226_v29 }
 0x2c8   :  { %v4180_v44 = vcombine.low %v4172_v12, %v4179_v14  ;;  %v4261_v36 = vrot.slane %v4233_v25, %v7611_v28  ;;  %v4262_v61 = vcombine.low %v4240_v53, %v4247_v57  ;;  %v2382_v24 = vcombine.high %v7657_v16, %v7657_v16  ;;  %v7660_v16 = vld [vmem:[#allocation5_spill] sm:$0xff] }
 0x2c9   :  { %v4221_v11 = vrot.slane %v4213_v19, %v7611_v28  ;;  %v4228_v35 = vrot.slane %v4214_v27, %v7611_v28  ;;  %v6672_v40 = vrot.slane %v2046_v2, %v7611_v28 }
 0x2ca   :  { %v4263_v20 = vcombine.low %v4254_v3, %v4261_v36  ;;  %4959 = vst.msk [vmem:[%s7542_s18 + $0x80] sm:$0xff] %vm1045_vm8, %v4180_v44  ;;  %v4270_v33 = vrot.slane %v4262_v61, %v7611_v28  ;;  %v6679_v14 = vrot.slane %v2382_v24, %v7611_v28 }
 0x2cb   :  { %v4229_v26 = vcombine.low %v4221_v11, %v4228_v35  ;;  %7658 = vst [vmem:[#allocation20_spill] sm:$0xff] %v6672_v40 }
 0x2cc   :  { %v4277_v55 = vrot.slane %v4263_v20, %v7611_v28  ;;  %7659 = vst [vmem:[#allocation21_spill] sm:$0xff] %v6679_v14 }
 0x2cd   :  { %4960 = vst.msk [vmem:[%s7542_s18 + $0x88] sm:$0xff] %vm1045_vm8, %v4229_v26 }
 0x2ce   :  { %v4278_v47 = vcombine.low %v4270_v33, %v4277_v55 }
 0x2d0   :  { %4961 = vst.msk [vmem:[%s7542_s18 + $0x90] sm:$0xff] %vm1045_vm8, %v4278_v47 }
 0x2ec   :  { %v2506_v13 = vpop.f32.mrb[8].mxu1 }
 0x2ed   :  { %v2507_v56 = vadd.f32 %v5126_v63, %v2506_v13  ;;  %v5201_v43 = vpop.f32.mrb[9].mxu1 }
 0x2ee   :  { %v2509_v5 = vpop.f32.mrb[10].mxu1 }
 0x2ef   :  { %v5128_v42 = vmul.f32 -1.442695, %v2507_v56  ;;  %v2510_v15 = vadd.f32 %v5126_v63, %v2509_v5  ;;  %v5202_v23 = vpop.f32.mrb[11].mxu1 }
 0x2f1   :  { %5237 = vpow2.f32 %v5128_v42  ;;  %v5129_v21 = vmul.f32 -1.442695, %v2510_v15 }
 0x2f3   :  { %5239 = vpow2.f32 %v5129_v21 }
 0x2f4   :  { %v2580_v1 = vpop.f32.mrb[12].mxu1 }
 0x2f5   :  { %v2581_v62 = vadd.f32 %v5132_v48, %v2580_v1  ;;  %v5207_v22 = vpop.f32.mrb[13].mxu1 }
 0x2f6   :  { %v2583_v50 = vpop.f32.mrb[14].mxu1 }
 0x2f7   :  { %v5134_v41 = vmul.f32 -1.442695, %v2581_v62  ;;  %v2584_v10 = vadd.f32 %v5132_v48, %v2583_v50  ;;  %v5208_v32 = vpop.f32.mrb[15].mxu1 }
 0x2f9   :  { %5241 = vpow2.f32 %v5134_v41  ;;  %v5135_v6 = vmul.f32 -1.442695, %v2584_v10 }
 0x2fb   :  { %v5238_v8 = vpop.eup %5237  ;;  %5243 = vpow2.f32 %v5135_v6 }
 0x2fc   :  { %v2519_v54 = vadd.f32 1.0, %v5238_v8 }
 0x2fd   :  { %v5240_v34 = vpop.eup %5239 }
 0x2fe   :  { %5245 = vrcp.f32 %v2519_v54  ;;  %v2520_v37 = vadd.f32 1.0, %v5240_v34 }
 0x300   :  { %5247 = vrcp.f32 %v2520_v37 }
 0x303   :  { %v5242_v45 = vpop.eup %5241 }
 0x304   :  { %v2593_v58 = vadd.f32 1.0, %v5242_v45 }
 0x305   :  { %v5244_v30 = vpop.eup %5243 }
 0x306   :  { %5249 = vrcp.f32 %v2593_v58  ;;  %v2594_v51 = vadd.f32 1.0, %v5244_v30 }
 0x308   :  { %v5246_v0 = vpop.eup %5245  ;;  %5251 = vrcp.f32 %v2594_v51 }
 0x309   :  { %v2601_v49 = vcombine.high %v5246_v0, %v5246_v0  ;;  %v2608_v7 = vrot.slane %v5246_v0, %v7611_v28 }
 0x30a   :  { %v5248_v60 = vpop.eup %5247 }
 0x30b   :  { %v2615_v4 = vrot.slane %v2601_v49, %v7611_v28  ;;  %v2616_v18 = vcombine.high %v2608_v7, %v2608_v7  ;;  %v6665_v39 = vrot.slane %v2608_v7, %v7611_v28  ;;  %v2650_v31 = vcombine.high %v5248_v60, %v5248_v60 }
 0x30c   :  { %v2657_v46 = vrot.slane %v5248_v60, %v7611_v28 }
 0x30d   :  { %v2617_v12 = vcombine.high %v2615_v4, %v2615_v4  ;;  %v6669_v17 = vrot.slane %v2615_v4, %v7611_v28  ;;  %v6675_v29 = vrot.slane %v2616_v18, %v7611_v28  ;;  %v2646_v19 = vcombine.high %v6665_v39, %v6665_v39 }
 0x30e   :  { %v2798_v25 = vrot.slane %v6665_v39, %v7660_v16  ;;  %v6686_v53 = vrot.slane %v2650_v31, %v7611_v28  ;;  %v2665_v27 = vcombine.high %v2657_v46, %v2657_v46  ;;  %v6689_v57 = vrot.slane %v2657_v46, %v7611_v28 }
 0x30f   :  { %v6693_v36 = vrot.slane %v2617_v12, %v7611_v28  ;;  %v2647_v35 = vcombine.high %v6669_v17, %v6669_v17  ;;  %v2648_v63 = vcombine.high %v6675_v29, %v6675_v29  ;;  %v2802_v13 = vrot.slane %v6675_v29, %v7660_v16 }
 0x310   :  { %v5250_v38 = vpop.eup %5249  ;;  %v2806_v21 = vrot.slane %v2646_v19, %v7660_v16  ;;  %v2814_v34 = vrot.slane %v6669_v17, %v7660_v16  ;;  %v2666_v30 = vcombine.high %v6686_v53, %v6686_v53  ;;  %v2680_v51 = vrot.slane %v6686_v53, %v7611_v28 }
 0x311   :  { %v2699_v9 = vcombine.high %v5250_v38, %v5250_v38  ;;  %v2706_v59 = vrot.slane %v5250_v38, %v7611_v28  ;;  %v2649_v7 = vcombine.high %v6693_v36, %v6693_v36  ;;  %v2687_v60 = vrot.slane %v2665_v27, %v7611_v28 }
 0x312   :  { %v5252_v52 = vpop.eup %5251  ;;  %v2695_v4 = vcombine.high %v6689_v57, %v6689_v57  ;;  %v2810_v46 = vrot.slane %v2648_v63, %v7660_v16  ;;  %v2822_v29 = vrot.slane %v2647_v35, %v7660_v16 }
 0x313   :  { %v2713_v44 = vrot.slane %v2699_v9, %v7611_v28  ;;  %v2714_v11 = vcombine.high %v2706_v59, %v2706_v59  ;;  %v2748_v3 = vcombine.high %v5252_v52, %v5252_v52  ;;  %v2722_v61 = vrot.slane %v2706_v59, %v7611_v28 }
 0x314   :  { %v2755_v20 = vrot.slane %v5252_v52, %v7611_v28  ;;  %v2818_v52 = vrot.slane %v6693_v36, %v7660_v16  ;;  %v2694_v9 = vrot.slane %v2666_v30, %v7611_v28  ;;  %v2826_v53 = vrot.slane %v2649_v7, %v7660_v16 }
 0x315   :  { %v2715_v26 = vcombine.high %v2713_v44, %v2713_v44  ;;  %v2729_v33 = vrot.slane %v2713_v44, %v7611_v28  ;;  %v2736_v55 = vrot.slane %v2714_v11, %v7611_v28  ;;  %v2762_v47 = vrot.slane %v2748_v3, %v7611_v28 }
 0x316   :  { %v2763_v56 = vcombine.high %v2755_v20, %v2755_v20  ;;  %v2771_v43 = vrot.slane %v2755_v20, %v7611_v28  ;;  %v2696_v27 = vcombine.high %v2687_v60, %v2687_v60  ;;  %v2830_v44 = vrot.slane %v6689_v57, %v7660_v16 }
 0x317   :  { %v2743_v5 = vrot.slane %v2715_v26, %v7611_v28  ;;  %v2745_v42 = vcombine.high %v2729_v33, %v2729_v33  ;;  %v2865_v15 = vcombine.low %v2722_v61, %v2736_v55  ;;  %v5136_v23 = vcombine.high %v2722_v61, %v2736_v55 }
 0x318   :  { %v2764_v48 = vcombine.high %v2762_v47, %v2762_v47  ;;  %v2785_v1 = vrot.slane %v2763_v56, %v7611_v28  ;;  %v2793_v62 = vcombine.high %v2771_v43, %v2771_v43  ;;  %v2778_v10 = vrot.slane %v2762_v47, %v7611_v28 }
 0x319   :  { %v2867_v22 = vcombine.low %v2729_v33, %v2743_v5  ;;  %v2874_v50 = vrot.slane %v2865_v15, %v7611_v28  ;;  %v2881_v41 = vrot.slane %v5136_v23, %v7611_v28  ;;  %v2747_v32 = vcombine.high %v2743_v5, %v2743_v5 }
 0x31a   :  { %v2792_v6 = vrot.slane %v2764_v48, %v7611_v28  ;;  %v2794_v8 = vcombine.high %v2785_v1, %v2785_v1  ;;  %v2914_v54 = vcombine.low %v2785_v1, %v2793_v62  ;;  %v2895_v45 = vrot.slane %v2745_v42, %v7611_v28 }
 0x31b   :  { %v2888_v37 = vrot.slane %v2867_v22, %v7611_v28  ;;  %v2896_v58 = vcombine.low %v2874_v50, %v2881_v41  ;;  %v2913_v0 = vcombine.low %v2747_v32, %v2771_v43  ;;  %v2834_v3 = vrot.slane %v2687_v60, %v7660_v16 }
 0x31c   :  { %v2915_v49 = vcombine.low %v2794_v8, %v2778_v10  ;;  %v2929_v24 = vrot.slane %v2914_v54, %v7611_v28  ;;  %v2943_v31 = vrot.slane %v2792_v6, %v7611_v28  ;;  %v2838_v36 = vrot.slane %v2695_v4, %v7660_v16 }
 0x31d   :  { %v2897_v2 = vcombine.low %v2888_v37, %v2895_v45  ;;  %v2922_v18 = vrot.slane %v2913_v0, %v7611_v28  ;;  %v2904_v12 = vrot.slane %v2896_v58, %v7611_v28  ;;  %v2842_v43 = vrot.slane %v2696_v27, %v7660_v16 }
 0x31e   :  { %v2936_v38 = vrot.slane %v2915_v49, %v7611_v28  ;;  %v2846_v5 = vrot.slane %v2680_v51, %v7660_v16  ;;  %v2850_v39 = vrot.slane %v2694_v9, %v7660_v16 }
 0x31f   :  { %v2911_v17 = vrot.slane %v2897_v2, %v7611_v28  ;;  %v2944_v59 = vcombine.low %v2922_v18, %v2929_v24 }
 0x320   :  { %v2945_v19 = vcombine.low %v2936_v38, %v2943_v31 }
 0x321   :  { %v2912_v11 = vcombine.low %v2904_v12, %v2911_v17  ;;  %v2952_v61 = vrot.slane %v2944_v59, %v7611_v28 }
 0x322   :  { %v2959_v20 = vrot.slane %v2945_v19, %v7611_v28 }
 0x323   :  { %v6748_v35 = vmul.f32 %v2912_v11, %v2798_v25  ;;  %v6750_v26 = vmul.f32 %v2912_v11, %v2802_v13  ;;  %v6752_v33 = vmul.f32 %v2912_v11, %v2806_v21  ;;  %v6754_v55 = vmul.f32 %v2912_v11, %v2810_v46 }
 0x324   :  { %v2960_v57 = vcombine.low %v2952_v61, %v2959_v20  ;;  %v6756_v47 = vmul.f32 %v2912_v11, %v2814_v34  ;;  %v6758_v63 = vmul.f32 %v2912_v11, %v2818_v52  ;;  %v6760_v56 = vmul.f32 %v2912_v11, %v2822_v29 }
 0x325   :  { %7661 = vst [vmem:[#allocation22_spill] sm:$0xff] %v6748_v35  ;;  %7662 = vst [vmem:[#allocation5_spill] sm:$0xff] %v6750_v26  ;;  %v3005_v37 = vcombine.high %v6748_v35, %v6748_v35  ;;  %v3012_v45 = vrot.slane %v6748_v35, %v7611_v28  ;;  %v3053_v58 = vcombine.high %v6750_v26, %v6750_v26 }
 0x326   :  { %7663 = vst [vmem:[#allocation23_spill] sm:$0xff] %v6752_v33  ;;  %7664 = vst [vmem:[#allocation24_spill] sm:$0xff] %v6754_v55  ;;  %v6765_v25 = vmul.f32 %v2960_v57, %v2826_v53  ;;  %v6767_v13 = vmul.f32 %v2960_v57, %v2830_v44  ;;  %v6769_v42 = vmul.f32 %v2960_v57, %v2834_v3 }
 0x327   :  { %7665 = vst [vmem:[#allocation25_spill] sm:$0xff] %v6756_v47  ;;  %7666 = vst [vmem:[#allocation26_spill] sm:$0xff] %v6758_v63  ;;  %v6771_v15 = vmul.f32 %v2960_v57, %v2838_v36  ;;  %v6773_v23 = vmul.f32 %v2960_v57, %v2842_v43  ;;  %v6775_v21 = vmul.f32 %v2960_v57, %v2846_v5 }
 0x328   :  { %7667 = vst [vmem:[#allocation27_spill] sm:$0xff] %v6760_v56  ;;  %7668 = vst [vmem:[#allocation28_spill] sm:$0xff] %v6765_v25  ;;  %v6777_v48 = vmul.f32 %v2960_v57, %v2850_v39  ;;  %v3060_v30 = vrot.slane %v6750_v26, %v7611_v28  ;;  %v3101_v51 = vcombine.high %v6752_v33, %v6752_v33 }
 0x329   :  { %7669 = vst [vmem:[#allocation29_spill] sm:$0xff] %v6767_v13  ;;  %7670 = vst [vmem:[#allocation30_spill] sm:$0xff] %v6769_v42  ;;  %v3108_v0 = vrot.slane %v6752_v33, %v7611_v28  ;;  %v3149_v49 = vcombine.high %v6754_v55, %v6754_v55  ;;  %v3019_v7 = vrot.slane %v3005_v37, %v7611_v28 }
 0x32a   :  { %7671 = vst [vmem:[#allocation31_spill] sm:$0xff] %v6771_v15  ;;  %7672 = vst [vmem:[#allocation32_spill] sm:$0xff] %v6773_v23  ;;  %v3020_v60 = vcombine.high %v3012_v45, %v3012_v45  ;;  %v6809_v4 = vrot.slane %v3012_v45, %v7611_v28  ;;  %v3067_v2 = vrot.slane %v3053_v58, %v7611_v28 }
 0x32b   :  { %7673 = vst [vmem:[#allocation33_spill] sm:$0xff] %v6775_v21  ;;  %7674 = vst [vmem:[#allocation34_spill] sm:$0xff] %v6777_v48  ;;  %v3068_v18 = vcombine.high %v3060_v30, %v3060_v30  ;;  %v6813_v24 = vrot.slane %v3060_v30, %v7611_v28  ;;  %v3115_v38 = vrot.slane %v3101_v51, %v7611_v28 }
 0x32c   :  { %v3116_v31 = vcombine.high %v3108_v0, %v3108_v0  ;;  %v3021_v46 = vcombine.high %v3019_v7, %v3019_v7  ;;  %v6817_v52 = vrot.slane %v3019_v7, %v7611_v28  ;;  %v6820_v12 = vrot.slane %v3020_v60, %v7611_v28 }
 0x32d   :  { %v3069_v29 = vcombine.high %v3067_v2, %v3067_v2  ;;  %v6825_v9 = vrot.slane %v3067_v2, %v7611_v28  ;;  %v6828_v59 = vrot.slane %v3068_v18, %v7611_v28  ;;  %v3117_v19 = vcombine.high %v3115_v38, %v3115_v38 }
 0x32e   :  { %v6831_v53 = vrot.slane %v3021_v46, %v7611_v28  ;;  %v6838_v11 = vrot.slane %v3108_v0, %v7611_v28  ;;  %v6846_v61 = vrot.slane %v3115_v38, %v7611_v28  ;;  %v6849_v20 = vrot.slane %v3116_v31, %v7611_v28 }
 0x32f   :  { %v6841_v3 = vrot.slane %v3069_v29, %v7611_v28  ;;  %v6852_v57 = vrot.slane %v3117_v19, %v7611_v28  ;;  %v3156_v5 = vrot.slane %v6754_v55, %v7611_v28  ;;  %v3163_v39 = vrot.slane %v3149_v49, %v7611_v28 }
 0x330   :  { %v3197_v58 = vcombine.high %v6756_v47, %v6756_v47  ;;  %v3204_v30 = vrot.slane %v6756_v47, %v7611_v28  ;;  %v3245_v38 = vcombine.high %v6758_v63, %v6758_v63  ;;  %v3252_v19 = vrot.slane %v6758_v63, %v7611_v28 }
 0x331   :  { %v3164_v51 = vcombine.high %v3156_v5, %v3156_v5  ;;  %v3165_v0 = vcombine.high %v3163_v39, %v3163_v39  ;;  %v6868_v7 = vrot.slane %v3156_v5, %v7611_v28  ;;  %v6871_v60 = vrot.slane %v3163_v39, %v7611_v28 }
 0x332   :  { %v3211_v49 = vrot.slane %v3197_v58, %v7611_v28  ;;  %v3212_v2 = vcombine.high %v3204_v30, %v3204_v30  ;;  %v6875_v18 = vrot.slane %v3204_v30, %v7611_v28  ;;  %v6899_v8 = vrot.slane %v3252_v19, %v7611_v28 }
 0x333   :  { %v6880_v31 = vrot.slane %v3164_v51, %v7611_v28  ;;  %v6883_v46 = vrot.slane %v3165_v0, %v7611_v28  ;;  %v3259_v51 = vrot.slane %v3245_v38, %v7611_v28  ;;  %v3260_v0 = vcombine.high %v3252_v19, %v3252_v19 }
 0x334   :  { %v3213_v5 = vcombine.high %v3211_v49, %v3211_v49  ;;  %v6890_v39 = vrot.slane %v3211_v49, %v7611_v28  ;;  %v6893_v58 = vrot.slane %v3212_v2, %v7611_v28  ;;  %v3293_v34 = vcombine.high %v6760_v56, %v6760_v56 }
 0x335   :  { %v3300_v41 = vrot.slane %v6760_v56, %v7611_v28  ;;  %v3261_v38 = vcombine.high %v3259_v51, %v3259_v51  ;;  %v6913_v22 = vrot.slane %v3259_v51, %v7611_v28  ;;  %v6916_v19 = vrot.slane %v3260_v0, %v7611_v28 }
 0x336   :  { %v6904_v32 = vrot.slane %v3213_v5, %v7611_v28  ;;  %v3307_v16 = vrot.slane %v3293_v34, %v7611_v28  ;;  %v3341_v49 = vcombine.high %v6765_v25, %v6765_v25  ;;  %v3348_v2 = vrot.slane %v6765_v25, %v7611_v28 }
 0x337   :  { %v3308_v5 = vcombine.high %v3300_v41, %v3300_v41  ;;  %v6920_v1 = vrot.slane %v3300_v41, %v7611_v28  ;;  %v6927_v30 = vrot.slane %v3261_v38, %v7611_v28  ;;  %v3437_v27 = vcombine.high %v6769_v42, %v6769_v42 }
 0x338   :  { %v3309_v0 = vcombine.high %v3307_v16, %v3307_v16  ;;  %v6932_v29 = vrot.slane %v3307_v16, %v7611_v28  ;;  %v3355_v37 = vrot.slane %v3341_v49, %v7611_v28  ;;  %v3356_v45 = vcombine.high %v3348_v2, %v3348_v2 }
 0x339   :  { %v6935_v34 = vrot.slane %v3308_v5, %v7611_v28  ;;  %v6946_v51 = vrot.slane %v3348_v2, %v7611_v28  ;;  %v3389_v16 = vcombine.high %v6767_v13, %v6767_v13  ;;  %v3396_v2 = vrot.slane %v6767_v13, %v7611_v28 }
 0x33a   :  { %v6941_v43 = vrot.slane %v3309_v0, %v7611_v28  ;;  %v3357_v36 = vcombine.high %v3355_v37, %v3355_v37  ;;  %v6953_v41 = vrot.slane %v3355_v37, %v7611_v28  ;;  %v6956_v49 = vrot.slane %v3356_v45, %v7611_v28 }
 0x33b   :  { %v3403_v38 = vrot.slane %v3389_v16, %v7611_v28  ;;  %v3444_v0 = vrot.slane %v6769_v42, %v7611_v28  ;;  %v3404_v44 = vcombine.high %v3396_v2, %v3396_v2  ;;  %v6975_v56 = vrot.slane %v3396_v2, %v7611_v28 }
 0x33c   :  { %v6966_v5 = vrot.slane %v3357_v36, %v7611_v28  ;;  %v3451_v36 = vrot.slane %v3437_v27, %v7611_v28  ;;  %v3485_v37 = vcombine.high %v6771_v15, %v6771_v15  ;;  %v3533_v2 = vcombine.high %v6773_v23, %v6773_v23 }
 0x33d   :  { %v3405_v17 = vcombine.high %v3403_v38, %v3403_v38  ;;  %v6978_v16 = vrot.slane %v3403_v38, %v7611_v28  ;;  %v3452_v55 = vcombine.high %v3444_v0, %v3444_v0  ;;  %v6982_v6 = vrot.slane %v3444_v0, %v7611_v28 }
 0x33e   :  { %v6987_v45 = vrot.slane %v3404_v44, %v7611_v28  ;;  %v3492_v38 = vrot.slane %v6771_v15, %v7611_v28  ;;  %v3453_v27 = vcombine.high %v3451_v36, %v3451_v36  ;;  %v6997_v25 = vrot.slane %v3451_v36, %v7611_v28 }
 0x33f   :  { %v6990_v63 = vrot.slane %v3405_v17, %v7611_v28  ;;  %v7000_v0 = vrot.slane %v3452_v55, %v7611_v28  ;;  %v3499_v54 = vrot.slane %v3485_v37, %v7611_v28  ;;  %v3540_v44 = vrot.slane %v6773_v23, %v7611_v28 }
 0x340   :  { %v3500_v17 = vcombine.high %v3492_v38, %v3492_v38  ;;  %v7006_v33 = vrot.slane %v3492_v38, %v7611_v28  ;;  %v7011_v10 = vrot.slane %v3453_v27, %v7611_v28  ;;  %v3547_v26 = vrot.slane %v3533_v2, %v7611_v28 }
 0x341   :  { %v3501_v37 = vcombine.high %v3499_v54, %v3499_v54  ;;  %v7020_v15 = vrot.slane %v3499_v54, %v7611_v28  ;;  %v3548_v27 = vcombine.high %v3540_v44, %v3540_v44  ;;  %v7027_v50 = vrot.slane %v3540_v44, %v7611_v28 }
 0x342   :  { %v7023_v38 = vrot.slane %v3500_v17, %v7611_v28  ;;  %v3581_v36 = vcombine.high %v6775_v21, %v6775_v21  ;;  %v3588_v55 = vrot.slane %v6775_v21, %v7611_v28  ;;  %v3549_v17 = vcombine.high %v3547_v26, %v3547_v26 }
 0x343   :  { %v7034_v23 = vrot.slane %v3501_v37, %v7611_v28  ;;  %v7039_v47 = vrot.slane %v3547_v26, %v7611_v28  ;;  %v7042_v2 = vrot.slane %v3548_v27, %v7611_v28  ;;  %v3629_v26 = vcombine.high %v6777_v48, %v6777_v48 }
 0x344   :  { %v3595_v35 = vrot.slane %v3581_v36, %v7611_v28  ;;  %v3596_v62 = vcombine.high %v3588_v55, %v3588_v55  ;;  %v7048_v21 = vrot.slane %v3549_v17, %v7611_v28  ;;  %v7053_v54 = vrot.slane %v3588_v55, %v7611_v28 }
 0x345   :  { %v3636_v17 = vrot.slane %v6777_v48, %v7611_v28  ;;  %v3643_v37 = vrot.slane %v3629_v26, %v7611_v28  ;;  %v4307_v55 = vcombine.low %v6809_v4, %v6809_v4  ;;  %v7682_v14 = vcombine.high %v6809_v4, %v6809_v4 }
 0x346   :  { %7680 = vst [vmem:[#allocation35_spill] sm:$0xff] %v7053_v54  ;;  %v3597_v42 = vcombine.high %v3595_v35, %v3595_v35  ;;  %v7060_v44 = vrot.slane %v3595_v35, %v7611_v28  ;;  %v7063_v36 = vrot.slane %v3596_v62, %v7611_v28  ;;  %v7683_v62 = vcombine.high %v6820_v12, %v6820_v12 }
 0x347   :  { %v4308_v27 = vcombine.low %v6820_v12, %v7682_v14  ;;  %v7684_v26 = vcombine.high %v6817_v52, %v6817_v52  ;;  %v3644_v54 = vcombine.high %v3636_v17, %v3636_v17  ;;  %v3645_v4 = vcombine.high %v3643_v37, %v3643_v37 }
 0x348   :  { %7681 = vst [vmem:[#allocation36_spill] sm:$0xff] %v7060_v44  ;;  %v7075_v13 = vrot.slane %v3597_v42, %v7611_v28  ;;  %v4309_v48 = vcombine.low %v7683_v62, %v6817_v52  ;;  %v7088_v14 = vrot.slane %v3636_v17, %v7611_v28  ;;  %v7091_v42 = vrot.slane %v3643_v37, %v7611_v28 }
 0x349   :  { %v4310_v40 = vcombine.low %v6831_v53, %v7684_v26  ;;  %v4317_v35 = vrot.slane %v4307_v55, %v7611_v28  ;;  %v4324_v44 = vrot.slane %v4308_v27, %v7611_v28  ;;  %v7098_v52 = vrot.slane %v3644_v54, %v7611_v28 }
 0x34a   :  { %v4331_v12 = vrot.slane %v4309_v48, %v7611_v28  ;;  %v7101_v53 = vrot.slane %v3645_v4, %v7611_v28  ;;  %v4356_v27 = vcombine.low %v6813_v24, %v6828_v59  ;;  %v4358_v54 = vcombine.low %v6825_v9, %v6841_v3 }
 0x34b   :  { %v4338_v62 = vrot.slane %v4310_v40, %v7611_v28  ;;  %v4339_v26 = vcombine.low %v4317_v35, %v4324_v44  ;;  %v5145_v40 = vcombine.high %v6813_v24, %v6828_v59  ;;  %v7685_v4 = vcombine.high %v6825_v9, %v6825_v9 }
 0x34c   :  { %v7686_v44 = vcombine.high %v6838_v11, %v6838_v11  ;;  %v4366_v59 = vrot.slane %v4356_v27, %v7611_v28  ;;  %v4380_v3 = vrot.slane %v4358_v54, %v7611_v28  ;;  %v7687_v9 = vcombine.high %v6849_v20, %v6849_v20 }
 0x34d   :  { %v4340_v55 = vcombine.low %v4331_v12, %v4338_v62  ;;  %v4359_v17 = vcombine.low %v7685_v4, %v6838_v11  ;;  %v4347_v12 = vrot.slane %v4339_v26, %v7611_v28  ;;  %v4373_v62 = vrot.slane %v5145_v40, %v7611_v28 }
 0x34e   :  { %v4405_v35 = vcombine.low %v6849_v20, %v7686_v44  ;;  %v4406_v4 = vcombine.low %v7687_v9, %v6846_v61  ;;  %v7688_v11 = vcombine.high %v6846_v61, %v6846_v61  ;;  %v4408_v27 = vcombine.low %v6868_v7, %v6880_v31 }
 0x34f   :  { %v4354_v24 = vrot.slane %v4340_v55, %v7611_v28  ;;  %v4387_v37 = vrot.slane %v4359_v17, %v7611_v28  ;;  %v4388_v55 = vcombine.low %v4366_v59, %v4373_v62  ;;  %v5146_v20 = vcombine.high %v6868_v7, %v6880_v31 }
 0x350   :  { %v4407_v26 = vcombine.low %v6852_v57, %v7688_v11  ;;  %v4415_v40 = vrot.slane %v4405_v35, %v7611_v28  ;;  %v4422_v17 = vrot.slane %v4406_v4, %v7611_v28  ;;  %v4436_v57 = vrot.slane %v4408_v27, %v7611_v28 }
 0x351   :  { %v7137_v44 = vcombine.low %v4347_v12, %v4354_v24  ;;  %v4389_v54 = vcombine.low %v4380_v3, %v4387_v37  ;;  %v4396_v61 = vrot.slane %v4388_v55, %v7611_v28  ;;  %v4455_v12 = vcombine.low %v6871_v60, %v6883_v46 }
 0x352   :  { %v4429_v48 = vrot.slane %v4407_v26, %v7611_v28  ;;  %v7689_v24 = vcombine.high %v6871_v60, %v6871_v60  ;;  %v4437_v59 = vcombine.low %v4415_v40, %v4422_v17  ;;  %v7690_v62 = vcombine.high %v6875_v18, %v6875_v18 }
 0x353   :  { %v4403_v37 = vrot.slane %v4389_v54, %v7611_v28  ;;  %v4464_v31 = vrot.slane %v5146_v20, %v7611_v28  ;;  %v4471_v9 = vrot.slane %v4455_v12, %v7611_v28  ;;  %v7691_v60 = vcombine.high %v6893_v58, %v6893_v58 }
 0x354   :  { %v4456_v35 = vcombine.low %v7689_v24, %v6875_v18  ;;  %v4457_v7 = vcombine.low %v6893_v58, %v7690_v62  ;;  %v4438_v3 = vcombine.low %v4429_v48, %v4436_v57  ;;  %v4445_v26 = vrot.slane %v4437_v59, %v7611_v28 }
 0x355   :  { %v4503_v4 = vcombine.low %v7691_v60, %v6890_v39  ;;  %v4404_v11 = vcombine.low %v4396_v61, %v4403_v37  ;;  %v7692_v18 = vcombine.high %v6890_v39, %v6890_v39  ;;  %v4486_v40 = vcombine.low %v4464_v31, %v4471_v9 }
 0x356   :  { %v4478_v46 = vrot.slane %v4456_v35, %v7611_v28  ;;  %v4485_v55 = vrot.slane %v4457_v7, %v7611_v28  ;;  %v4452_v48 = vrot.slane %v4438_v3, %v7611_v28  ;;  %v4505_v54 = vcombine.low %v6899_v8, %v6916_v19 }
 0x357   :  { %v4504_v27 = vcombine.low %v6904_v32, %v7692_v18  ;;  %v5147_v58 = vcombine.high %v6899_v8, %v6916_v19  ;;  %v4513_v20 = vrot.slane %v4503_v4, %v7611_v28  ;;  %v4552_v39 = vcombine.low %v6913_v22, %v6927_v30  ;;  %4949 = vst.msk [vmem:[%s7542_s18 + $0x38] sm:$0xff] %vm1045_vm8, %v4404_v11 }
 0x358   :  { %v4487_v17 = vcombine.low %v4478_v46, %v4485_v55  ;;  %v4453_v32 = vcombine.low %v4445_v26, %v4452_v48  ;;  %v4494_v57 = vrot.slane %v4486_v40, %v7611_v28  ;;  %v4527_v12 = vrot.slane %v4505_v54, %v7611_v28 }
 0x359   :  { %v4520_v61 = vrot.slane %v4504_v27, %v7611_v28  ;;  %v4534_v8 = vrot.slane %v5147_v58, %v7611_v28  ;;  %v7693_v35 = vcombine.high %v6913_v22, %v6913_v22  ;;  %v7694_v37 = vcombine.high %v6920_v1, %v6920_v1 }
 0x35a   :  { %v4501_v19 = vrot.slane %v4487_v17, %v7611_v28  ;;  %v7695_v7 = vcombine.high %v6935_v34, %v6935_v34  ;;  %v4562_v3 = vrot.slane %v4552_v39, %v7611_v28  ;;  %v7696_v9 = vcombine.high %v6932_v29, %v6932_v29  ;;  %4950 = vst.msk [vmem:[%s7542_s18 + $0x40] sm:$0xff] %vm1045_vm8, %v4453_v32 }
 0x35b   :  { %v4535_v24 = vcombine.low %v4513_v20, %v4520_v61  ;;  %v4553_v30 = vcombine.low %v7693_v35, %v6920_v1  ;;  %v4554_v59 = vcombine.low %v6935_v34, %v7694_v37  ;;  %v4536_v62 = vcombine.low %v4527_v12, %v4534_v8 }
 0x35c   :  { %v4555_v31 = vcombine.low %v7695_v7, %v6932_v29  ;;  %v4601_v46 = vcombine.low %v6941_v43, %v7696_v9  ;;  %v4502_v1 = vcombine.low %v4494_v57, %v4501_v19  ;;  %v4616_v43 = vcombine.low %v6946_v51, %v6946_v51 }
 0x35d   :  { %v4543_v22 = vrot.slane %v4535_v24, %v7611_v28  ;;  %v4569_v60 = vrot.slane %v4553_v30, %v7611_v28  ;;  %v4576_v34 = vrot.slane %v4554_v59, %v7611_v28  ;;  %v4550_v4 = vrot.slane %v4536_v62, %v7611_v28 }
 0x35e   :  { %v4583_v11 = vrot.slane %v4555_v31, %v7611_v28  ;;  %v4608_v29 = vrot.slane %v4601_v46, %v7611_v28  ;;  %v7697_v55 = vcombine.high %v6946_v51, %v6946_v51  ;;  %v7698_v27 = vcombine.high %v6956_v49, %v6956_v49  ;;  %4951 = vst.msk [vmem:[%s7542_s18 + $0x48] sm:$0xff] %vm1045_vm8, %v4502_v1 }
 0x35f   :  { %v4584_v26 = vcombine.low %v4562_v3, %v4569_v60  ;;  %v7699_v40 = vcombine.high %v6953_v41, %v6953_v41  ;;  %v4551_v58 = vcombine.low %v4543_v22, %v4550_v4  ;;  %v4626_v20 = vrot.slane %v4616_v43, %v7611_v28 }
 0x360   :  { %v4617_v18 = vcombine.low %v6956_v49, %v7697_v55  ;;  %v4618_v48 = vcombine.low %v7698_v27, %v6953_v41  ;;  %v4585_v17 = vcombine.low %v4576_v34, %v4583_v11  ;;  %v4615_v51 = vrot.slane %v4608_v29, %v7611_v28 }
 0x361   :  { %v4619_v54 = vcombine.low %v6966_v5, %v7699_v40  ;;  %v4592_v61 = vrot.slane %v4584_v26, %v7611_v28  ;;  %v4665_v32 = vcombine.low %v6975_v56, %v6987_v45  ;;  %v5148_v57 = vcombine.high %v6975_v56, %v6987_v45  ;;  %4952 = vst.msk [vmem:[%s7542_s18 + $0x50] sm:$0xff] %vm1045_vm8, %v4551_v58 }
 0x362   :  { %v4633_v49 = vrot.slane %v4617_v18, %v7611_v28  ;;  %v4640_v39 = vrot.slane %v4618_v48, %v7611_v28  ;;  %v4599_v5 = vrot.slane %v4585_v17, %v7611_v28  ;;  %v4667_v12 = vcombine.low %v6978_v16, %v6990_v63  ;;  %4955 = vst.msk [vmem:[%s7542_s18 + $0x60] sm:$0x3] %vm4954_vm14, %v4615_v51 }
 0x363   :  { %v4647_v41 = vrot.slane %v4619_v54, %v7611_v28  ;;  %v7700_v24 = vcombine.high %v6978_v16, %v6978_v16  ;;  %v7701_v63 = vcombine.high %v6982_v6, %v6982_v6  ;;  %v4675_v30 = vrot.slane %v4665_v32, %v7611_v28 }
 0x364   :  { %v4648_v8 = vcombine.low %v4626_v20, %v4633_v49  ;;  %v4600_v35 = vcombine.low %v4592_v61, %v4599_v5  ;;  %v4682_v37 = vrot.slane %v5148_v57, %v7611_v28  ;;  %v4689_v59 = vrot.slane %v4667_v12, %v7611_v28  ;;  %v7709_v57 = vld [vmem:[#allocation36_spill] sm:$0xff] }
 0x365   :  { %v4649_v19 = vcombine.low %v4640_v39, %v4647_v41  ;;  %v4668_v56 = vcombine.low %v7700_v24, %v6982_v6  ;;  %v4714_v45 = vcombine.low %v7000_v0, %v7701_v63  ;;  %v7702_v16 = vcombine.high %v7000_v0, %v7000_v0  ;;  %v7708_v39 = vld [vmem:[#allocation35_spill] sm:$0xff] }
 0x366   :  { %v4656_v62 = vrot.slane %v4648_v8, %v7611_v28  ;;  %v4697_v3 = vcombine.low %v4675_v30, %v4682_v37  ;;  %v7703_v9 = vcombine.high %v6997_v25, %v6997_v25  ;;  %v4717_v1 = vcombine.low %v7006_v33, %v7023_v38  ;;  %4953 = vst.msk [vmem:[%s7542_s18 + $0x58] sm:$0xff] %vm1045_vm8, %v4600_v35 }
 0x367   :  { %v4663_v7 = vrot.slane %v4649_v19, %v7611_v28  ;;  %v4696_v31 = vrot.slane %v4668_v56, %v7611_v28  ;;  %v4715_v6 = vcombine.low %v7702_v16, %v6997_v25  ;;  %v4724_v22 = vrot.slane %v4714_v45, %v7611_v28 }
 0x368   :  { %v4716_v46 = vcombine.low %v7011_v10, %v7703_v9  ;;  %v5149_v4 = vcombine.high %v7006_v33, %v7023_v38  ;;  %v4705_v25 = vrot.slane %v4697_v3, %v7611_v28  ;;  %v4745_v11 = vrot.slane %v4717_v1, %v7611_v28  ;;  %v7716_v1 = vld [vmem:[#allocation29_spill] sm:$0xff] }
 0x369   :  { %v4664_v60 = vcombine.low %v4656_v62, %v4663_v7  ;;  %v4698_v34 = vcombine.low %v4689_v59, %v4696_v31  ;;  %v4731_v0 = vrot.slane %v4715_v6, %v7611_v28  ;;  %v4764_v29 = vcombine.low %v7020_v15, %v7034_v23 }
 0x36a   :  { %v4738_v10 = vrot.slane %v4716_v46, %v7611_v28  ;;  %v7704_v55 = vcombine.high %v7020_v15, %v7020_v15  ;;  %v7705_v33 = vcombine.high %v7027_v50, %v7027_v50  ;;  %v4773_v48 = vrot.slane %v5149_v4, %v7611_v28 }
 0x36b   :  { %v4712_v43 = vrot.slane %v4698_v34, %v7611_v28  ;;  %v4746_v26 = vcombine.low %v4724_v22, %v4731_v0  ;;  %v4780_v40 = vrot.slane %v4764_v29, %v7611_v28  ;;  %v7706_v23 = vcombine.high %v7042_v2, %v7042_v2  ;;  %v7717_v22 = vld [vmem:[#allocation14_spill] sm:$0xff]  ;;  %v7721_v29 = vld [vmem:[#allocation15_spill] sm:$0xff] }
 0x36c   :  { %v4765_v18 = vcombine.low %v7704_v55, %v7027_v50  ;;  %v4766_v38 = vcombine.low %v7042_v2, %v7705_v33  ;;  %v4747_v27 = vcombine.low %v4738_v10, %v4745_v11  ;;  %v7707_v61 = vcombine.high %v7039_v47, %v7039_v47  ;;  %v7723_v33 = vld [vmem:[#allocation22_spill] sm:$0xff] }
 0x36d   :  { %v4812_v54 = vcombine.low %v7706_v23, %v7039_v47  ;;  %v4713_v58 = vcombine.low %v4705_v25, %v4712_v43  ;;  %v4754_v17 = vrot.slane %v4746_v26, %v7611_v28  ;;  %v4795_v20 = vcombine.low %v4773_v48, %v4780_v40  ;;  %v7718_v25 = vld [vmem:[#allocation21_spill] sm:$0xff]  ;;  %v7726_v40 = vld [vmem:[#allocation10_spill] sm:$0xff] }
 0x36e   :  { %v4787_v15 = vrot.slane %v4765_v18, %v7611_v28  ;;  %v4794_v51 = vrot.slane %v4766_v38, %v7611_v28  ;;  %v4761_v50 = vrot.slane %v4747_v27, %v7611_v28  ;;  %v4813_v49 = vcombine.low %v7048_v21, %v7707_v61  ;;  %v7722_v18 = vld [vmem:[#allocation6_spill] sm:$0xff]  ;;  %v7725_v48 = vld [vmem:[#allocation25_spill] sm:$0xff] }
 0x36f   :  { %v4814_v41 = vcombine.low %v7708_v39, %v7063_v36  ;;  %v5150_v5 = vcombine.high %v7708_v39, %v7063_v36  ;;  %v4822_v32 = vrot.slane %v4812_v54, %v7611_v28  ;;  %v4861_v12 = vcombine.low %v7709_v57, %v7075_v13  ;;  %4963 = vst.msk [vmem:[%s7542_s18 + $0xa0] sm:$0xff] %vm1045_vm8, %v4713_v58  ;;  %v4983_v61 = vld [vmem:[%s7539_s15] sm:$0x7f] }
 0x370   :  { %v4796_v2 = vcombine.low %v4787_v15, %v4794_v51  ;;  %v4762_v47 = vcombine.low %v4754_v17, %v4761_v50  ;;  %v4803_v21 = vrot.slane %v4795_v20, %v7611_v28  ;;  %v4829_v8 = vrot.slane %v4813_v49, %v7611_v28  ;;  %v5254_v17 = vld [vmem:[%s7596_s3 + $0x8] sm:$0x7f]  ;;  %v7727_v15 = vld [vmem:[#allocation7_spill] sm:$0xff]  ;;  %v7731_v39 = vld [vmem:[#allocation16_spill] sm:$0xff] }
 0x371   :  { %v4836_v19 = vrot.slane %v4814_v41, %v7611_v28  ;;  %v4843_v36 = vrot.slane %v5150_v5, %v7611_v28  ;;  %v7710_v13 = vcombine.high %v7709_v57, %v7709_v57  ;;  %v7711_v63 = vcombine.high %v7088_v14, %v7088_v14  ;;  %v7728_v51 = vld [vmem:[#allocation5_spill] sm:$0xff]  ;;  %v7730_v49 = vld [vmem:[#allocation31_spill] sm:$0xff] }
 0x372   :  { %v4810_v24 = vrot.slane %v4796_v2, %v7611_v28  ;;  %v4844_v35 = vcombine.low %v4822_v32, %v4829_v8  ;;  %v7712_v30 = vcombine.high %v7098_v52, %v7098_v52  ;;  %v4871_v59 = vrot.slane %v4861_v12, %v7611_v28  ;;  %4964 = vst.msk [vmem:[%s7542_s18 + $0xa8] sm:$0xff] %vm1045_vm8, %v4762_v47  ;;  %v5255_v5 = vld [vmem:[%s7596_s3 + $0x10] sm:$0x7f]  ;;  %v7732_v32 = vld [vmem:[#allocation8_spill] sm:$0xff]  ;;  %v7735_v8 = vld [vmem:[#allocation13_spill] sm:$0xff] }
 0x373   :  { %v4862_v56 = vcombine.low %v7710_v13, %v7088_v14  ;;  %v4863_v45 = vcombine.low %v7098_v52, %v7711_v63  ;;  %v7713_v62 = vcombine.high %v7091_v42, %v7091_v42  ;;  %v4845_v31 = vcombine.low %v4836_v19, %v4843_v36  ;;  %v7733_v57 = vld [vmem:[#allocation23_spill] sm:$0xff]  ;;  %v7736_v19 = vld [vmem:[#allocation28_spill] sm:$0xff]  ;;  %v4984_v36 = vld [vmem:[%s7539_s15 + $0x8] sm:$0x7f] }
 0x374   :  { %v4864_v37 = vcombine.low %v7712_v30, %v7091_v42  ;;  %v4811_v14 = vcombine.low %v4803_v21, %v4810_v24  ;;  %v4852_v52 = vrot.slane %v4844_v35, %v7611_v28  ;;  %v7714_v42 = vld [vmem:[#allocation20_spill] sm:$0xff]  ;;  %v2985_v34 = vmax.f32 %v7717_v22, %v7716_v1  ;;  %v7738_v13 = vld [vmem:[#allocation26_spill] sm:$0xff]  ;;  %v7741_v35 = vld [vmem:[#allocation17_spill] sm:$0xff] }
 0x375   :  { %v4910_v7 = vcombine.low %v7101_v53, %v7713_v62  ;;  %v4878_v16 = vrot.slane %v4862_v56, %v7611_v28  ;;  %v4885_v6 = vrot.slane %v4863_v45, %v7611_v28  ;;  %v7715_v53 = vrot.slane %v7714_v42, %v7611_v28  ;;  %v5256_v21 = vld [vmem:[%s7596_s3 + $0x38] sm:$0x7f]  ;;  %v4985_v62 = vld [vmem:[%s7539_s15 + $0x10] sm:$0x7f]  ;;  %v7747_v22 = vld [vmem:[#allocation33_spill] sm:$0xff] }
 0x376   :  { %v4892_v3 = vrot.slane %v4864_v37, %v7611_v28  ;;  %v4859_v0 = vrot.slane %v4845_v31, %v7611_v28  ;;  %v7719_v10 = vrot.slane %v7718_v25, %v7611_v28  ;;  %4965 = vst.msk [vmem:[%s7542_s18 + $0xb0] sm:$0xff] %vm1045_vm8, %v4811_v14  ;;  %v7724_v38 = vmax.f32 %v7722_v18, %v7723_v33  ;;  %v7739_v56 = vld [vmem:[#allocation11_spill] sm:$0xff]  ;;  %v7740_v45 = vld [vmem:[#allocation32_spill] sm:$0xff]  ;;  %v7742_v31 = vld [vmem:[#allocation9_spill] sm:$0xff] }
 0x377   :  { %v4917_v9 = vrot.slane %v4910_v7, %v7611_v28  ;;  %v4940_v46 = vsel %vm4939_vm15, %v7715_v53, %v7137_v44  ;;  %v4893_v4 = vcombine.low %v4871_v59, %v4878_v16  ;;  %v7720_v44 = vld [vmem:[#allocation30_spill] sm:$0xff]  ;;  %v2981_v23 = vmax.f32 %v7726_v40, %v7725_v48  ;;  %v5257_v37 = vld [vmem:[%s7596_s3 + $0x40] sm:$0x7f]  ;;  %v5258_v14 = vld [vmem:[%s7596_s3 + $0x18] sm:$0x7f] }
 0x378   :  { %v4941_v11 = vsel %vm4939_vm15, %v7719_v10, %v4664_v60  ;;  %4948 = vst.msk [vmem:[%s7542_s18 + $0x30] sm:$0xff] %vm1045_vm8, %v4940_v46  ;;  %v2986_v43 = vmax.f32 %v7721_v29, %v7720_v44  ;;  %v4894_v26 = vcombine.low %v4885_v6, %v4892_v3  ;;  %v5253_v60 = vld [vmem:[%s7596_s3] sm:$0x7f]  ;;  %v4860_v54 = vcombine.low %v4852_v52, %v4859_v0  ;;  %v5259_v3 = vld [vmem:[%s7596_s3 + $0x48] sm:$0x7f]  ;;  %v7745_v53 = vld [vmem:[#allocation27_spill] sm:$0xff] }
 0x379   :  { %v4924_v55 = vrot.slane %v4917_v9, %v7611_v28  ;;  %4962 = vst.msk [vmem:[%s7542_s18 + $0x98] sm:$0xff] %vm1045_vm8, %v4941_v11  ;;  %v4969_v27 = vmul.f32 %v5253_v60, %v7724_v38  ;;  %v4901_v58 = vrot.slane %v4893_v4, %v7611_v28  ;;  %v7729_v50 = vmax.f32 %v7727_v15, %v7728_v51  ;;  %v7743_v16 = vld [vmem:[#allocation24_spill] sm:$0xff]  ;;  %v5261_v44 = vld [vmem:[%s7596_s3 + $0x50] sm:$0x7f] }
 0x37a   :  { %v2987_v41 = vmax.f32 %v7731_v39, %v7730_v49  ;;  %v4908_v2 = vrot.slane %v4894_v26, %v7611_v28  ;;  %v7734_v12 = vmax.f32 %v7732_v32, %v7733_v57  ;;  %v7737_v28 = vmax.f32 %v7735_v8, %v7736_v19  ;;  %4966 = vst.msk [vmem:[%s7542_s18 + $0xb8] sm:$0xff] %vm1045_vm8, %v4860_v54  ;;  %v7746_v46 = vld [vmem:[#allocation12_spill] sm:$0xff]  ;;  %v7749_v18 = vld [vmem:[#allocation34_spill] sm:$0xff]  ;;  %v7750_v33 = vld [vmem:[#allocation19_spill] sm:$0xff] }
 0x37b   :  { %v4970_v20 = vmul.f32 %v5254_v17, %v7729_v50  ;;  %4968 = vst.msk [vmem:[%s7542_s18 + $0xc8] sm:$0x3] %vm4954_vm14, %v4924_v55  ;;  %v2982_v63 = vmax.f32 %v7739_v56, %v7738_v13  ;;  %v2988_v30 = vmax.f32 %v7741_v35, %v7740_v45  ;;  %v4977_v59 = vmul.f32 %v5257_v37, %v2985_v34  ;;  %v7748_v34 = vld [vmem:[#allocation18_spill] sm:$0xff]  ;;  %v5260_v4 = vld [vmem:[%s7596_s3 + $0x20] sm:$0x7f] }
 0x37c   :  { %v4971_v47 = vmul.f32 %v5255_v5, %v7734_v12  ;;  %v4976_v24 = vmul.f32 %v5256_v21, %v7737_v28  ;;  %v4909_v7 = vcombine.low %v4901_v58, %v4908_v2  ;;  %v7744_v6 = vmax.f32 %v7742_v31, %v7743_v16  ;;  %v4986_v10 = vld [vmem:[%s7539_s15 + $0x18] sm:$0x7f]  ;;  %v5264_v51 = vld [vmem:[%s7596_s3 + $0x30] sm:$0x7f]  ;;  %v4988_v49 = vld [vmem:[%s7539_s15 + $0x28] sm:$0x7f] }
 0x37d   :  { %v4978_v9 = vmul.f32 %v5259_v3, %v2986_v43  ;;  %v4990_v42 = vmul.f32 %v4983_v61, %v4969_v27  ;;  %v2983_v1 = vmax.f32 %v7746_v46, %v7745_v53  ;;  %v2989_v0 = vmax.f32 %v7748_v34, %v7747_v22  ;;  %v4987_v43 = vld [vmem:[%s7539_s15 + $0x20] sm:$0x7f]  ;;  %v5262_v27 = vld [vmem:[%s7596_s3 + $0x28] sm:$0x7f]  ;;  %v5263_v40 = vld [vmem:[%s7596_s3 + $0x58] sm:$0x7f] }
 0x37e   :  { %v4972_v52 = vmul.f32 %v5258_v14, %v7744_v6  ;;  %v4973_v25 = vmul.f32 %v5260_v4, %v2981_v23  ;;  %v4991_v11 = vmul.f32 %v4984_v36, %v4970_v20  ;;  %4967 = vst.msk [vmem:[%s7542_s18 + $0xc0] sm:$0xff] %vm1045_vm8, %v4909_v7  ;;  %v4979_v29 = vmul.f32 %v5261_v44, %v2987_v41  ;;  %v5265_v20 = vld [vmem:[%s7596_s3 + $0x60] sm:$0x7f]  ;;  %v5266_v12 = vld [vmem:[%s7596_s3 + $0x68] sm:$0x7f] }
 0x37f   :  { %v4992_v26 = vmul.f32 %v4985_v62, %v4971_v47  ;;  %v4997_v55 = vmul.f32 %v4983_v61, %v4976_v24  ;;  %v4998_v60 = vmul.f32 %v4984_v36, %v4977_v59  ;;  %v2990_v38 = vmax.f32 %v7750_v33, %v7749_v18  ;;  %v4989_v21 = vld [vmem:[%s7539_s15 + $0x30] sm:$0x7f]  ;;  %v5152_v33 = vld [vmem:[%s7541_s17] ss:$0 sm:$0xff] }
 0x380   :  { %v4974_v48 = vmul.f32 %v5262_v27, %v2982_v63  ;;  %v4980_v23 = vmul.f32 %v5263_v40, %v2988_v30  ;;  %v4993_v54 = vmul.f32 %v4986_v10, %v4972_v52  ;;  %v4999_v58 = vmul.f32 %v4985_v62, %v4978_v9 }
 0x381   :  { %v5004_v17 = vsel %vm92_vm0, %v4990_v42, 0.0  ;;  %v5005_v15 = vsel %vm92_vm0, %v4991_v11, 0.0  ;;  %v4975_v50 = vmul.f32 %v5264_v51, %v2983_v1  ;;  %v4981_v61 = vmul.f32 %v5265_v20, %v2989_v0 }
 0x382   :  { %v4994_v39 = vmul.f32 %v4987_v43, %v4973_v25  ;;  %v5006_v41 = vadd.f32 %v5005_v15, %v5004_v17  ;;  %v5000_v2 = vmul.f32 %v4986_v10, %v4979_v29  ;;  %v5007_v5 = vsel %vm92_vm0, %v4992_v26, 0.0  ;;  %v5151_v26 = vld [vmem:[%s7540_s16] ss:$0 sm:$0xff] }
 0x383   :  { %v5023_v32 = vsel %vm92_vm0, %v4997_v55, 0.0  ;;  %v5024_v57 = vsel %vm92_vm0, %v4998_v60, 0.0  ;;  %v4982_v47 = vmul.f32 %v5266_v12, %v2990_v38  ;;  %v4995_v28 = vmul.f32 %v4988_v49, %v4974_v48 }
 0x384   :  { %v5008_v8 = vadd.f32 %v5007_v5, %v5006_v41  ;;  %v5025_v19 = vadd.f32 %v5024_v57, %v5023_v32  ;;  %v5001_v24 = vmul.f32 %v4987_v43, %v4980_v23  ;;  %v5009_v36 = vsel %vm92_vm0, %v4993_v54, 0.0 }
 0x385   :  { %v5026_v13 = vsel %vm92_vm0, %v4999_v58, 0.0  ;;  %v4996_v45 = vmul.f32 %v4989_v21, %v4975_v50  ;;  %v5002_v35 = vmul.f32 %v4988_v49, %v4981_v61  ;;  %v5011_v30 = vsel %vm92_vm0, %v4994_v39, 0.0 }
 0x386   :  { %v5010_v56 = vadd.f32 %v5009_v36, %v5008_v8  ;;  %v5027_v63 = vadd.f32 %v5026_v13, %v5025_v19  ;;  %v5028_v37 = vsel %vm92_vm0, %v5000_v2, 0.0  ;;  %v5003_v7 = vmul.f32 %v4989_v21, %v4982_v47 }
 0x387   :  { %v5013_v14 = vsel %vm92_vm0, %v4995_v28, 0.0  ;;  %v5030_v31 = vsel %vm92_vm0, %v5001_v24, 0.0  ;;  %v5015_v52 = vsel %vm92_vm0, %v4996_v45, 0.0  ;;  %v5032_v3 = vsel %vm92_vm0, %v5002_v35, 0.0 }
 0x388   :  { %v5012_v59 = vadd.f32 %v5011_v30, %v5010_v56  ;;  %v5029_v62 = vadd.f32 %v5028_v37, %v5027_v63  ;;  %v5034_v53 = vsel %vm92_vm0, %v5003_v7, 0.0 }
 0x38a   :  { %v5014_v16 = vadd.f32 %v5013_v14, %v5012_v59  ;;  %v5031_v6 = vadd.f32 %v5030_v31, %v5029_v62 }
 0x38c   :  { %v5016_v9 = vadd.f32 %v5015_v52, %v5014_v16  ;;  %v5033_v42 = vadd.f32 %v5032_v3, %v5031_v6 }
 0x38e   :  { %v5017_v46 = vrot.slane %v5016_v9, 4  ;;  %v5035_v1 = vadd.f32 %v5034_v53, %v5033_v42 }
 0x390   :  { %v5018_v22 = vadd.f32 %v5017_v46, %v5016_v9  ;;  %v5036_v34 = vrot.slane %v5035_v1, 4 }
 0x392   :  { %v5019_v0 = vrot.slane %v5018_v22, 2  ;;  %v5037_v4 = vadd.f32 %v5036_v34, %v5035_v1 }
 0x394   :  { %v5020_v25 = vadd.f32 %v5019_v0, %v5018_v22  ;;  %v5038_v10 = vrot.slane %v5037_v4, 2 }
 0x396   :  { %v5021_v11 = vrot.slane %v5020_v25, 1  ;;  %v5039_v44 = vadd.f32 %v5038_v10, %v5037_v4 }
 0x398   :  { %v5022_v29 = vadd.f32 %v5021_v11, %v5020_v25  ;;  %v5040_v43 = vrot.slane %v5039_v44, 1 }
 0x39a   :  { %v5041_v55 = vadd.f32 %v5040_v43, %v5039_v44  ;;  %v5049_v60 = vmul.f32 %v5151_v26, %v5022_v29 }
 0x39c   :  { %v5050_v18 = vmul.f32 %v5151_v26, %v5041_v55  ;;  %v5058_v27 = vadd.f32 %v5152_v33, %v5049_v60 }
 0x39e   :  { %v5059_v38 = vadd.f32 %v5152_v33, %v5050_v18 }
 0x3a0   :  { %v5062_v48 = vrot.slane %v5059_v38, 7 }
 0x3a2   :  { %v5063_v40 = vsel %vm913_vm1, %v5062_v48, %v5058_v27 }
 0x3a3   :  { %5065 = vst.msk [vmem:[#allocation2] sm:$0x3] %vm4954_vm14, %v5063_v40 }
 0x3a4   :  { %5278 = shalt.err (!%p5275_p4)
}
 0x3a5   :  { %s5279_s17 = scalar_lea.hbm %s7543_s19, 32 }
 0x3a6   :  { %p5280_p5 = scmp.ne.s32.totalorder %s7543_s19, %s5279_s17  ;;  %p5283_p6 = scmp.lt.u32.totalorder %s5279_s17, %s7543_s19 }
 0x3a8   :  { %p5285_p7 = pnand %p5283_p6, %p5280_p5 }
 0x3aa   :  { %5288 = shalt.err (!%p5285_p7)
}
 0x3ab   :  { %5077 = dma.vmem_to_hbm [thread:$0]  %s5075_s27, 32, %s7543_s19, [#allocation3]  }
 0x3ac   :  { %5289 = dma.done.wait [#allocation3], 32  }
 0x3ad   :  { %5290 = vsyncadd [#allocation3], 4294967264 }
 0x3ae   :  { %5083 = vsyncpa [#allocation3], 1 }

</bundles_post_ra>
